<compile_context>
chip_gen: v5e
topology: v5e:2x2
jax: 0.10.0
libtpu: 0.0.40
codegen_flags: <defaults>
</compile_context>

<pallas_src>
import math
import functools

import jax
import jax.numpy as jnp
import numpy as np
from jax.experimental import pallas as pl
from jax.experimental.pallas import tpu as pltpu

_LANE = 128
_BLOCK_TARGET_BYTES = 4 * 1024 * 1024   # ~4 MiB output block per grid step


def _pos_embed_kernel(rows_ref, consts_ref, o_ref, *, num_pos_feats):
    """Fill one lane-dense (C, tile_hw) output block.

    rows_ref   : (2, tile_hw)           row 0 = y_embed, row 1 = x_embed per flat pos
    consts_ref : (num_pos_feats, 2)     col 0 = 1/dim_t, col 1 = sin/cos phase
    o_ref      : (2*num_pos_feats, tile_hw)
    """
    npf = num_pos_feats
    consts = consts_ref[...]
    inv_dim_t = consts[:, 0:1]                      # (npf, 1)
    phase = consts[:, 1:2]                          # (npf, 1)
    row_y = rows_ref[0:1, :]                        # (1, tile_hw)
    row_x = rows_ref[1:2, :]                        # (1, tile_hw)

    # One transcendental per element; cos(v) == sin(v + pi/2) folded via phase.
    val_y = jnp.sin(row_y * inv_dim_t + phase)      # (npf, tile_hw)  y-half channels
    val_x = jnp.sin(row_x * inv_dim_t + phase)      # (npf, tile_hw)  x-half channels

    if npf % 8 == 0:
        # Sublane-aligned static slices -> two plain full-lane stores.
        o_ref[0:npf, :] = val_y.astype(o_ref.dtype)
        o_ref[npf:2 * npf, :] = val_x.astype(o_ref.dtype)
    else:
        o_ref[...] = jnp.concatenate([val_y, val_x], axis=0).astype(o_ref.dtype)


def _choose_tiling(hw, c, itemsize):
    """Pick a 128-lane-aligned tile for the flat spatial axis."""
    hw_pad = -(-hw // _LANE) * _LANE
    n_lane_blocks = hw_pad // _LANE
    target_lanes = max(_LANE, (_BLOCK_TARGET_BYTES // (c * itemsize)) // _LANE * _LANE)
    tiles_wanted = -(-hw_pad // target_lanes)
    if tiles_wanted == 1 and n_lane_blocks >= 2:
        tiles_wanted = 2                      # let v7x's 2 TCs share the parallel axis
    blocks_per_tile = -(-n_lane_blocks // tiles_wanted)
    tile_hw = blocks_per_tile * _LANE
    num_tiles = -(-hw_pad // tile_hw)
    hw_padded = num_tiles * tile_hw           # exact multiple of tile_hw -> no OOB tail
    return tile_hw, num_tiles, hw_padded


def position_embedding_sine(x, num_pos_feats=64, temperature=10000,
                            normalize=False, scale=None,
                            out_dtype=jnp.float32, expand_batch=True):
    """x: (B, C_in, H, W) array (only its shape matters; mask=None path).

    Returns pos: (B, 2*num_pos_feats, H, W) in `out_dtype` (NCHW, PyTorch order).
    With expand_batch=False returns (1, 2*num_pos_feats, H, W) (result is
    batch-invariant; broadcast in the consumer to avoid B HBM copies).
    """
    if scale is not None and normalize is False:
        raise ValueError("normalize should be True if scale is passed")
    if scale is None:
        scale = 2 * math.pi

    B, _, H, W = x.shape
    npf = num_pos_feats
    C = 2 * npf
    HW = H * W

    itemsize = np.dtype(out_dtype).itemsize
    tile_hw, num_tiles, hw_padded = _choose_tiling(HW, C, itemsize)

    # ---- trace-time constants (numpy float64 -> float32; all tiny) ----
    eps = 1e-6
    y_mul = (scale / (H + eps)) if normalize else 1.0
    x_mul = (scale / (W + eps)) if normalize else 1.0
    s = np.minimum(np.arange(hw_padded), HW - 1)          # clamp the pad region
    row_y = ((s // W) + 1).astype(np.float64) * y_mul     # cumsum of ones along H
    row_x = ((s % W) + 1).astype(np.float64) * x_mul      # cumsum of ones along W
    rows = jnp.asarray(np.stack([row_y, row_x]).astype(np.float32))   # (2, hw_padded)

    d = np.arange(npf, dtype=np.float64)
    dim_t = np.asarray(temperature, np.float64) ** (2.0 * np.floor(d / 2.0) / npf)
    phase = np.where(np.arange(npf) % 2 == 0, 0.0, np.pi / 2.0)       # even->sin, odd->cos
    consts = jnp.asarray(np.stack([1.0 / dim_t, phase], axis=1).astype(np.float32))  # (npf, 2)

    kernel = functools.partial(_pos_embed_kernel, num_pos_feats=npf)

    pos_flat = pl.pallas_call(
        kernel,
        out_shape=jax.ShapeDtypeStruct((C, hw_padded), out_dtype),
        grid=(num_tiles,),
        in_specs=[pl.BlockSpec((2, tile_hw), lambda t: (0, t)),
                  pl.BlockSpec((npf, 2), lambda t: (0, 0))],
        out_specs=pl.BlockSpec((C, tile_hw), lambda t: (0, t)),
        compiler_params=pltpu.CompilerParams(
            dimension_semantics=("parallel",),
            vmem_limit_bytes=32 * 1024 * 1024),
    )(rows, consts)

    # Drop lane padding (no-op when HW already a multiple of the tile) + free reshape.
    if hw_padded != HW:
        pos_flat = pos_flat[:, :HW]
    pos = pos_flat.reshape(C, H, W)

    if not expand_batch:
        return pos[None]
    # Batch-invariant; broadcast fuses into consumers under jit.
    return jnp.broadcast_to(pos[None], (B, C, H, W))


def _reference(x, num_pos_feats=64, temperature=10000, normalize=False, scale=None):
    """Pure-numpy port of the PyTorch forward (mask=None) for verification."""
    if scale is None:
        scale = 2 * math.pi
    B, _, H, W = x.shape
    not_mask = np.ones((B, H, W), dtype=np.float32)
    y_embed = not_mask.cumsum(1)
    x_embed = not_mask.cumsum(2)
    if normalize:
        eps = 1e-6
        y_embed = y_embed / (y_embed[:, -1:, :] + eps) * scale
        x_embed = x_embed / (x_embed[:, :, -1:] + eps) * scale
    dim_t = np.arange(num_pos_feats, dtype=np.float32)
    dim_t = temperature ** (2 * np.floor(dim_t / 2) / num_pos_feats)
    pos_x = x_embed[:, :, :, None] / dim_t
    pos_y = y_embed[:, :, :, None] / dim_t
    pos_x = np.stack((np.sin(pos_x[:, :, :, 0::2]),
                      np.cos(pos_x[:, :, :, 1::2])), axis=4).reshape(B, H, W, -1)
    pos_y = np.stack((np.sin(pos_y[:, :, :, 0::2]),
                      np.cos(pos_y[:, :, :, 1::2])), axis=4).reshape(B, H, W, -1)
    pos = np.concatenate((pos_y, pos_x), axis=3).transpose(0, 3, 1, 2)
    return pos.astype(np.float32)


if __name__ == "__main__":
    key = jax.random.PRNGKey(0)
    # x only supplies the shape (B, C, H, W); values are irrelevant to the output.
    x = jax.random.normal(key, (2, 4, 16, 16), dtype=jnp.float32)
    num_pos_feats = 64

    # normalize=False (module default)
    pos = position_embedding_sine(x, num_pos_feats=num_pos_feats,
                                  temperature=10000, normalize=False)
    pos = jax.block_until_ready(pos)
    assert pos.shape == (2, 2 * num_pos_feats, 16, 16), pos.shape
    ref = _reference(np.asarray(x), num_pos_feats=num_pos_feats,
                     temperature=10000, normalize=False)
    np.testing.assert_allclose(np.asarray(pos), ref, rtol=2e-4, atol=2e-4)

    # normalize=True (common Mask2Former config)
    pos_n = position_embedding_sine(x, num_pos_feats=num_pos_feats,
                                    temperature=10000, normalize=True)
    pos_n = jax.block_until_ready(pos_n)
    ref_n = _reference(np.asarray(x), num_pos_feats=num_pos_feats,
                       temperature=10000, normalize=True)
    np.testing.assert_allclose(np.asarray(pos_n), ref_n, rtol=2e-4, atol=2e-4)

    # Non-128-multiple spatial size -> exercises lane padding + wrapper slice.
    x2 = jax.random.normal(key, (1, 3, 10, 12), dtype=jnp.float32)
    pos2 = position_embedding_sine(x2, num_pos_feats=num_pos_feats,
                                   temperature=10000, normalize=True)
    pos2 = jax.block_until_ready(pos2)
    ref2 = _reference(np.asarray(x2), num_pos_feats=num_pos_feats,
                      temperature=10000, normalize=True)
    np.testing.assert_allclose(np.asarray(pos2), ref2, rtol=2e-4, atol=2e-4)

    print("KERNEL_OK")
</pallas_src>

<mosaic_0001>
module attributes {stable_mosaic.version = 11 : i64} {
  func.func @_pos_embed_kernel(%arg0: i32, %arg1: memref<2x128xf32, #tpu.memory_space<vmem>>, %arg2: memref<64x2xf32, #tpu.memory_space<vmem>>, %arg3: memref<128x128xf32, #tpu.memory_space<vmem>>) attributes {dimension_semantics = [#tpu.dimension_semantics<parallel>], iteration_bounds = array<i64: 2>, scalar_prefetch = 0 : i64, scratch_operands = 0 : i64, tpu.core_type = #tpu.core_type<tc>, window_params = [{transform_indices = @transform_0, window_bounds = array<i64: 2, 128>}, {pipeline_mode = #tpu.pipeline_mode<synchronous>, transform_indices = @transform_1, window_bounds = array<i64: 64, 2>}, {transform_indices = @transform_2, window_bounds = array<i64: 128, 128>}]} {
    %c0 = arith.constant 0 : index
    %c0_0 = arith.constant 0 : index
    %0 = vector.load %arg2[%c0, %c0_0] : memref<64x2xf32, #tpu.memory_space<vmem>>, vector<64x2xf32>
    %1 = vector.extract_strided_slice %0 {offsets = [0, 0], sizes = [64, 1], strides = [1, 1]} : vector<64x2xf32> to vector<64x1xf32>
    %2 = vector.extract_strided_slice %0 {offsets = [0, 1], sizes = [64, 1], strides = [1, 1]} : vector<64x2xf32> to vector<64x1xf32>
    %c0_1 = arith.constant 0 : index
    %c0_2 = arith.constant 0 : index
    %3 = vector.load %arg1[%c0_1, %c0_2] : memref<2x128xf32, #tpu.memory_space<vmem>>, vector<1x128xf32>
    %c1 = arith.constant 1 : index
    %c0_3 = arith.constant 0 : index
    %4 = vector.load %arg1[%c1, %c0_3] : memref<2x128xf32, #tpu.memory_space<vmem>>, vector<1x128xf32>
    %5 = vector.broadcast %3 : vector<1x128xf32> to vector<64x128xf32>
    %6 = vector.broadcast %1 : vector<64x1xf32> to vector<64x128xf32>
    %7 = arith.mulf %5, %6 : vector<64x128xf32>
    %8 = vector.broadcast %2 : vector<64x1xf32> to vector<64x128xf32>
    %9 = arith.addf %7, %8 : vector<64x128xf32>
    %10 = math.sin %9 : vector<64x128xf32>
    %11 = vector.broadcast %4 : vector<1x128xf32> to vector<64x128xf32>
    %12 = vector.broadcast %1 : vector<64x1xf32> to vector<64x128xf32>
    %13 = arith.mulf %11, %12 : vector<64x128xf32>
    %14 = vector.broadcast %2 : vector<64x1xf32> to vector<64x128xf32>
    %15 = arith.addf %13, %14 : vector<64x128xf32>
    %16 = math.sin %15 : vector<64x128xf32>
    %c0_4 = arith.constant 0 : index
    %c0_5 = arith.constant 0 : index
    %17 = vector.load %arg3[%c0_4, %c0_5] : memref<128x128xf32, #tpu.memory_space<vmem>>, vector<64x128xf32>
    tpu.vector_store %arg3[%c0_4, %c0_5], %10 {strides = array<i32>} : memref<128x128xf32, #tpu.memory_space<vmem>>, vector<64x128xf32>,
    %c64 = arith.constant 64 : index
    %c0_6 = arith.constant 0 : index
    %18 = vector.load %arg3[%c64, %c0_6] : memref<128x128xf32, #tpu.memory_space<vmem>>, vector<64x128xf32>
    tpu.vector_store %arg3[%c64, %c0_6], %16 {strides = array<i32>} : memref<128x128xf32, #tpu.memory_space<vmem>>, vector<64x128xf32>,
    return
  }
  func.func @transform_0(%arg0: i32) -> (i32, i32) {
    %c0_i32 = arith.constant 0 : i32
    %c0_i32_0 = arith.constant 0 : i32
    return %c0_i32, %arg0 : i32, i32
  }
  func.func @transform_1(%arg0: i32) -> (i32, i32) {
    %c0_i32 = arith.constant 0 : i32
    %c0_i32_0 = arith.constant 0 : i32
    %c0_i32_1 = arith.constant 0 : i32
    return %c0_i32, %c0_i32_0 : i32, i32
  }
  func.func @transform_2(%arg0: i32) -> (i32, i32) {
    %c0_i32 = arith.constant 0 : i32
    %c0_i32_0 = arith.constant 0 : i32
    return %c0_i32, %arg0 : i32, i32
  }
}

</mosaic_0001>

<bundles_post_ra>
// kernel: tpu_custom_call.1
= control target key start
LH: loop header
LB: loop body
LE: loop exit
PB: predicated region body
PF: predicated region fallthrough
CT: control target
= control target key end

     0   :  { %7 = vsyncpa [#allocation3], 0  ;;  %s5072_s0 = inlined_call_operand.vmem [shape: f32[2,256], index: 0, kind: input, shape index: {}]   ;;  %s5073_s1 = inlined_call_operand.vmem [shape: f32[64,2], index: 1, kind: input, shape index: {}]   ;;  %s5074_s2 = inlined_call_operand.hbm [shape: f32[128,256], index: 2, kind: output, shape index: {}]  }
   0x1   :  { %9 = vsyncpa [#allocation3 + $0x1], 0  ;;  %s3040_s9 = smov 0   ;;  %s3042_s10 = smov 0  }
   0x2   :  { %s3044_s11 = smov 0   ;;  %s3046_s12 = smov 0  }
   0x3 LB: > { %s3061_s13 = sadd.s32 4294967295, %s3012_s12   ;;  %s2828_s14 = sadd.s32 4294967294, %s3012_s12   ;;  %s3012_s12 = sphi %s3046_s12, %s5110_s12   ;;  %s3008_s11 = sphi %s3044_s11, %s5109_s11   ;;  %s3004_s10 = sphi %s3042_s10, %s5108_s10   ;;  %s3000_s9 = sphi %s3040_s9, %s5107_s9  }
   0x4   : > { %s3065_s15 = sadd.s32 1, %s3012_s12   ;;  %s69_s16 = sadd.s32 1, %s3008_s11 }
   0x5   : > { %s66_s17 = ssub.s32 %s3012_s12, %s3065_s15  ;;  %p79_p0 = scmp.ne.s32.totalorder %s3008_s11, %s3004_s10 }
   0x6   : > { %p67_p1 = scmp.eq.s32.totalorder %s66_s17, 0  ;;  %p80_p2 = scmp.eq.s32.totalorder %s3061_s13, 1 }
   0x7   : > { %p85_p3 = scmp.ne.s32.totalorder %s3004_s10, %s3000_s9  ;;  %p86_p4 = scmp.eq.s32.totalorder %s2828_s14, 1 }
   0x8   : > { %s3076_s18 = scalar_select %p67_p1, %s3008_s11, %s69_s16  }
   0x9   : > { %p3078_p5 = por %p80_p2, %p79_p0  ;;  %p3082_p6 = por %p86_p4, %p85_p3 }
   0xa   : > { %p2831_p7 = scmp.ge.s32.totalorder %s3012_s12, 1  ;;  %p114_p8 = scmp.lt.s32.totalorder %s3012_s12, 3 }
   0xc   : > { %p115_p9 = pnand %p2831_p7, %p114_p8 }
   0xd   : > { %p135_p10 = scmp.lt.s32.totalorder (!%p115_p9), %s3061_s13, 1  ;;  %s132_s23 = sand.u32 (!%p115_p9), 1, %s3004_s10  }
   0xe   : > { %118 = sbr.rel (%p115_p9) target bundleno = 788 (0x314), region = 28  ;;  %s2832_s24 = sshll.u32 (!%p115_p9), %s132_s23, 7 }
   0xf   : > { %s3456_s25 = scalar_lea.vmem (!%p115_p9), [#allocation2], %s2832_s24  ;;  %s2883_s26 = sshll.u32 (!%p115_p9), %s3061_s13, 3 }
  0x10   : > { %s2762_s29 = scalar_lea.hbm (!%p115_p9), %s5074_s2, %s2883_s26  ;;  %s2763_s30 = sshll.u32 (!%p115_p9), %s3456_s25, 4  ;;  %s5038_s30 = int_to_ptr.vmem [resolvable:$true] %s2763_s30 }
  0x11   : > { %s2970_s8 = scalar_lea.hbm (!%p115_p9), %s5074_s2, 256 }
  0x13   : > { %v143_v0 = vld [vmem:[%s5073_s1 + $0x20] sm:$0xff]  ;;  %v141_v1 = vld [vmem:[%s5073_s1 + $0x10] sm:$0xff]  ;;  %v3014_v3 = vmov 0   ;;  %s136_s27 = scalar_select %p135_p10, %s3061_s13, 1  ;;  %v144_v4 = vld [vmem:[%s5073_s1 + $0x28] sm:$0xff]  ;;  %v3015_v9 = vmov 1  }
  0x14   : > { %v139_v2 = vld [vmem:[%s5073_s1] sm:$0xff]  ;;  %2938 = vset.pattern.permute.xlu2 %v3014_v3  ;;  %2937 = vset.pattern.permute.xlu1 %v3014_v3  ;;  %v142_v5 = vld [vmem:[%s5073_s1 + $0x18] sm:$0xff]  ;;  %v140_v6 = vld [vmem:[%s5073_s1 + $0x8] sm:$0xff]  ;;  %v3016_v44 = vmov 683565275   ;;  %s2752_s13 = scalar_lea.sflag [#allocation3], %s132_s23 }
  0x15   : > { %2936 = vset.pattern.permute.xlu0 %v3014_v3  ;;  %172 = vperm.xlu2 %2938, %v143_v0   ;;  %s2833_s28 = sshll.u32 %s136_s27, 1  ;;  %v146_v7 = vld [vmem:[%s5073_s1 + $0x38] sm:$0xff]  ;;  %v145_v8 = vld [vmem:[%s5073_s1 + $0x30] sm:$0xff]  ;;  %v3017_v46 = vmov 2475754826  }
  0x16   : > { %162 = vperm.xlu1 %2937, %v141_v1   ;;  %152 = vperm.xlu0 %2936, %v139_v2   ;;  %s3105_s3 = scalar_lea.vmem %s5072_s0, %s2833_s28  ;;  %v3018_v48 = vmov 2131351028   ;;  %v3019_v51 = vmov 2102212464   ;;  %v3020_v53 = vmov 920167782  }
  0x17   : > { %v3127_v12 = vld [vmem:[%s3105_s3] ss:$0 sm:$0xff]  ;;  %v3130_v13 = vld [vmem:[%s3105_s3 + $0x1] ss:$0 sm:$0xff]  ;;  %v3021_v62 = vmov 1326507024  }
  0x1d   : > { %177 = vperm.xlu2 %2938, %v144_v4  }
  0x1e   : > { %167 = vperm.xlu1 %2937, %v142_v5   ;;  %157 = vperm.xlu0 %2936, %v140_v6  }
  0x25   : > { %2939 = vset.pattern.permute.xlu2 %v3015_v9 }
  0x26   : > { %187 = vperm.xlu1 %2937, %v146_v7   ;;  %182 = vperm.xlu0 %2936, %v145_v8  }
  0x27   : > { %199 = vperm.xlu2 %2939, %v139_v2  }
  0x2e   : > { %2941 = vset.pattern.permute.xlu1 %v3015_v9  ;;  %2940 = vset.pattern.permute.xlu0 %v3015_v9 }
  0x2f   : > { %207 = vperm.xlu1 %2941, %v141_v1   ;;  %211 = vperm.xlu2 %2939, %v142_v5  }
  0x30   : > { %203 = vperm.xlu0 %2940, %v140_v6  }
  0x37   : > { %215 = vperm.xlu1 %2941, %v143_v0   ;;  %219 = vperm.xlu2 %2939, %v144_v4  }
  0x38   : > { %223 = vperm.xlu0 %2940, %v145_v8  }
  0x3f   : > { %227 = vperm.xlu1 %2941, %v146_v7  }
  0x6f   : > { %v3122_v10 = vpop.permute.xlu2 %172 }
  0x77   : > { %v3124_v11 = vpop.permute.xlu2 %177 }
  0x81   : > { %v200_v18 = vpop.permute.xlu2 %199 }
  0x88   : > { %v153_v14 = vpop.permute.xlu0 %152  ;;  %v3132_v15 = vpop.permute.xlu1 %162 }
  0x89   : > { %v190_v16 = vmul.f32 %v3127_v12, %v153_v14  ;;  %v1479_v17 = vmul.f32 %v3130_v13, %v153_v14  ;;  %v3161_v50 = vpop.permute.xlu2 %211 }
  0x8b   : > { %v3136_v19 = vadd.f32 %v200_v18, %v190_v16  ;;  %v3138_v20 = vadd.f32 %v1479_v17, %v200_v18 }
  0x8d   : > { %v238_v21 = vand.u32 2147483647, %v3136_v19  ;;  %v241_v22 = vand.u32 2139095040, %v3136_v19  ;;  %v1495_v23 = vand.u32 2147483647, %v3138_v20  ;;  %v1498_v24 = vand.u32 2139095040, %v3138_v20 }
  0x8f   : > { %v242_v25 = vshrl.u32 %v241_v22, 23  ;;  %v245_v26 = vand.u32 8388607, %v238_v21  ;;  %v1499_v27 = vshrl.u32 %v1498_v24, 23  ;;  %v1502_v30 = vand.u32 8388607, %v1495_v23 }
  0x90   : > { %v3148_v33 = vpop.permute.xlu1 %167 }
  0x91   : > { %v2834_v28 = vadd.s32 4294967169, %v242_v25  ;;  %v2858_v29 = vadd.s32 4294967169, %v1499_v27  ;;  %v246_v31 = vor.u32 8388608, %v245_v26  ;;  %v1503_v36 = vor.u32 8388608, %v1502_v30 }
  0x92   : > { %v193_v37 = vmul.f32 %v3127_v12, %v3148_v33 }
  0x93   : > { %v248_v32 = vadd.s32 1, %v2834_v28  ;;  %v1505_v34 = vadd.s32 1, %v2858_v29  ;;  %v3152_v39 = vshll.u32 %v246_v31, 8  ;;  %v3165_v55 = vshll.u32 %v1503_v36, 8 }
  0x94   : > { %v3168_v56 = vadd.f32 %v3161_v50, %v193_v37 }
  0x95   : > { %vm249_vm0 = vcmp.gt.s32.totalorder %v248_v32, 0  ;;  %vm1506_vm1 = vcmp.gt.s32.totalorder %v1505_v34, 0  ;;  %v287_v60 = vand.u32 65535, %v3152_v39  ;;  %v288_v7 = vshrl.u32 %v3152_v39, 16 }
  0x96   : > { %v250_v35 = vsel %vm249_vm0, %v248_v32, 0  ;;  %v1507_v40 = vsel %vm1506_vm1, %v1505_v34, 0  ;;  %v3212_v31 = vand.u32 65535, %v3165_v55  ;;  %vm240_vm0 = vcmp.lt.s32.totalorder %v3136_v19, 0 }
  0x97   : > { %v252_v38 = vand.u32 31, %v250_v35  ;;  %v3154_v41 = vshrl.u32 %v250_v35, 5  ;;  %v3156_v42 = vand.u32 31, %v1507_v40 }
  0x99   : > { %v253_v43 = vsub.s32 32, %v252_v38  ;;  %v255_v45 = vshll.u32 %v3016_v44, %v252_v38  ;;  %v258_v47 = vshll.u32 %v3017_v46, %v252_v38  ;;  %v261_v49 = vshll.u32 %v3018_v48, %v252_v38 }
  0x9a   : > { %v264_v52 = vshll.u32 %v3019_v51, %v252_v38  ;;  %v267_v54 = vshll.u32 %v3020_v53, %v252_v38  ;;  %vm270_vm2 = vcmp.lt.s32.totalorder %v3154_v41, 1  ;;  %vm273_vm3 = vcmp.lt.s32.totalorder %v3154_v41, 4 }
  0x9b   : > { %v256_v57 = vshrl.u32 %v3017_v46, %v253_v43  ;;  %v259_v58 = vshrl.u32 %v3018_v48, %v253_v43  ;;  %v262_v59 = vshrl.u32 %v3019_v51, %v253_v43  ;;  %v265_v61 = vshrl.u32 %v3020_v53, %v253_v43 }
  0x9c   : > { %v268_v63 = vshrl.u32 %v3021_v62, %v253_v43  ;;  %v3179_v4 = vsub.s32 32, %v3156_v42  ;;  %vm272_vm4 = vcmp.lt.s32.totalorder %v3154_v41, 3  ;;  %v254_v8 = vshrl.u32 %v3016_v44, %v253_v43 }
  0x9d   : > { %v257_v0 = vor.u32 %v256_v57, %v255_v45  ;;  %v260_v1 = vor.u32 %v259_v58, %v258_v47  ;;  %v263_v2 = vor.u32 %v262_v59, %v261_v49  ;;  %v266_v5 = vor.u32 %v265_v61, %v264_v52 }
  0x9e   : > { %v269_v6 = vor.u32 %v268_v63, %v267_v54  ;;  %vm271_vm5 = vcmp.lt.s32.totalorder %v3154_v41, 2  ;;  %v1512_v18 = vshll.u32 %v3016_v44, %v3156_v42  ;;  %v1515_v22 = vshll.u32 %v3017_v46, %v3156_v42 }
  0x9f   : > { %v278_v9 = vsel %vm270_vm2, %v257_v0, %v260_v1  ;;  %v282_v14 = vsel %vm270_vm2, %v260_v1, %v263_v2  ;;  %v279_v16 = vsel %vm273_vm3, %v266_v5, 920167782  ;;  %v275_v24 = vsel %vm273_vm3, %v263_v2, 2102212464 }
  0xa0   : > { %v283_v17 = vsel %vm273_vm3, %v269_v6, 1326507024  ;;  %v280_v25 = vsel %vm272_vm4, %v263_v2, %v279_v16  ;;  %v1513_v27 = vshrl.u32 %v3017_v46, %v3179_v4  ;;  %v1516_v30 = vshrl.u32 %v3018_v48, %v3179_v4 }
  0xa1   : > { %v284_v26 = vsel %vm272_vm4, %v266_v5, %v283_v17  ;;  %v281_v28 = vsel %vm271_vm5, %v278_v9, %v280_v25  ;;  %v274_v37 = vsel %vm270_vm2, %v254_v8, %v257_v0  ;;  %v276_v38 = vsel %vm272_vm4, %v260_v1, %v275_v24 }
  0xa2   : > { %v285_v29 = vsel %vm271_vm5, %v282_v14, %v284_v26  ;;  %v311_v35 = vand.u32 65535, %v281_v28  ;;  %v312_v36 = vshrl.u32 %v281_v28, 16  ;;  %v3218_v43 = vshrl.u32 %v1507_v40, 5 }
  0xa3   : > { %v289_v32 = vand.u32 65535, %v285_v29  ;;  %v290_v34 = vshrl.u32 %v285_v29, 16  ;;  %v3220_v45 = vor.u32 %v1513_v27, %v1512_v18  ;;  %v3222_v52 = vor.u32 %v1516_v30, %v1515_v22 }
  0xa4   : > { %v1518_v54 = vshll.u32 %v3018_v48, %v3156_v42  ;;  %v314_v58 = vmul.u32 %v312_v36, %v287_v60  ;;  %v315_v59 = vmul.u32 %v311_v35, %v288_v7  ;;  %v1519_v61 = vshrl.u32 %v3019_v51, %v3179_v4 }
  0xa5   : > { %v292_v47 = vmul.u32 %v290_v34, %v287_v60  ;;  %v293_v49 = vmul.u32 %v289_v32, %v288_v7  ;;  %v291_v57 = vmul.u32 %v289_v32, %v287_v60  ;;  %v294_v63 = vmul.u32 %v290_v34, %v288_v7 }
  0xa6   : > { %v313_v1 = vmul.u32 %v311_v35, %v287_v60  ;;  %v316_v40 = vmul.u32 %v312_v36, %v288_v7  ;;  %v317_v8 = vshll.u32 %v314_v58, 16  ;;  %v319_v14 = vshll.u32 %v315_v59, 16 }
  0xa7   : > { %v295_v0 = vshll.u32 %v292_v47, 16  ;;  %v296_v2 = vshrl.u32 %v292_v47, 16  ;;  %v297_v5 = vshll.u32 %v293_v49, 16  ;;  %v298_v6 = vshrl.u32 %v293_v49, 16 }
  0xa8   : > { %v1521_v16 = vshll.u32 %v3019_v51, %v3156_v42  ;;  %vm321_vm7 = vc.u32 %v313_v1, %v317_v8  ;;  %v323_v18 = vadd.s32 %v317_v8, %v313_v1  ;;  %v1522_v22 = vshrl.u32 %v3020_v53, %v3179_v4 }
  0xa9   : > { %vm299_vm6 = vc.u32 %v291_v57, %v295_v0  ;;  %v301_v9 = vadd.s32 %v295_v0, %v291_v57  ;;  %v322_v60 = vsel %vm321_vm7, 1, %v3014_v3  ;;  %v1524_v7 = vshll.u32 %v3020_v53, %v3156_v42 }
  0xaa   : > { %v300_v17 = vsel %vm299_vm6, 1, %v3014_v3  ;;  %v324_v26 = vadd.s32 %v322_v60, %v316_v40  ;;  %vm325_vm9 = vc.u32 %v323_v18, %v319_v14  ;;  %v1520_v27 = vor.u32 %v1519_v61, %v1518_v54 }
  0xab   : > { %v302_v24 = vadd.s32 %v300_v17, %v294_v63  ;;  %vm303_vm8 = vc.u32 %v301_v9, %v297_v5  ;;  %v326_v29 = vsel %vm325_vm9, 1, %v3014_v3  ;;  %v1523_v30 = vor.u32 %v1522_v22, %v1521_v16 }
  0xac   : > { %v304_v25 = vsel %vm303_vm8, 1, %v3014_v3  ;;  %v1525_v32 = vshrl.u32 %v3021_v62, %v3179_v4  ;;  %v318_v34 = vshrl.u32 %v314_v58, 16  ;;  %v328_v35 = vadd.s32 %v326_v29, %v324_v26 }
  0xad   : > { %v306_v28 = vadd.s32 %v304_v25, %v302_v24  ;;  %vm1527_vm10 = vcmp.lt.s32.totalorder %v3218_v43, 1  ;;  %vm1529_vm11 = vcmp.lt.s32.totalorder %v3218_v43, 3  ;;  %vm1528_vm12 = vcmp.lt.s32.totalorder %v3218_v43, 2 }
  0xae   : > { %v1526_v42 = vor.u32 %v1525_v32, %v1524_v7  ;;  %vm1530_vm13 = vcmp.lt.s32.totalorder %v3218_v43, 4  ;;  %v320_v47 = vshrl.u32 %v315_v59, 16  ;;  %v329_v49 = vadd.s32 %v328_v35, %v318_v34 }
  0xaf   : > { %v307_v36 = vadd.s32 %v306_v28, %v296_v2  ;;  %v1535_v54 = vsel %vm1527_vm10, %v3220_v45, %v3222_v52  ;;  %v1536_v57 = vsel %vm1530_vm13, %v1523_v30, 920167782  ;;  %v3252_v61 = vadd.s32 %v323_v18, %v319_v14 }
  0xb0   : > { %v1537_v63 = vsel %vm1529_vm11, %v1520_v27, %v1536_v57  ;;  %v1539_v59 = vsel %vm1527_vm10, %v3222_v52, %v1520_v27  ;;  %v277_v0 = vsel %vm271_vm5, %v274_v37, %v276_v38  ;;  %v330_v1 = vadd.s32 %v329_v49, %v320_v47 }
  0xb1   : > { %v3250_v58 = vadd.s32 %v307_v36, %v298_v6  ;;  %v1538_v40 = vsel %vm1528_vm12, %v1535_v54, %v1537_v63  ;;  %v1540_v2 = vsel %vm1530_vm13, %v1526_v42, 1326507024  ;;  %v1545_v6 = vshrl.u32 %v3165_v55, 16 }
  0xb2   : > { %v1541_v5 = vsel %vm1529_vm11, %v1523_v30, %v1540_v2  ;;  %v1568_v8 = vand.u32 65535, %v1538_v40  ;;  %v334_v9 = vadd.s32 1, %v330_v1  ;;  %v1569_v37 = vshrl.u32 %v1538_v40, 16 }
  0xb3   : > { %vm333_vm14 = vc.u32 %v3250_v58, %v3252_v61  ;;  %v1542_v41 = vsel %vm1528_vm12, %v1539_v59, %v1541_v5  ;;  %v706_v38 = vand.u32 2139095040, %v3168_v56  ;;  %v331_v14 = vmul.u32 %v3152_v39, %v277_v0 }
  0xb4   : > { %v1546_v16 = vand.u32 65535, %v1542_v41  ;;  %v1547_v17 = vshrl.u32 %v1542_v41, 16  ;;  %v335_v18 = vsel %vm333_vm14, %v334_v9, %v330_v1  ;;  %v1511_v22 = vshrl.u32 %v3016_v44, %v3179_v4 }
  0xb5   : > { %v1571_v24 = vmul.u32 %v1569_v37, %v3212_v31  ;;  %v1572_v60 = vmul.u32 %v1568_v8, %v1545_v6  ;;  %v336_v7 = vadd.s32 %v335_v18, %v331_v14  ;;  %v1532_v25 = vsel %vm1530_vm13, %v1520_v27, 2102212464 }
  0xb6   : > { %v1549_v26 = vmul.u32 %v1547_v17, %v3212_v31  ;;  %v1550_v28 = vmul.u32 %v1546_v16, %v1545_v6  ;;  %v1570_v29 = vmul.u32 %v1568_v8, %v3212_v31  ;;  %v1573_v30 = vmul.u32 %v1569_v37, %v1545_v6 }
  0xb7   : > { %v1574_v39 = vshll.u32 %v1571_v24, 16  ;;  %v707_v32 = vshrl.u32 %v706_v38, 23  ;;  %v337_v34 = vadd.s32 536870912, %v336_v7  ;;  %v1548_v35 = vmul.u32 %v1546_v16, %v3212_v31 }
  0xb8   : > { %v1551_v36 = vmul.u32 %v1547_v17, %v1545_v6  ;;  %v1552_v4 = vshll.u32 %v1549_v26, 16  ;;  %v1554_v42 = vshll.u32 %v1550_v28, 16  ;;  %v1576_v47 = vshll.u32 %v1572_v60, 16 }
  0xb9   : > { %vm1578_vm15 = vc.u32 %v1570_v29, %v1574_v39  ;;  %v1580_v49 = vadd.s32 %v1574_v39, %v1570_v29  ;;  %v338_v27 = vshrl.u32 %v337_v34, 30  ;;  %v1531_v63 = vsel %vm1527_vm10, %v1511_v22, %v3220_v45 }
  0xba   : > { %vm1556_vm1 = vc.u32 %v1548_v35, %v1552_v4  ;;  %v1558_v54 = vadd.s32 %v1552_v4, %v1548_v35  ;;  %v1579_v57 = vsel %vm1578_vm15, 1, %v3014_v3  ;;  %v1533_v1 = vsel %vm1529_vm11, %v3222_v52, %v1532_v25 }
  0xbb   : > { %v1557_v59 = vsel %vm1556_vm1, 1, %v3014_v3  ;;  %v1581_v31 = vadd.s32 %v1579_v57, %v1573_v30  ;;  %vm1582_vm2 = vc.u32 %v1580_v49, %v1576_v47  ;;  %v339_v0 = vshll.u32 %v338_v27, 30 }
  0xbc   : > { %v1559_v40 = vadd.s32 %v1557_v59, %v1551_v36  ;;  %vm1560_vm3 = vc.u32 %v1558_v54, %v1554_v42  ;;  %v1583_v5 = vsel %vm1582_vm2, 1, %v3014_v3  ;;  %v703_v6 = vand.u32 2147483647, %v3168_v56 }
  0xbd   : > { %v1561_v2 = vsel %vm1560_vm3, 1, %v3014_v3  ;;  %v2843_v8 = vadd.s32 4294967169, %v707_v32  ;;  %v340_v9 = vsub.s32 %v336_v7, %v339_v0  ;;  %v1553_v45 = vshrl.u32 %v1549_v26, 16 }
  0xbe   : > { %v1563_v41 = vadd.s32 %v1561_v2, %v1559_v40  ;;  %v1585_v37 = vadd.s32 %v1583_v5, %v1581_v31  ;;  %v362_v38 = vsub.s32 4, %v338_v27  ;;  %v1534_v14 = vsel %vm1528_vm12, %v1531_v63, %v1533_v1 }
  0xbf   : > { %v1575_v16 = vshrl.u32 %v1571_v24, 16  ;;  %v713_v17 = vadd.s32 1, %v2843_v8  ;;  %vm341_vm4 = vcmp.lt.s32.totalorder %v340_v9, 0  ;;  %v342_v52 = vsub.s32 0, %v340_v9 }
  0xc0   : > { %v1555_v18 = vshrl.u32 %v1550_v28, 16  ;;  %v1564_v22 = vadd.s32 %v1563_v41, %v1553_v45  ;;  %v1577_v25 = vshrl.u32 %v1572_v60, 16  ;;  %v3296_v29 = vadd.s32 %v1580_v49, %v1576_v47 }
  0xc1   : > { %v1586_v30 = vadd.s32 %v1585_v37, %v1575_v16  ;;  %vm714_vm5 = vcmp.gt.s32.totalorder %v713_v17, 0  ;;  %v343_v39 = vsel %vm341_vm4, %v342_v52, %v340_v9  ;;  %v710_v26 = vand.u32 8388607, %v703_v6 }
  0xc2   : > { %v3298_v7 = vadd.s32 %v1564_v22, %v1555_v18  ;;  %v715_v32 = vsel %vm714_vm5, %v713_v17, 0  ;;  %v344_v43 = vclz %v343_v39  ;;  %v363_v24 = vsel %vm240_vm0, %v362_v38, %v338_v27 }
  0xc3   : > { %v1587_v34 = vadd.s32 %v1586_v30, %v1577_v25  ;;  %v717_v35 = vand.u32 31, %v715_v32  ;;  %vm3306_vm6 = vcmp.le.f32.partialorder %v238_v21, 0.7853982  ;;  %v332_v42 = vadd.s32 %v3252_v61, %v3250_v58 }
  0xc4   : > { %v2835_v28 = vadd.s32 4294967294, %v344_v43  ;;  %vm1590_vm7 = vc.u32 %v3298_v7, %v3296_v29  ;;  %v365_v47 = vsel %vm3306_vm6, 0, %v363_v24  ;;  %v1588_v49 = vmul.u32 %v3165_v55, %v1534_v14 }
  0xc5   : > { %v1591_v36 = vadd.s32 1, %v1587_v34  ;;  %v718_v4 = vsub.s32 32, %v717_v35  ;;  %v711_v27 = vor.u32 8388608, %v710_v26  ;;  %v3317_v54 = vshrl.u32 %v715_v32, 5 }
  0xc6   : > { %vm2836_vm8 = vcmp.lt.s32.totalorder %v2835_v28, 0  ;;  %v720_v57 = vshll.u32 %v3016_v44, %v717_v35  ;;  %v723_v61 = vshll.u32 %v3017_v46, %v717_v35  ;;  %v726_v2 = vshll.u32 %v3018_v48, %v717_v35 }
  0xc7   : > { %v1592_v21 = vsel %vm1590_vm7, %v1591_v36, %v1587_v34  ;;  %v347_v63 = vsel %vm2836_vm8, 0, %v2835_v28  ;;  %v721_v31 = vshrl.u32 %v3017_v46, %v718_v4  ;;  %v724_v0 = vshrl.u32 %v3018_v48, %v718_v4 }
  0xc8   : > { %v1593_v59 = vadd.s32 %v1592_v21, %v1588_v49  ;;  %v348_v1 = vsub.s32 32, %v347_v63  ;;  %v352_v58 = vsub.s32 4294967266, %v347_v63  ;;  %v727_v40 = vshrl.u32 %v3019_v51, %v718_v4 }
  0xc9   : > { %v729_v5 = vshll.u32 %v3019_v51, %v717_v35  ;;  %v730_v8 = vshrl.u32 %v3020_v53, %v718_v4  ;;  %v349_v45 = vshll.u32 %v340_v9, %v347_v63  ;;  %v733_v38 = vshrl.u32 %v3021_v62, %v718_v4 }
  0xca   : > { %v1594_v55 = vadd.s32 536870912, %v1593_v59  ;;  %v350_v41 = vshrl.u32 %v332_v42, %v348_v1  ;;  %v353_v37 = vadd.s32 127, %v352_v58  ;;  %v722_v16 = vor.u32 %v721_v31, %v720_v57 }
  0xcb   : > { %v725_v17 = vor.u32 %v724_v0, %v723_v61  ;;  %v731_v52 = vor.u32 %v730_v8, %v729_v5  ;;  %v728_v25 = vor.u32 %v727_v40, %v726_v2  ;;  %v732_v30 = vshll.u32 %v3020_v53, %v717_v35 }
  0xcc   : > { %v1595_v14 = vshrl.u32 %v1594_v55, 30  ;;  %v351_v18 = vor.u32 %v350_v41, %v349_v45  ;;  %v354_v22 = vshll.u32 %v353_v37, 23  ;;  %v3331_v39 = vmul.f32 %v3127_v12, %v3124_v11 }
  0xcd   : > { %v382_v26 = vadd.s32 3, %v365_v47  ;;  %v3333_v9 = vshll.u32 %v711_v27, 8  ;;  %v734_v24 = vor.u32 %v733_v38, %v732_v30  ;;  %vm735_vm9 = vcmp.lt.s32.totalorder %v3317_v54, 1 }
  0xce   : > { %v1596_v32 = vshll.u32 %v1595_v14, 30  ;;  %v355_v43 = vor.u32 4788187, %v354_v22  ;;  %vm738_vm10 = vcmp.lt.s32.totalorder %v3317_v54, 4  ;;  %vm1497_vm11 = vcmp.lt.s32.totalorder %v3138_v20, 0 }
  0xcf   : > { %vm737_vm12 = vcmp.lt.s32.totalorder %v3317_v54, 3  ;;  %v743_v12 = vsel %vm735_vm9, %v722_v16, %v725_v17  ;;  %v744_v35 = vsel %vm738_vm10, %v731_v52, 920167782  ;;  %v358_v36 = vcvt.s32.f32 %v351_v18 }
  0xd0   : > { %v3338_v34 = vsub.s32 %v1593_v59, %v1596_v32  ;;  %v356_v28 = vand.u32 2147483647, %v355_v43  ;;  %v745_v42 = vsel %vm737_vm12, %v728_v25, %v744_v35  ;;  %v3349_v47 = vmul.f32 %v3130_v13, %v3148_v33 }
  0xd1   : > { %v3351_v49 = vand.u32 3, %v382_v26  ;;  %vm736_vm14 = vcmp.lt.s32.totalorder %v3317_v54, 2  ;;  %v747_v63 = vsel %vm735_vm9, %v725_v17, %v728_v25  ;;  %v748_v13 = vsel %vm738_vm10, %v734_v24, 1326507024 }
  0xd2   : > { %vm1598_vm13 = vcmp.lt.s32.totalorder %v3338_v34, 0  ;;  %v1599_v27 = vsub.s32 0, %v3338_v34  ;;  %v359_v21 = vmul.f32 %v358_v36, %v356_v28  ;;  %v3358_v57 = vsel %vm736_vm14, %v743_v12, %v745_v42 }
  0xd3   : > { %v1619_v59 = vsub.s32 4, %v1595_v14  ;;  %v719_v31 = vshrl.u32 %v3016_v44, %v718_v4  ;;  %v749_v0 = vsel %vm737_vm12, %v731_v52, %v748_v13  ;;  %v740_v61 = vsel %vm738_vm10, %v728_v25, 2102212464 }
  0xd4   : > { %v1600_v33 = vsel %vm1598_vm13, %v1599_v27, %v3338_v34  ;;  %v360_v1 = vxor.u32 2147483648, %v359_v21  ;;  %v750_v40 = vsel %vm736_vm14, %v747_v63, %v749_v0  ;;  %v752_v55 = vand.u32 65535, %v3333_v9 }
  0xd5   : > { %v1601_v58 = vclz %v1600_v33  ;;  %v753_v2 = vshrl.u32 %v3333_v9, 16  ;;  %v754_v5 = vand.u32 65535, %v750_v40  ;;  %v776_v8 = vand.u32 65535, %v3358_v57 }
  0xd6   : > { %v361_v4 = vsel %vm240_vm0, %v360_v1, %v359_v21  ;;  %v755_v41 = vshrl.u32 %v750_v40, 16  ;;  %v777_v37 = vshrl.u32 %v3358_v57, 16  ;;  %v1589_v52 = vadd.s32 %v3296_v29, %v3298_v7 }
  0xd7   : > { %v2859_v45 = vadd.s32 4294967294, %v1601_v58  ;;  %v3381_v38 = vsel %vm3306_vm6, %v3136_v19, %v361_v4  ;;  %v3387_v18 = vsel %vm735_vm9, %v719_v31, %v722_v16  ;;  %v3389_v22 = vmul.u32 %v754_v5, %v753_v2 }
  0xd8   : > { %v366_v25 = vmul.f32 %v3381_v38, %v3381_v38  ;;  %v3395_v30 = vsel %vm1497_vm11, %v1619_v59, %v1595_v14  ;;  %v757_v60 = vmul.u32 %v755_v41, %v752_v55  ;;  %v3399_v32 = vsel %vm737_vm12, %v725_v17, %v740_v61 }
  0xd9   : > { %vm2860_vm15 = vcmp.lt.s32.totalorder %v2859_v45, 0  ;;  %v756_v29 = vmul.u32 %v754_v5, %v752_v55  ;;  %v778_v7 = vmul.u32 %v776_v8, %v752_v55  ;;  %v3401_v12 = vmul.u32 %v777_v37, %v752_v55 }
  0xda   : > { %v1604_v26 = vsel %vm2860_vm15, 0, %v2859_v45  ;;  %v367_v16 = vmul.f32 -0.001358992, %v366_v25  ;;  %v374_v43 = vmul.f32 -0.00019511016, %v366_v25  ;;  %v759_v28 = vmul.u32 %v755_v41, %v753_v2 }
  0xdb   : > { %v1605_v24 = vsub.s32 32, %v1604_v26  ;;  %v1609_v35 = vsub.s32 4294967266, %v1604_v26  ;;  %v760_v36 = vshll.u32 %v757_v60, 16  ;;  %v762_v42 = vshll.u32 %v3389_v22, 16 }
  0xdc   : > { %v368_v14 = vadd.f32 0.041655596, %v367_v16  ;;  %v375_v27 = vadd.f32 0.008332121, %v374_v43  ;;  %v1606_v21 = vshll.u32 %v3338_v34, %v1604_v26  ;;  %v780_v13 = vmul.u32 %v776_v8, %v753_v2 }
  0xdd   : > { %v1607_v57 = vshrl.u32 %v1589_v52, %v1605_v24  ;;  %v1610_v63 = vadd.s32 127, %v1609_v35  ;;  %vm764_vm0 = vc.u32 %v756_v29, %v760_v36  ;;  %v766_v17 = vadd.s32 %v760_v36, %v756_v29 }
  0xde   : > { %v369_v33 = vmul.f32 %v368_v14, %v366_v25  ;;  %v376_v59 = vmul.f32 %v375_v27, %v366_v25  ;;  %vm3407_vm1 = vcmp.le.f32.partialorder %v1495_v23, 0.7853982  ;;  %v765_v0 = vsel %vm764_vm0, 1, %v3014_v3 }
  0xdf   : > { %v782_v1 = vshll.u32 %v3401_v12, 16  ;;  %v1608_v58 = vor.u32 %v1607_v57, %v1606_v21  ;;  %v1611_v61 = vshll.u32 %v1610_v63, 23  ;;  %v767_v34 = vadd.s32 %v765_v0, %v759_v28 }
  0xe0   : > { %vm768_vm2 = vc.u32 %v766_v17, %v762_v42  ;;  %v370_v40 = vadd.f32 -0.4999988, %v369_v33  ;;  %v377_v55 = vadd.f32 -0.16666654, %v376_v59  ;;  %v761_v5 = vshrl.u32 %v757_v60, 16 }
  0xe1   : > { %v769_v8 = vsel %vm768_vm2, 1, %v3014_v3  ;;  %vm385_vm3 = vcmp.eq.s32.totalorder %v3351_v49, 0  ;;  %v1612_v23 = vor.u32 4788187, %v1611_v61  ;;  %v781_v45 = vmul.u32 %v777_v37, %v753_v2 }
  0xe2   : > { %v771_v4 = vadd.s32 %v769_v8, %v767_v34  ;;  %v784_v41 = vshll.u32 %v780_v13, 16  ;;  %v371_v52 = vmul.f32 %v370_v40, %v366_v25  ;;  %v378_v26 = vmul.f32 %v377_v55, %v366_v25 }
  0xe3   : > { %vm384_vm4 = vcmp.lt.s32.totalorder %v3351_v49, 2  ;;  %vm786_vm5 = vc.u32 %v778_v7, %v782_v1  ;;  %v788_v29 = vadd.s32 %v782_v1, %v778_v7  ;;  %vm381_vm6 = vweird.f32 %v3136_v19  ;;  %v3440_v1 = vpop.permute.xlu2 %219 }
  0xe4   : > { %v1613_v16 = vand.u32 2147483647, %v1612_v23  ;;  %v1615_v43 = vcvt.s32.f32 %v1608_v58  ;;  %v772_v60 = vadd.s32 %v771_v4, %v761_v5  ;;  %v787_v24 = vsel %vm786_vm5, 1, %v3014_v3 }
  0xe5   : > { %v372_v35 = vadd.f32 1.0, %v371_v52  ;;  %v379_v28 = vadd.f32 1.0, %v378_v26  ;;  %v789_v36 = vadd.s32 %v787_v24, %v781_v45  ;;  %vm790_vm7 = vc.u32 %v788_v29, %v784_v41 }
  0xe6   : > { %v1616_v2 = vmul.f32 %v1615_v43, %v1613_v16  ;;  %v763_v37 = vshrl.u32 %v3389_v22, 16  ;;  %v783_v25 = vshrl.u32 %v3401_v12, 16  ;;  %v791_v7 = vsel %vm790_vm7, 1, %v3014_v3 }
  0xe7   : > { %v380_v42 = vmul.f32 %v379_v28, %v3381_v38  ;;  %v389_v14 = vxor.u32 2147483648, %v372_v35  ;;  %v793_v27 = vadd.s32 %v791_v7, %v789_v36  ;;  %v3425_v21 = vadd.f32 %v3349_v47, %v3161_v50 }
  0xe8   : > { %vm388_vm8 = vcmp.eq.s32.totalorder %v3351_v49, 2  ;;  %v1617_v57 = vxor.u32 2147483648, %v1616_v2  ;;  %v1622_v22 = vsel %vm3407_vm1, 0, %v3395_v30  ;;  %v773_v12 = vadd.s32 %v772_v60, %v763_v37 }
  0xe9   : > { %v386_v63 = vxor.u32 2147483648, %v380_v42  ;;  %v742_v38 = vsel %vm736_vm14, %v3387_v18, %v3399_v32  ;;  %v785_v17 = vshrl.u32 %v780_v13, 16  ;;  %v794_v33 = vadd.s32 %v793_v27, %v783_v25 }
  0xea   : > { %v390_v50 = vsel %vm388_vm8, %v389_v14, %v380_v42  ;;  %v1618_v47 = vsel %vm1497_vm11, %v1617_v57, %v1616_v2  ;;  %v792_v59 = vadd.s32 %v788_v29, %v784_v41  ;;  %v1963_v0 = vand.u32 2139095040, %v3425_v21 }
  0xeb   : > { %v387_v30 = vsel %vm385_vm3, %v372_v35, %v386_v63  ;;  %v1621_v58 = vsel %vm3407_vm1, %v3138_v20, %v1618_v47  ;;  %v795_v54 = vadd.s32 %v794_v33, %v785_v17  ;;  %v1960_v18 = vand.u32 2147483647, %v3425_v21 }
  0xec   : > { %v391_v32 = vsel %vm384_vm4, %v387_v30, %v390_v50  ;;  %v1623_v13 = vmul.f32 %v1621_v58, %v1621_v58  ;;  %vm798_vm9 = vc.u32 %v773_v12, %v792_v59  ;;  %v1964_v61 = vshrl.u32 %v1963_v0, 23 }
  0xed   : > { %v392_v34 = vsel %vm381_vm6, nan, %v391_v32  ;;  %v1639_v40 = vadd.s32 3, %v1622_v22  ;;  %v799_v55 = vadd.s32 1, %v795_v54  ;;  %v3454_v5 = vadd.f32 %v3440_v1, %v3331_v39 }
  0xee   : > { %v1624_v31 = vmul.f32 -0.001358992, %v1623_v13  ;;  %v1631_v8 = vmul.f32 -0.00019511016, %v1623_v13  ;;  %2735 = vst [vmem:[%s3456_s25] sm:$0xff] %v392_v34  ;;  %v796_v49 = vmul.u32 %v3333_v9, %v742_v38  ;;  %v2867_v23 = vadd.s32 4294967169, %v1964_v61 }
  0xef   : > { %v800_v4 = vsel %vm798_vm9, %v799_v55, %v795_v54  ;;  %v1967_v19 = vand.u32 8388607, %v1960_v18  ;;  %v1640_v29 = vand.u32 3, %v1639_v40  ;;  %v1016_v39 = vand.u32 2139095040, %v3454_v5 }
  0xf0   : > { %v1625_v45 = vadd.f32 0.041655596, %v1624_v31  ;;  %v1632_v41 = vadd.f32 0.008332121, %v1631_v8  ;;  %v801_v52 = vadd.s32 %v800_v4, %v796_v49  ;;  %v1970_v26 = vadd.s32 1, %v2867_v23 }
  0xf1   : > { %v1968_v36 = vor.u32 8388608, %v1967_v19  ;;  %vm705_vm11 = vcmp.lt.s32.totalorder %v3168_v56, 0  ;;  %v1013_v37 = vand.u32 2147483647, %v3454_v5  ;;  %v1017_v25 = vshrl.u32 %v1016_v39, 23 }
  0xf2   : > { %v1626_v16 = vmul.f32 %v1625_v45, %v1623_v13  ;;  %v1633_v43 = vmul.f32 %v1632_v41, %v1623_v13  ;;  %v802_v60 = vadd.s32 536870912, %v801_v52  ;;  %vm1971_vm10 = vcmp.gt.s32.totalorder %v1970_v26, 0 }
  0xf3   : > { %v1972_v24 = vsel %vm1971_vm10, %v1970_v26, 0  ;;  %vm1641_vm12 = vcmp.lt.s32.totalorder %v1640_v29, 2  ;;  %vm1638_vm13 = vweird.f32 %v3138_v20  ;;  %vm1642_vm14 = vcmp.eq.s32.totalorder %v1640_v29, 0 }
  0xf4   : > { %v1627_v35 = vadd.f32 -0.4999988, %v1626_v16  ;;  %v1634_v28 = vadd.f32 -0.16666654, %v1633_v43  ;;  %v803_v9 = vshrl.u32 %v802_v60, 30  ;;  %v1974_v2 = vand.u32 31, %v1972_v24 }
  0xf5   : > { %vm1645_vm15 = vcmp.eq.s32.totalorder %v1640_v29, 2  ;;  %v797_v27 = vadd.s32 %v792_v59, %v773_v12  ;;  %vm3468_vm0 = vcmp.le.f32.partialorder %v703_v6, 0.7853982  ;;  %v3472_v33 = vshll.u32 %v1968_v36, 8 }
  0xf6   : > { %v1628_v7 = vmul.f32 %v1627_v35, %v1623_v13  ;;  %v1635_v42 = vmul.f32 %v1634_v28, %v1623_v13  ;;  %v804_v14 = vshll.u32 %v803_v9, 30  ;;  %v1975_v57 = vsub.s32 32, %v1974_v2 }
  0xf7   : > { %v827_v50 = vsub.s32 4, %v803_v9  ;;  %v3474_v47 = vshrl.u32 %v1972_v24, 5  ;;  %v2849_v0 = vadd.s32 4294967169, %v1017_v25  ;;  %v3478_v30 = vand.u32 8388607, %v1013_v37 }
  0xf8   : > { %v1629_v22 = vadd.f32 1.0, %v1628_v7  ;;  %v1636_v63 = vadd.f32 1.0, %v1635_v42  ;;  %v805_v17 = vsub.s32 %v801_v52, %v804_v14  ;;  %v1977_v6 = vshll.u32 %v3016_v44, %v1974_v2 }
  0xf9   : > { %v1978_v32 = vshrl.u32 %v3017_v46, %v1975_v57  ;;  %v1980_v13 = vshll.u32 %v3017_v46, %v1974_v2  ;;  %v1981_v61 = vshrl.u32 %v3018_v48, %v1975_v57  ;;  %v1983_v55 = vshll.u32 %v3018_v48, %v1974_v2 }
  0xfa   : > { %v1637_v12 = vmul.f32 %v1636_v63, %v1621_v58  ;;  %v1646_v59 = vxor.u32 2147483648, %v1629_v22  ;;  %vm806_vm1 = vcmp.lt.s32.totalorder %v805_v17, 0  ;;  %v807_v54 = vsub.s32 0, %v805_v17 }
  0xfb   : > { %v1984_v31 = vshrl.u32 %v3019_v51, %v1975_v57  ;;  %v828_v49 = vsel %vm705_vm11, %v827_v50, %v803_v9  ;;  %v1987_v23 = vshrl.u32 %v3020_v53, %v1975_v57  ;;  %v1986_v19 = vshll.u32 %v3019_v51, %v1974_v2 }
  0xfc   : > { %v1643_v34 = vxor.u32 2147483648, %v1637_v12  ;;  %v808_v40 = vsel %vm806_vm1, %v807_v54, %v805_v17  ;;  %v1647_v8 = vsel %vm1645_vm15, %v1646_v59, %v1637_v12  ;;  %v1989_v45 = vshll.u32 %v3020_v53, %v1974_v2 }
  0xfd   : > { %v809_v58 = vclz %v808_v40  ;;  %v1990_v41 = vshrl.u32 %v3021_v62, %v1975_v57  ;;  %v1979_v39 = vor.u32 %v1978_v32, %v1977_v6  ;;  %v1982_v16 = vor.u32 %v1981_v61, %v1980_v13 }
  0xfe   : > { %v1644_v4 = vsel %vm1642_vm14, %v1629_v22, %v1643_v34  ;;  %v1985_v60 = vor.u32 %v1984_v31, %v1983_v55  ;;  %v1988_v24 = vor.u32 %v1987_v23, %v1986_v19  ;;  %v830_v28 = vsel %vm3468_vm0, 0, %v828_v49 }
  0xff   : > { %v1648_v52 = vsel %vm1641_vm12, %v1644_v4, %v1647_v8  ;;  %v2844_v26 = vadd.s32 4294967294, %v809_v58  ;;  %v1991_v35 = vor.u32 %v1990_v41, %v1989_v45  ;;  %v2009_v9 = vand.u32 65535, %v3472_v33 }
 0x100   : > { %v1649_v43 = vsel %vm1638_vm13, nan, %v1648_v52  ;;  %v1023_v36 = vadd.s32 1, %v2849_v0  ;;  %vm1992_vm3 = vcmp.lt.s32.totalorder %v3474_v47, 1  ;;  %vm1993_vm4 = vcmp.lt.s32.totalorder %v3474_v47, 2 }
 0x101   : > { %2743 = vst [vmem:[%s3456_s25 + $0x40] sm:$0xff] %v1649_v43  ;;  %vm2845_vm2 = vcmp.lt.s32.totalorder %v2844_v26, 0  ;;  %vm1994_vm5 = vcmp.lt.s32.totalorder %v3474_v47, 3  ;;  %vm1995_vm6 = vcmp.lt.s32.totalorder %v3474_v47, 4  ;;  %v2000_v25 = vsel %vm1992_vm3, %v1979_v39, %v1982_v16 }
 0x102   : > { %v812_v2 = vsel %vm2845_vm2, 0, %v2844_v26  ;;  %v2001_v42 = vsel %vm1995_vm6, %v1988_v24, 920167782  ;;  %v2004_v14 = vsel %vm1992_vm3, %v1982_v16, %v1985_v60  ;;  %v2005_v22 = vsel %vm1995_vm6, %v1991_v35, 1326507024 }
 0x103   : > { %v813_v20 = vsub.s32 32, %v812_v2  ;;  %v817_v29 = vsub.s32 4294967266, %v812_v2  ;;  %v814_v7 = vshll.u32 %v805_v17, %v812_v2  ;;  %v2002_v0 = vsel %vm1994_vm5, %v1985_v60, %v2001_v42 }
 0x104   : > { %v2006_v12 = vsel %vm1994_vm5, %v1988_v24, %v2005_v22  ;;  %v1976_v59 = vshrl.u32 %v3016_v44, %v1975_v57  ;;  %v1997_v54 = vsel %vm1995_vm6, %v1985_v60, 2102212464  ;;  %v2003_v6 = vsel %vm1993_vm4, %v2000_v25, %v2002_v0 }
 0x105   : > { %v815_v63 = vshrl.u32 %v797_v27, %v813_v20  ;;  %v818_v50 = vadd.s32 127, %v817_v29  ;;  %v2007_v17 = vsel %vm1993_vm4, %v2004_v14, %v2006_v12  ;;  %v2010_v34 = vshrl.u32 %v3472_v33, 16 }
 0x106   : > { %v2011_v61 = vand.u32 65535, %v2007_v17  ;;  %v2012_v27 = vshrl.u32 %v2007_v17, 16  ;;  %v2033_v40 = vand.u32 65535, %v2003_v6  ;;  %v2034_v55 = vshrl.u32 %v2003_v6, 16 }
 0x107   : > { %v816_v32 = vor.u32 %v815_v63, %v814_v7  ;;  %v819_v13 = vshll.u32 %v818_v50, 23  ;;  %v1021_v31 = vor.u32 8388608, %v3478_v30  ;;  %v3520_v58 = vadd.s32 3, %v830_v28 }
 0x108   : > { %v1996_v57 = vsel %vm1992_vm3, %v1976_v59, %v1979_v39  ;;  %v2014_v49 = vmul.u32 %v2012_v27, %v2009_v9  ;;  %v1998_v23 = vsel %vm1994_vm5, %v1982_v16, %v1997_v54  ;;  %v2015_v4 = vmul.u32 %v2011_v61, %v2010_v34 }
 0x109   : > { %v820_v8 = vor.u32 4788187, %v819_v13  ;;  %v2036_v19 = vmul.u32 %v2034_v55, %v2009_v9  ;;  %vm1024_vm7 = vcmp.gt.s32.totalorder %v1023_v36, 0  ;;  %v823_v41 = vcvt.s32.f32 %v816_v32 }
 0x10a   : > { %v2013_v52 = vmul.u32 %v2011_v61, %v2009_v9  ;;  %v2017_v26 = vshll.u32 %v2014_v49, 16  ;;  %v2016_v43 = vmul.u32 %v2012_v27, %v2010_v34  ;;  %v2035_v60 = vmul.u32 %v2033_v40, %v2009_v9 }
 0x10b   : > { %v821_v45 = vand.u32 2147483647, %v820_v8  ;;  %v2037_v24 = vmul.u32 %v2033_v40, %v2010_v34  ;;  %v2039_v35 = vshll.u32 %v2036_v19, 16  ;;  %v2019_v2 = vshll.u32 %v2015_v4, 16 }
 0x10c   : > { %vm2021_vm8 = vc.u32 %v2013_v52, %v2017_v26  ;;  %v2023_v20 = vadd.s32 %v2017_v26, %v2013_v52  ;;  %v2038_v29 = vmul.u32 %v2034_v55, %v2010_v34  ;;  %v1025_v16 = vsel %vm1024_vm7, %v1023_v36, 0 }
 0x10d   : > { %v824_v28 = vmul.f32 %v823_v41, %v821_v45  ;;  %v2022_v39 = vsel %vm2021_vm8, 1, %v3014_v3  ;;  %vm2043_vm9 = vc.u32 %v2035_v60, %v2039_v35  ;;  %v2041_v9 = vshll.u32 %v2037_v24, 16 }
 0x10e   : > { %v2024_v7 = vadd.s32 %v2022_v39, %v2016_v43  ;;  %vm2025_vm10 = vc.u32 %v2023_v20, %v2019_v2  ;;  %v2044_v42 = vsel %vm2043_vm9, 1, %v3014_v3  ;;  %v2045_v22 = vadd.s32 %v2039_v35, %v2035_v60 }
 0x10f   : > { %v825_v25 = vxor.u32 2147483648, %v824_v28  ;;  %v2026_v14 = vsel %vm2025_vm10, 1, %v3014_v3  ;;  %v2046_v63 = vadd.s32 %v2044_v42, %v2038_v29  ;;  %v2018_v0 = vshrl.u32 %v2014_v49, 16 }
 0x110   : > { %v2028_v12 = vadd.s32 %v2026_v14, %v2024_v7  ;;  %v1027_v59 = vand.u32 31, %v1025_v16  ;;  %v1999_v54 = vsel %vm1993_vm4, %v1996_v57, %v1998_v23  ;;  %v2020_v6 = vshrl.u32 %v2015_v4, 16 }
 0x111   : > { %v826_v50 = vsel %vm705_vm11, %v825_v25, %v824_v28  ;;  %vm2047_vm12 = vc.u32 %v2045_v22, %v2041_v9  ;;  %v2040_v27 = vshrl.u32 %v2036_v19, 16  ;;  %v2042_v34 = vshrl.u32 %v2037_v24, 16 }
 0x112   : > { %v829_v36 = vsel %vm3468_vm0, %v3168_v56, %v826_v50  ;;  %v2029_v32 = vadd.s32 %v2028_v12, %v2018_v0  ;;  %v2048_v13 = vsel %vm2047_vm12, 1, %v3014_v3  ;;  %v3538_v61 = vsub.s32 32, %v1027_v59 }
 0x113   : > { %v831_v17 = vmul.f32 %v829_v36, %v829_v36  ;;  %v2050_v40 = vadd.s32 %v2048_v13, %v2046_v63  ;;  %v3540_v55 = vshrl.u32 %v1025_v16, 5  ;;  %v3544_v45 = vadd.s32 %v2045_v22, %v2041_v9 }
 0x114   : > { %v3542_v38 = vadd.s32 %v2029_v32, %v2020_v6  ;;  %v1030_v57 = vshll.u32 %v3016_v44, %v1027_v59  ;;  %v1031_v23 = vshrl.u32 %v3017_v46, %v3538_v61  ;;  %v1034_v4 = vshrl.u32 %v3018_v48, %v3538_v61 }
 0x115   : > { %v832_v8 = vmul.f32 -0.001358992, %v831_v17  ;;  %v839_v49 = vmul.f32 -0.00019511016, %v831_v17  ;;  %v2051_v47 = vadd.s32 %v2050_v40, %v2040_v27  ;;  %v1033_v52 = vshll.u32 %v3017_v46, %v1027_v59 }
 0x116   : > { %v1036_v26 = vshll.u32 %v3018_v48, %v1027_v59  ;;  %vm2055_vm11 = vc.u32 %v3542_v38, %v3544_v45  ;;  %v3555_v60 = vor.u32 %v1031_v23, %v1030_v57  ;;  %v1037_v24 = vshrl.u32 %v3019_v51, %v3538_v61 }
 0x117   : > { %v833_v19 = vadd.f32 0.041655596, %v832_v8  ;;  %v840_v41 = vadd.f32 0.008332121, %v839_v49  ;;  %v2052_v43 = vadd.s32 %v2051_v47, %v2042_v34  ;;  %v1039_v2 = vshll.u32 %v3019_v51, %v1027_v59 }
 0x118   : > { %v1040_v20 = vshrl.u32 %v3020_v53, %v3538_v61  ;;  %v3562_v29 = vor.u32 %v1034_v4, %v1033_v52  ;;  %v1042_v16 = vshll.u32 %v3020_v53, %v1027_v59  ;;  %v1043_v25 = vshrl.u32 %v3021_v62, %v3538_v61 }
 0x119   : > { %v834_v35 = vmul.f32 %v833_v19, %v831_v17  ;;  %v841_v28 = vmul.f32 %v840_v41, %v831_v17  ;;  %v2056_v39 = vadd.s32 1, %v2052_v43  ;;  %v2053_v14 = vmul.u32 %v3472_v33, %v1999_v54 }
 0x11a   : > { %v1041_v9 = vor.u32 %v1040_v20, %v1039_v2  ;;  %v1038_v63 = vor.u32 %v1037_v24, %v1036_v26  ;;  %v1044_v50 = vor.u32 %v1043_v25, %v1042_v16  ;;  %vm1045_vm13 = vcmp.lt.s32.totalorder %v3540_v55, 1 }
 0x11b   : > { %v835_v7 = vadd.f32 -0.4999988, %v834_v35  ;;  %v842_v42 = vadd.f32 -0.16666654, %v841_v28  ;;  %v2057_v22 = vsel %vm2055_vm11, %v2056_v39, %v2052_v43  ;;  %vm1048_vm14 = vcmp.lt.s32.totalorder %v3540_v55, 4 }
 0x11c   : > { %v2058_v6 = vadd.s32 %v2057_v22, %v2053_v14  ;;  %v848_v59 = vand.u32 3, %v3520_v58  ;;  %v1053_v32 = vsel %vm1045_vm13, %v3555_v60, %v3562_v29  ;;  %v1054_v33 = vsel %vm1048_vm14, %v1041_v9, 920167782 }
 0x11d   : > { %v836_v0 = vmul.f32 %v835_v7, %v831_v17  ;;  %v843_v12 = vmul.f32 %v842_v42, %v831_v17  ;;  %v3579_v54 = vshll.u32 %v1021_v31, 8  ;;  %vm1047_vm15 = vcmp.lt.s32.totalorder %v3540_v55, 3  ;;  %v3615_v42 = vld [vmem:[%s3105_s3 + $0x1] ss:$0 sm:$0xff] }
 0x11e   : > { %v2059_v17 = vadd.s32 536870912, %v2058_v6  ;;  %vm1046_vm0 = vcmp.lt.s32.totalorder %v3540_v55, 2  ;;  %v1055_v58 = vsel %vm1047_vm15, %v1038_v63, %v1054_v33  ;;  %v1057_v34 = vsel %vm1045_vm13, %v3562_v29, %v1038_v63 }
 0x11f   : > { %v837_v13 = vadd.f32 1.0, %v836_v0  ;;  %v844_v27 = vadd.f32 1.0, %v843_v12  ;;  %v1058_v40 = vsel %vm1048_vm14, %v1044_v50, 1326507024  ;;  %v1056_v49 = vsel %vm1046_vm0, %v1053_v32, %v1055_v58 }
 0x120   : > { %v3590_v8 = vshrl.u32 %v2059_v17, 30  ;;  %vm846_vm1 = vweird.f32 %v3168_v56  ;;  %vm849_vm2 = vcmp.lt.s32.totalorder %v848_v59, 2  ;;  %v1059_v47 = vsel %vm1047_vm15, %v1041_v9, %v1058_v40 }
 0x121   : > { %v845_v30 = vmul.f32 %v844_v27, %v829_v36  ;;  %v854_v31 = vxor.u32 2147483648, %v837_v13  ;;  %v1087_v57 = vshrl.u32 %v1056_v49, 16  ;;  %vm853_vm3 = vcmp.eq.s32.totalorder %v848_v59, 2 }
 0x122   : > { %v2061_v4 = vshll.u32 %v3590_v8, 30  ;;  %v1062_v19 = vand.u32 65535, %v3579_v54  ;;  %vm850_vm4 = vcmp.eq.s32.totalorder %v848_v59, 0  ;;  %v1060_v41 = vsel %vm1046_vm0, %v1057_v34, %v1059_v47 }
 0x123   : > { %v851_v23 = vxor.u32 2147483648, %v845_v30  ;;  %v855_v36 = vsel %vm853_vm3, %v854_v31, %v845_v30  ;;  %v1086_v52 = vand.u32 65535, %v1056_v49  ;;  %v1064_v24 = vand.u32 65535, %v1060_v41 }
 0x124   : > { %v3601_v43 = vsub.s32 %v2058_v6, %v2061_v4  ;;  %v3603_v35 = vmul.u32 %v1087_v57, %v1062_v19  ;;  %v1029_v2 = vshrl.u32 %v3016_v44, %v3538_v61  ;;  %v1063_v20 = vshrl.u32 %v3579_v54, 16 }
 0x125   : > { %v852_v26 = vsel %vm850_vm4, %v837_v13, %v851_v23  ;;  %v1065_v39 = vshrl.u32 %v1060_v41, 16  ;;  %v1050_v7 = vsel %vm1048_vm14, %v1038_v63, 2102212464  ;;  %v1484_v14 = vmul.f32 %v3615_v42, %v3124_v11 }
 0x126   : > { %v856_v28 = vsel %vm849_vm2, %v852_v26, %v855_v36  ;;  %vm2063_vm5 = vcmp.lt.s32.totalorder %v3601_v43, 0  ;;  %v2064_v25 = vsub.s32 0, %v3601_v43  ;;  %v2054_v61 = vadd.s32 %v3544_v45, %v3542_v38 }
 0x127   : > { %v857_v16 = vsel %vm846_vm1, nan, %v856_v28  ;;  %v1067_v9 = vmul.u32 %v1065_v39, %v1062_v19  ;;  %v1068_v22 = vmul.u32 %v1064_v24, %v1063_v20  ;;  %v1049_v50 = vsel %vm1045_vm13, %v1029_v2, %v3555_v60 }
 0x128   : > { %2738 = vst [vmem:[%s3456_s25 + $0x18] sm:$0xff] %v857_v16  ;;  %v2065_v56 = vsel %vm2063_vm5, %v2064_v25, %v3601_v43  ;;  %v1090_v0 = vmul.u32 %v1086_v52, %v1063_v20  ;;  %v1092_v63 = vshll.u32 %v3603_v35, 16  ;;  %v1051_v11 = vsel %vm1047_vm15, %v3562_v29, %v1050_v7 }
 0x129   : > { %v2066_v12 = vclz %v2065_v56  ;;  %v1066_v6 = vmul.u32 %v1064_v24, %v1062_v19  ;;  %v1070_v59 = vshll.u32 %v1067_v9, 16  ;;  %v1069_v38 = vmul.u32 %v1065_v39, %v1063_v20 }
 0x12a   : > { %v1088_v45 = vmul.u32 %v1086_v52, %v1062_v19  ;;  %v1091_v32 = vmul.u32 %v1087_v57, %v1063_v20  ;;  %v1093_v33 = vshrl.u32 %v3603_v35, 16  ;;  %v1072_v27 = vshll.u32 %v1068_v22, 16  ;;  %v3634_v19 = vpop.permute.xlu1 %187 }
 0x12b   : > { %v2868_v13 = vadd.s32 4294967294, %v2066_v12  ;;  %vm1074_vm6 = vc.u32 %v1066_v6, %v1070_v59  ;;  %v1076_v17 = vadd.s32 %v1070_v59, %v1066_v6  ;;  %v1094_v58 = vshll.u32 %v1090_v0, 16 }
 0x12c   : > { %v1075_v60 = vsel %vm1074_vm6, 1, %v3014_v3  ;;  %vm1096_vm7 = vc.u32 %v1088_v45, %v1092_v63  ;;  %v1098_v34 = vadd.s32 %v1092_v63, %v1088_v45  ;;  %v1071_v23 = vshrl.u32 %v1067_v9, 16 }
 0x12d   : > { %vm2869_vm8 = vcmp.lt.s32.totalorder %v2868_v13, 0  ;;  %v1077_v40 = vadd.s32 %v1075_v60, %v1069_v38  ;;  %vm1078_vm9 = vc.u32 %v1076_v17, %v1072_v27  ;;  %v1097_v29 = vsel %vm1096_vm7, 1, %v3014_v3  ;;  %v3664_v17 = vld [vmem:[%s3105_s3] ss:$0 sm:$0xff] }
 0x12e   : > { %v2069_v30 = vsel %vm2869_vm8, 0, %v2868_v13  ;;  %v1079_v31 = vsel %vm1078_vm9, 1, %v3014_v3  ;;  %v1099_v49 = vadd.s32 %v1097_v29, %v1091_v32  ;;  %vm1100_vm10 = vc.u32 %v1098_v34, %v1094_v58 }
 0x12f   : > { %v2070_v47 = vsub.s32 32, %v2069_v30  ;;  %v2074_v57 = vsub.s32 4294967266, %v2069_v30  ;;  %v1081_v4 = vadd.s32 %v1079_v31, %v1077_v40  ;;  %v2071_v36 = vshll.u32 %v3601_v43, %v2069_v30 }
 0x130   : > { %v1073_v41 = vshrl.u32 %v1068_v22, 16  ;;  %v1101_v52 = vsel %vm1100_vm10, 1, %v3014_v3  ;;  %v3639_v26 = vadd.f32 %v1484_v14, %v3440_v1  ;;  %v2084_v20 = vsub.s32 4, %v3590_v8 }
 0x131   : > { %v2072_v24 = vshrl.u32 %v2054_v61, %v2070_v47  ;;  %v2075_v35 = vadd.s32 127, %v2074_v57  ;;  %v1082_v28 = vadd.s32 %v1081_v4, %v1071_v23  ;;  %v1103_v2 = vadd.s32 %v1101_v52, %v1099_v49 }
 0x132   : > { %v1095_v39 = vshrl.u32 %v1090_v0, 16  ;;  %v2270_v16 = vand.u32 2147483647, %v3639_v26  ;;  %v2273_v25 = vand.u32 2139095040, %v3639_v26  ;;  %vm1962_vm12 = vcmp.lt.s32.totalorder %v3425_v21, 0  ;;  %v3661_v27 = vpop.permute.xlu1 %207 }
 0x133   : > { %v2073_v7 = vor.u32 %v2072_v24, %v2071_v36  ;;  %v2076_v9 = vshll.u32 %v2075_v35, 23  ;;  %v1083_v43 = vadd.s32 %v1082_v28, %v1073_v41  ;;  %v1104_v22 = vadd.s32 %v1103_v2, %v1093_v33 }
 0x134   : > { %v1102_v56 = vadd.s32 %v1098_v34, %v1094_v58  ;;  %v2274_v1 = vshrl.u32 %v2273_v25, 23  ;;  %v1052_v61 = vsel %vm1046_vm0, %v1049_v50, %v1051_v11  ;;  %v2277_v0 = vand.u32 8388607, %v2270_v16 }
 0x135   : > { %v2077_v14 = vor.u32 4788187, %v2076_v9  ;;  %v1105_v63 = vadd.s32 %v1104_v22, %v1095_v39  ;;  %v2085_v12 = vsel %vm1962_vm12, %v2084_v20, %v3590_v8  ;;  %v2080_v38 = vcvt.s32.f32 %v2073_v7 }
 0x136   : > { %vm1108_vm11 = vc.u32 %v1083_v43, %v1102_v56  ;;  %v2873_v6 = vadd.s32 4294967169, %v2274_v1  ;;  %vm3654_vm13 = vcmp.le.f32.partialorder %v1960_v18, 0.7853982  ;;  %v1106_v55 = vmul.u32 %v3579_v54, %v1052_v61 }
 0x137   : > { %v2078_v59 = vand.u32 2147483647, %v2077_v14  ;;  %v1109_v45 = vadd.s32 1, %v1105_v63  ;;  %v2087_v33 = vsel %vm3654_vm13, 0, %v2085_v12  ;;  %v2278_v8 = vor.u32 8388608, %v2277_v0 }
 0x138   : > { %v2280_v50 = vadd.s32 1, %v2873_v6  ;;  %v192_v60 = vmul.f32 %v3664_v17, %v3132_v15  ;;  %v2104_v40 = vadd.s32 3, %v2087_v33  ;;  %v3680_v41 = vadd.s32 %v1102_v56, %v1083_v43 }
 0x139   : > { %v2081_v11 = vmul.f32 %v2080_v38, %v2078_v59  ;;  %v1110_v13 = vsel %vm1108_vm11, %v1109_v45, %v1105_v63  ;;  %v3673_v49 = vshll.u32 %v2278_v8, 8  ;;  %vm1015_vm15 = vcmp.lt.s32.totalorder %v3454_v5, 0 }
 0x13a   : > { %v1111_v18 = vadd.s32 %v1110_v13, %v1106_v55  ;;  %vm2281_vm14 = vcmp.gt.s32.totalorder %v2280_v50, 0  ;;  %v3669_v30 = vadd.f32 %v3661_v27, %v192_v60  ;;  %v3678_v36 = vand.u32 3, %v2104_v40 }
 0x13b   : > { %v2082_v58 = vxor.u32 2147483648, %v2081_v11  ;;  %v2282_v34 = vsel %vm2281_vm14, %v2280_v50, 0  ;;  %v3685_v2 = vand.u32 65535, %v3673_v49  ;;  %v3688_v20 = vshrl.u32 %v3673_v49, 16 }
 0x13c   : > { %v1112_v54 = vadd.s32 536870912, %v1111_v18  ;;  %v2284_v29 = vand.u32 31, %v2282_v34  ;;  %v548_v24 = vand.u32 2147483647, %v3669_v30  ;;  %v3692_v25 = vshrl.u32 %v2282_v34, 5 }
 0x13d   : > { %v2083_v31 = vsel %vm1962_vm12, %v2082_v58, %v2081_v11  ;;  %v551_v9 = vand.u32 2139095040, %v3669_v30  ;;  %vm2107_vm1 = vcmp.eq.s32.totalorder %v3678_v36, 0  ;;  %vm2110_vm2 = vcmp.eq.s32.totalorder %v3678_v36, 2 }
 0x13e   : > { %v2086_v47 = vsel %vm3654_vm13, %v3425_v21, %v2083_v31  ;;  %v1113_v57 = vshrl.u32 %v1112_v54, 30  ;;  %v2285_v4 = vsub.s32 32, %v2284_v29  ;;  %v2287_v7 = vshll.u32 %v3016_v44, %v2284_v29 }
 0x13f   : > { %v2088_v23 = vmul.f32 %v2086_v47, %v2086_v47  ;;  %v2290_v1 = vshll.u32 %v3017_v46, %v2284_v29  ;;  %v2296_v59 = vshll.u32 %v3019_v51, %v2284_v29  ;;  %v2299_v32 = vshll.u32 %v3020_v53, %v2284_v29 }
 0x140   : > { %v1114_v52 = vshll.u32 %v1113_v57, 30  ;;  %v2288_v56 = vshrl.u32 %v3017_v46, %v2285_v4  ;;  %v2291_v61 = vshrl.u32 %v3018_v48, %v2285_v4  ;;  %v2297_v63 = vshrl.u32 %v3020_v53, %v2285_v4 }
 0x141   : > { %v2089_v35 = vmul.f32 -0.001358992, %v2088_v23  ;;  %v2096_v28 = vmul.f32 -0.00019511016, %v2088_v23  ;;  %v2294_v6 = vshrl.u32 %v3019_v51, %v2285_v4  ;;  %v1137_v45 = vsub.s32 4, %v1113_v57 }
 0x142   : > { %v3690_v39 = vsub.s32 %v1111_v18, %v1114_v52  ;;  %v2300_v55 = vshrl.u32 %v3021_v62, %v2285_v4  ;;  %v2293_v13 = vshll.u32 %v3018_v48, %v2284_v29  ;;  %v2289_v8 = vor.u32 %v2288_v56, %v2287_v7 }
 0x143   : > { %v2090_v43 = vadd.f32 0.041655596, %v2089_v35  ;;  %v2097_v22 = vadd.f32 0.008332121, %v2096_v28  ;;  %v3710_v60 = vor.u32 %v2291_v61, %v2290_v1  ;;  %v2298_v18 = vor.u32 %v2297_v63, %v2296_v59 }
 0x144   : > { %vm1116_vm0 = vcmp.lt.s32.totalorder %v3690_v39, 0  ;;  %v1117_v14 = vsub.s32 0, %v3690_v39  ;;  %v2301_v58 = vor.u32 %v2300_v55, %v2299_v32  ;;  %vm2106_vm3 = vcmp.lt.s32.totalorder %v3678_v36, 2 }
 0x145   : > { %v2091_v0 = vmul.f32 %v2090_v43, %v2088_v23  ;;  %v2098_v12 = vmul.f32 %v2097_v22, %v2088_v23  ;;  %v3713_v31 = vor.u32 %v2294_v6, %v2293_v13  ;;  %vm2103_vm4 = vweird.f32 %v3425_v21 }
 0x146   : > { %v1118_v38 = vsel %vm1116_vm0, %v1117_v14, %v3690_v39  ;;  %vm3718_vm5 = vcmp.le.f32.partialorder %v1013_v37, 0.7853982  ;;  %v3724_v52 = vsel %vm1015_vm15, %v1137_v45, %v1113_v57  ;;  %v2286_v35 = vshrl.u32 %v3016_v44, %v2285_v4 }
 0x147   : > { %v2092_v50 = vadd.f32 -0.4999988, %v2091_v0  ;;  %v2099_v11 = vadd.f32 -0.16666654, %v2098_v12  ;;  %v1119_v33 = vclz %v1118_v38  ;;  %vm2302_vm6 = vcmp.lt.s32.totalorder %v3692_v25, 1 }
 0x148   : > { %vm2304_vm7 = vcmp.lt.s32.totalorder %v3692_v25, 3  ;;  %vm2305_vm9 = vcmp.lt.s32.totalorder %v3692_v25, 4  ;;  %v2310_v37 = vsel %vm2302_vm6, %v2289_v8, %v3710_v60  ;;  %v2314_v1 = vsel %vm2302_vm6, %v3710_v60, %v3713_v31 }
 0x149   : > { %v2093_v34 = vmul.f32 %v2092_v50, %v2088_v23  ;;  %v2100_v40 = vmul.f32 %v2099_v11, %v2088_v23  ;;  %v2850_v54 = vadd.s32 4294967294, %v1119_v33  ;;  %v2311_v57 = vsel %vm2305_vm9, %v2298_v18, 920167782 }
 0x14a   : > { %v2315_v4 = vsel %vm2305_vm9, %v2301_v58, 1326507024  ;;  %vm2303_vm10 = vcmp.lt.s32.totalorder %v3692_v25, 2  ;;  %v2312_v61 = vsel %vm2304_vm7, %v3713_v31, %v2311_v57  ;;  %v2306_v36 = vsel %vm2302_vm6, %v2286_v35, %v2289_v8 }
 0x14b   : > { %v2094_v23 = vadd.f32 1.0, %v2093_v34  ;;  %v2101_v28 = vadd.f32 1.0, %v2100_v40  ;;  %vm2851_vm8 = vcmp.lt.s32.totalorder %v2850_v54, 0  ;;  %v2316_v63 = vsel %vm2304_vm7, %v2298_v18, %v2315_v4 }
 0x14c   : > { %v1122_v7 = vsel %vm2851_vm8, 0, %v2850_v54  ;;  %v2313_v6 = vsel %vm2303_vm10, %v2310_v37, %v2312_v61  ;;  %v2317_v38 = vsel %vm2303_vm10, %v2314_v1, %v2316_v63  ;;  %v1140_v34 = vsel %vm3718_vm5, 0, %v3724_v52 }
 0x14d   : > { %v2102_v43 = vmul.f32 %v2101_v28, %v2086_v47  ;;  %v2111_v22 = vxor.u32 2147483648, %v2094_v23  ;;  %v1123_v56 = vsub.s32 32, %v1122_v7  ;;  %v1127_v14 = vsub.s32 4294967266, %v1122_v7 }
 0x14e   : > { %v1124_v47 = vshll.u32 %v3690_v39, %v1122_v7  ;;  %v2343_v45 = vand.u32 65535, %v2313_v6  ;;  %v2344_v32 = vshrl.u32 %v2313_v6, 16  ;;  %v2321_v11 = vand.u32 65535, %v2317_v38 }
 0x14f   : > { %v2108_v0 = vxor.u32 2147483648, %v2102_v43  ;;  %v1125_v12 = vshrl.u32 %v3680_v41, %v1123_v56  ;;  %v1128_v59 = vadd.s32 127, %v1127_v14  ;;  %v2112_v50 = vsel %vm2110_vm2, %v2111_v22, %v2102_v43 }
 0x150   : > { %v2322_v39 = vshrl.u32 %v2317_v38, 16  ;;  %v2346_v18 = vmul.u32 %v2344_v32, %v3685_v2  ;;  %v552_v54 = vshrl.u32 %v551_v9, 23  ;;  %v2325_v28 = vmul.u32 %v2321_v11, %v3688_v20 }
 0x151   : > { %v2109_v55 = vsel %vm2107_vm1, %v2094_v23, %v2108_v0  ;;  %v1126_v33 = vor.u32 %v1125_v12, %v1124_v47  ;;  %v1129_v13 = vshll.u32 %v1128_v59, 23  ;;  %v2347_v7 = vmul.u32 %v2343_v45, %v3688_v20 }
 0x152   : > { %v2113_v41 = vsel %vm2106_vm3, %v2109_v55, %v2112_v50  ;;  %v2324_v40 = vmul.u32 %v2322_v39, %v3685_v2  ;;  %v2323_v21 = vmul.u32 %v2321_v11, %v3685_v2  ;;  %v2345_v57 = vmul.u32 %v2343_v45, %v3685_v2 }
 0x153   : > { %v2114_v58 = vsel %vm2103_vm4, nan, %v2113_v41  ;;  %v1130_v23 = vor.u32 4788187, %v1129_v13  ;;  %v2349_v52 = vshll.u32 %v2346_v18, 16  ;;  %v1133_v43 = vcvt.s32.f32 %v1126_v33 }
 0x154   : > { %2746 = vst [vmem:[%s3456_s25 + $0x58] sm:$0xff] %v2114_v58  ;;  %v2327_v37 = vshll.u32 %v2324_v40, 16  ;;  %v2326_v22 = vmul.u32 %v2322_v39, %v3688_v20  ;;  %v2348_v9 = vmul.u32 %v2344_v32, %v3688_v20  ;;  %v2329_v56 = vshll.u32 %v2325_v28, 16 }
 0x155   : > { %v1131_v4 = vand.u32 2147483647, %v1130_v23  ;;  %v2351_v8 = vshll.u32 %v2347_v7, 16  ;;  %vm2353_vm11 = vc.u32 %v2345_v57, %v2349_v52  ;;  %v2355_v61 = vadd.s32 %v2349_v52, %v2345_v57 }
 0x156   : > { %vm2331_vm12 = vc.u32 %v2323_v21, %v2327_v37  ;;  %v2333_v1 = vadd.s32 %v2327_v37, %v2323_v21  ;;  %v2307_v2 = vsel %vm2305_vm9, %v3713_v31, 2102212464  ;;  %v2354_v0 = vsel %vm2353_vm11, 1, %v3014_v3 }
 0x157   : > { %v1134_v35 = vmul.f32 %v1133_v43, %v1131_v4  ;;  %v2332_v14 = vsel %vm2331_vm12, 1, %v3014_v3  ;;  %v2356_v12 = vadd.s32 %v2354_v0, %v2348_v9  ;;  %vm2357_vm14 = vc.u32 %v2355_v61, %v2351_v8 }
 0x158   : > { %v2334_v63 = vadd.s32 %v2332_v14, %v2326_v22  ;;  %vm2335_vm13 = vc.u32 %v2333_v1, %v2329_v56  ;;  %v2328_v6 = vshrl.u32 %v2324_v40, 16  ;;  %v2358_v38 = vsel %vm2357_vm14, 1, %v3014_v3 }
 0x159   : > { %v1135_v47 = vxor.u32 2147483648, %v1134_v35  ;;  %v2336_v20 = vsel %vm2335_vm13, 1, %v3014_v3  ;;  %v2840_v45 = vadd.s32 4294967169, %v552_v54  ;;  %v2308_v31 = vsel %vm2304_vm7, %v3710_v60, %v2307_v2 }
 0x15a   : > { %v2338_v59 = vadd.s32 %v2336_v20, %v2334_v63  ;;  %v2350_v55 = vshrl.u32 %v2346_v18, 16  ;;  %v2360_v50 = vadd.s32 %v2358_v38, %v2356_v12  ;;  %v2330_v39 = vshrl.u32 %v2325_v28, 16 }
 0x15b   : > { %v1136_v32 = vsel %vm1015_vm15, %v1135_v47, %v1134_v35  ;;  %v558_v33 = vadd.s32 1, %v2840_v45  ;;  %v1157_v58 = vadd.s32 3, %v1140_v34  ;;  %v2352_v40 = vshrl.u32 %v2347_v7, 16 }
 0x15c   : > { %v1139_v11 = vsel %vm3718_vm5, %v3454_v5, %v1136_v32  ;;  %v2339_v41 = vadd.s32 %v2338_v59, %v2328_v6  ;;  %v2361_v54 = vadd.s32 %v2360_v50, %v2350_v55  ;;  %v2309_v23 = vsel %vm2303_vm10, %v2306_v36, %v2308_v31 }
 0x15d   : > { %v1141_v13 = vmul.f32 %v1139_v11, %v1139_v11  ;;  %v3796_v37 = vadd.s32 %v2355_v61, %v2351_v8  ;;  %vm559_vm15 = vcmp.gt.s32.totalorder %v558_v33, 0  ;;  %v555_v34 = vand.u32 8388607, %v548_v24 }
 0x15e   : > { %v3794_v21 = vadd.s32 %v2339_v41, %v2330_v39  ;;  %v2362_v57 = vadd.s32 %v2361_v54, %v2352_v40  ;;  %v560_v29 = vsel %vm559_vm15, %v558_v33, 0  ;;  %v2363_v36 = vmul.u32 %v3673_v49, %v2309_v23 }
 0x15f   : > { %v1142_v60 = vmul.f32 -0.001358992, %v1141_v13  ;;  %v1149_v18 = vmul.f32 -0.00019511016, %v1141_v13  ;;  %v562_v28 = vand.u32 31, %v560_v29  ;;  %v1158_v9 = vand.u32 3, %v1157_v58 }
 0x160   : > { %vm2365_vm0 = vc.u32 %v3794_v21, %v3796_v37  ;;  %v2366_v25 = vadd.s32 1, %v2362_v57  ;;  %v556_v8 = vor.u32 8388608, %v555_v34  ;;  %v3805_v35 = vshrl.u32 %v560_v29, 5 }
 0x161   : > { %v1143_v7 = vadd.f32 0.041655596, %v1142_v60  ;;  %v1150_v52 = vadd.f32 0.008332121, %v1149_v18  ;;  %v3803_v4 = vsub.s32 32, %v562_v28  ;;  %v565_v47 = vshll.u32 %v3016_v44, %v562_v28 }
 0x162   : > { %v2367_v56 = vsel %vm2365_vm0, %v2366_v25, %v2362_v57  ;;  %v574_v12 = vshll.u32 %v3019_v51, %v562_v28  ;;  %v568_v38 = vshll.u32 %v3017_v46, %v562_v28  ;;  %v571_v45 = vshll.u32 %v3018_v48, %v562_v28 }
 0x163   : > { %v1144_v43 = vmul.f32 %v1143_v7, %v1141_v13  ;;  %v1151_v22 = vmul.f32 %v1150_v52, %v1141_v13  ;;  %v2368_v1 = vadd.s32 %v2367_v56, %v2363_v36  ;;  %v566_v14 = vshrl.u32 %v3017_v46, %v3803_v4 }
 0x164   : > { %v569_v63 = vshrl.u32 %v3018_v48, %v3803_v4  ;;  %v575_v49 = vshrl.u32 %v3020_v53, %v3803_v4  ;;  %v572_v20 = vshrl.u32 %v3019_v51, %v3803_v4  ;;  %vm1156_vm1 = vweird.f32 %v3454_v5 }
 0x165   : > { %v1145_v61 = vadd.f32 -0.4999988, %v1144_v43  ;;  %v1152_v2 = vadd.f32 -0.16666654, %v1151_v22  ;;  %v2369_v0 = vadd.s32 536870912, %v2368_v1  ;;  %v3820_v31 = vor.u32 %v566_v14, %v565_v47 }
 0x166   : > { %v576_v55 = vor.u32 %v575_v49, %v574_v12  ;;  %v578_v50 = vshrl.u32 %v3021_v62, %v3803_v4  ;;  %v3824_v33 = vor.u32 %v569_v63, %v568_v38  ;;  %v577_v58 = vshll.u32 %v3020_v53, %v562_v28 }
 0x167   : > { %v1146_v6 = vmul.f32 %v1145_v61, %v1141_v13  ;;  %v1153_v59 = vmul.f32 %v1152_v2, %v1141_v13  ;;  %v2370_v32 = vshrl.u32 %v2369_v0, 30  ;;  %vm1159_vm2 = vcmp.lt.s32.totalorder %v1158_v9, 2 }
 0x168   : > { %vm1160_vm3 = vcmp.eq.s32.totalorder %v1158_v9, 0  ;;  %v573_v40 = vor.u32 %v572_v20, %v571_v45  ;;  %v579_v60 = vor.u32 %v578_v50, %v577_v58  ;;  %vm583_vm4 = vcmp.lt.s32.totalorder %v3805_v35, 4 }
 0x169   : > { %v1147_v39 = vadd.f32 1.0, %v1146_v6  ;;  %v1154_v41 = vadd.f32 1.0, %v1153_v59  ;;  %v2371_v13 = vshll.u32 %v2370_v32, 30  ;;  %vm1163_vm5 = vcmp.eq.s32.totalorder %v1158_v9, 2  ;;  %v3863_v9 = vpop.permute.xlu0 %157 }
 0x16a   : > { %vm580_vm6 = vcmp.lt.s32.totalorder %v3805_v35, 1  ;;  %v589_v57 = vsel %vm583_vm4, %v576_v55, 920167782  ;;  %vm582_vm7 = vcmp.lt.s32.totalorder %v3805_v35, 3  ;;  %v3838_v34 = vshll.u32 %v556_v8, 8 }
 0x16b   : > { %v1155_v54 = vmul.f32 %v1154_v41, %v1139_v11  ;;  %v1164_v23 = vxor.u32 2147483648, %v1147_v39  ;;  %v3828_v18 = vsub.s32 %v2368_v1, %v2371_v13  ;;  %v588_v11 = vsel %vm580_vm6, %v3820_v31, %v3824_v33 }
 0x16c   : > { %vm581_vm9 = vcmp.lt.s32.totalorder %v3805_v35, 2  ;;  %v590_v7 = vsel %vm582_vm7, %v573_v40, %v589_v57  ;;  %v592_v36 = vsel %vm580_vm6, %v3824_v33, %v573_v40  ;;  %v593_v43 = vsel %vm583_vm4, %v579_v60, 1326507024 }
 0x16d   : > { %v1161_v29 = vxor.u32 2147483648, %v1155_v54  ;;  %vm2373_vm8 = vcmp.lt.s32.totalorder %v3828_v18, 0  ;;  %v2374_v28 = vsub.s32 0, %v3828_v18  ;;  %v1165_v25 = vsel %vm1163_vm5, %v1164_v23, %v1155_v54 }
 0x16e   : > { %v591_v1 = vsel %vm581_vm9, %v588_v11, %v590_v7  ;;  %v594_v8 = vsel %vm582_vm7, %v576_v55, %v593_v43  ;;  %v1481_v14 = vmul.f32 %v3615_v42, %v3132_v15  ;;  %vm2272_vm10 = vcmp.lt.s32.totalorder %v3639_v26, 0 }
 0x16f   : > { %v1162_v52 = vsel %vm1160_vm3, %v1147_v39, %v1161_v29  ;;  %v2375_v56 = vsel %vm2373_vm8, %v2374_v28, %v3828_v18  ;;  %v595_v63 = vsel %vm581_vm9, %v592_v36, %v594_v8  ;;  %v2394_v49 = vsub.s32 4, %v2370_v32 }
 0x170   : > { %v1166_v22 = vsel %vm1159_vm2, %v1162_v52, %v1165_v25  ;;  %v2376_v2 = vclz %v2375_v56  ;;  %v598_v0 = vshrl.u32 %v3838_v34, 16  ;;  %v599_v47 = vand.u32 65535, %v595_v63 }
 0x171   : > { %v1167_v61 = vsel %vm1156_vm1, nan, %v1166_v22  ;;  %v597_v12 = vand.u32 65535, %v3838_v34  ;;  %v600_v15 = vshrl.u32 %v595_v63, 16  ;;  %v622_v42 = vshrl.u32 %v591_v1, 16  ;;  %v3888_v22 = vpop.permute.xlu0 %182 }
 0x172   : > { %2740 = vst [vmem:[%s3456_s25 + $0x28] sm:$0xff] %v1167_v61  ;;  %v2874_v20 = vadd.s32 4294967294, %v2376_v2  ;;  %v2364_v5 = vadd.s32 %v3796_v37, %v3794_v21  ;;  %v603_v6 = vmul.u32 %v599_v47, %v598_v0  ;;  %v621_v59 = vand.u32 65535, %v591_v1 }
 0x173   : > { %v3872_v38 = vadd.f32 %v1481_v14, %v3661_v27  ;;  %v564_v45 = vshrl.u32 %v3016_v44, %v3803_v4  ;;  %v585_v55 = vsel %vm583_vm4, %v573_v40, 2102212464  ;;  %v602_v50 = vmul.u32 %v600_v15, %v597_v12 }
 0x174   : > { %vm2875_vm12 = vcmp.lt.s32.totalorder %v2874_v20, 0  ;;  %v2395_v41 = vsel %vm2272_vm10, %v2394_v49, %v2370_v32  ;;  %v601_v58 = vmul.u32 %v599_v47, %v597_v12  ;;  %v624_v13 = vmul.u32 %v622_v42, %v597_v12 }
 0x175   : > { %v2379_v39 = vsel %vm2875_vm12, 0, %v2874_v20  ;;  %v604_v54 = vmul.u32 %v600_v15, %v598_v0  ;;  %v605_v23 = vshll.u32 %v602_v50, 16  ;;  %vm3882_vm11 = vcmp.le.f32.partialorder %v2270_v16, 0.7853982 }
 0x176   : > { %v2380_v21 = vsub.s32 32, %v2379_v39  ;;  %v2384_v37 = vsub.s32 4294967266, %v2379_v39  ;;  %v2381_v4 = vshll.u32 %v3828_v18, %v2379_v39  ;;  %v607_v40 = vshll.u32 %v603_v6, 16 }
 0x177   : > { %v625_v60 = vmul.u32 %v621_v59, %v598_v0  ;;  %v627_v57 = vshll.u32 %v624_v13, 16  ;;  %vm609_vm13 = vc.u32 %v601_v58, %v605_v23  ;;  %v611_v32 = vadd.s32 %v605_v23, %v601_v58 }
 0x178   : > { %v2382_v29 = vshrl.u32 %v2364_v5, %v2380_v21  ;;  %v2385_v11 = vadd.s32 127, %v2384_v37  ;;  %v610_v28 = vsel %vm609_vm13, 1, %v3014_v3  ;;  %v623_v7 = vmul.u32 %v621_v59, %v597_v12 }
 0x179   : > { %v626_v52 = vmul.u32 %v622_v42, %v598_v0  ;;  %v629_v25 = vshll.u32 %v625_v60, 16  ;;  %v612_v16 = vadd.s32 %v610_v28, %v604_v54  ;;  %vm613_vm14 = vc.u32 %v611_v32, %v607_v40 }
 0x17a   : > { %v2383_v36 = vor.u32 %v2382_v29, %v2381_v4  ;;  %v2386_v43 = vshll.u32 %v2385_v11, 23  ;;  %v614_v18 = vsel %vm613_vm14, 1, %v3014_v3  ;;  %vm631_vm15 = vc.u32 %v623_v7, %v627_v57  ;;  %v3920_v11 = vpop.permute.xlu0 %203 }
 0x17b   : > { %v633_v56 = vadd.s32 %v627_v57, %v623_v7  ;;  %v1808_v1 = vand.u32 2139095040, %v3872_v38  ;;  %v606_v14 = vshrl.u32 %v602_v50, 16  ;;  %v616_v61 = vadd.s32 %v614_v18, %v612_v16 }
 0x17c   : > { %v2387_v8 = vor.u32 4788187, %v2386_v43  ;;  %v632_v2 = vsel %vm631_vm15, 1, %v3014_v3  ;;  %v608_v63 = vshrl.u32 %v603_v6, 16  ;;  %v2390_v20 = vcvt.s32.f32 %v2383_v36 }
 0x17d   : > { %v634_v49 = vadd.s32 %v632_v2, %v626_v52  ;;  %vm635_vm0 = vc.u32 %v633_v56, %v629_v25  ;;  %v1809_v0 = vshrl.u32 %v1808_v1, 23  ;;  %v617_v12 = vadd.s32 %v616_v61, %v606_v14 }
 0x17e   : > { %v2388_v47 = vand.u32 2147483647, %v2387_v8  ;;  %v636_v15 = vsel %vm635_vm0, 1, %v3014_v3  ;;  %v584_v42 = vsel %vm580_vm6, %v564_v45, %v3820_v31  ;;  %v628_v5 = vshrl.u32 %v624_v13, 16 }
 0x17f   : > { %v638_v59 = vadd.s32 %v636_v15, %v634_v49  ;;  %v2864_v39 = vadd.s32 4294967169, %v1809_v0  ;;  %v2397_v58 = vsel %vm3882_vm11, 0, %v2395_v41  ;;  %v586_v6 = vsel %vm582_vm7, %v3824_v33, %v585_v55 }
 0x180   : > { %v2391_v50 = vmul.f32 %v2390_v20, %v2388_v47  ;;  %v3902_v21 = vadd.s32 %v617_v12, %v608_v63  ;;  %v630_v37 = vshrl.u32 %v625_v60, 16  ;;  %v1805_v23 = vand.u32 2147483647, %v3872_v38 }
 0x181   : > { %v639_v54 = vadd.s32 %v638_v59, %v628_v5  ;;  %v1815_v4 = vadd.s32 1, %v2864_v39  ;;  %v3905_v31 = vadd.s32 %v633_v56, %v629_v25  ;;  %v2414_v45 = vadd.s32 3, %v2397_v58 }
 0x182   : > { %v2392_v40 = vxor.u32 2147483648, %v2391_v50  ;;  %v587_v13 = vsel %vm581_vm9, %v584_v42, %v586_v6  ;;  %v1812_v29 = vand.u32 8388607, %v1805_v23  ;;  %v191_v32 = vmul.f32 %v3664_v17, %v3863_v9 }
 0x183   : > { %v640_v57 = vadd.s32 %v639_v54, %v630_v37  ;;  %vm1816_vm1 = vcmp.gt.s32.totalorder %v1815_v4, 0  ;;  %vm643_vm2 = vc.u32 %v3902_v21, %v3905_v31  ;;  %v641_v7 = vmul.u32 %v3838_v34, %v587_v13 }
 0x184   : > { %v2393_v41 = vsel %vm2272_vm10, %v2392_v40, %v2391_v50  ;;  %v1817_v33 = vsel %vm1816_vm1, %v1815_v4, 0  ;;  %v3927_v52 = vand.u32 3, %v2414_v45  ;;  %v3932_v18 = vadd.f32 %v3920_v11, %v191_v32 }
 0x185   : > { %v3916_v55 = vsel %vm3882_vm11, %v3639_v26, %v2393_v41  ;;  %v644_v60 = vadd.s32 1, %v640_v57  ;;  %v1819_v35 = vand.u32 31, %v1817_v33  ;;  %v1813_v56 = vor.u32 8388608, %v1812_v29 }
 0x186   : > { %v2398_v28 = vmul.f32 %v3916_v55, %v3916_v55  ;;  %v3934_v1 = vshrl.u32 %v1817_v33, 5  ;;  %vm2417_vm3 = vcmp.eq.s32.totalorder %v3927_v52, 0  ;;  %vm2420_vm4 = vcmp.eq.s32.totalorder %v3927_v52, 2 }
 0x187   : > { %v645_v27 = vsel %vm643_vm2, %v644_v60, %v640_v57  ;;  %v3929_v25 = vsub.s32 32, %v1819_v35  ;;  %v1822_v2 = vshll.u32 %v3016_v44, %v1819_v35  ;;  %v1825_v63 = vshll.u32 %v3017_v46, %v1819_v35 }
 0x188   : > { %v2399_v36 = vmul.f32 -0.001358992, %v2398_v28  ;;  %v2406_v43 = vmul.f32 -0.00019511016, %v2398_v28  ;;  %v646_v16 = vadd.s32 %v645_v27, %v641_v7  ;;  %v1831_v0 = vshll.u32 %v3019_v51, %v1819_v35 }
 0x189   : > { %v1823_v17 = vshrl.u32 %v3017_v46, %v3929_v25  ;;  %v1826_v34 = vshrl.u32 %v3018_v48, %v3929_v25  ;;  %v1829_v49 = vshrl.u32 %v3019_v51, %v3929_v25  ;;  %v1832_v47 = vshrl.u32 %v3020_v53, %v3929_v25 }
 0x18a   : > { %v2400_v8 = vadd.f32 0.041655596, %v2399_v36  ;;  %v2407_v14 = vadd.f32 0.008332121, %v2406_v43  ;;  %v647_v61 = vadd.s32 536870912, %v646_v16  ;;  %v1828_v42 = vshll.u32 %v3018_v48, %v1819_v35 }
 0x18b   : > { %v1824_v5 = vor.u32 %v1823_v17, %v1822_v2  ;;  %v3950_v59 = vor.u32 %v1826_v34, %v1825_v63  ;;  %v1833_v39 = vor.u32 %v1832_v47, %v1831_v0  ;;  %v1835_v50 = vshrl.u32 %v3021_v62, %v3929_v25 }
 0x18c   : > { %v2401_v20 = vmul.f32 %v2400_v8, %v2398_v28  ;;  %v2408_v12 = vmul.f32 %v2407_v14, %v2398_v28  ;;  %v3947_v15 = vshrl.u32 %v647_v61, 30  ;;  %v3955_v54 = vshll.u32 %v1813_v56, 8 }
 0x18d   : > { %v1830_v4 = vor.u32 %v1829_v49, %v1828_v42  ;;  %v1834_v40 = vshll.u32 %v3020_v53, %v1819_v35  ;;  %vm1837_vm5 = vcmp.lt.s32.totalorder %v3934_v1, 1  ;;  %v396_v45 = vand.u32 2139095040, %v3932_v18 }
 0x18e   : > { %v2402_v58 = vadd.f32 -0.4999988, %v2401_v20  ;;  %v2409_v6 = vadd.f32 -0.16666654, %v2408_v12  ;;  %v649_v37 = vshll.u32 %v3947_v15, 30  ;;  %vm2416_vm6 = vcmp.lt.s32.totalorder %v3927_v52, 2 }
 0x18f   : > { %vm1840_vm7 = vcmp.lt.s32.totalorder %v3934_v1, 4  ;;  %vm2413_vm8 = vweird.f32 %v3639_v26  ;;  %v1836_v33 = vor.u32 %v1835_v50, %v1834_v40  ;;  %vm1839_vm9 = vcmp.lt.s32.totalorder %v3934_v1, 3 }
 0x190   : > { %v2403_v13 = vmul.f32 %v2402_v58, %v2398_v28  ;;  %v2410_v57 = vmul.f32 %v2409_v6, %v2398_v28  ;;  %v650_v41 = vsub.s32 %v646_v16, %v649_v37  ;;  %v1845_v60 = vsel %vm1837_vm5, %v1824_v5, %v3950_v59 }
 0x191   : > { %v1846_v29 = vsel %vm1840_vm7, %v1833_v39, 920167782  ;;  %vm550_vm10 = vcmp.lt.s32.totalorder %v3669_v30, 0  ;;  %v642_v7 = vadd.s32 %v3905_v31, %v3902_v21  ;;  %v1854_v36 = vand.u32 65535, %v3955_v54 }
 0x192   : > { %v2404_v35 = vadd.f32 1.0, %v2403_v13  ;;  %v2411_v32 = vadd.f32 1.0, %v2410_v57  ;;  %vm651_vm12 = vcmp.lt.s32.totalorder %v650_v41, 0  ;;  %v652_v28 = vsub.s32 0, %v650_v41 }
 0x193   : > { %v1847_v27 = vsel %vm1839_vm9, %v1830_v4, %v1846_v29  ;;  %v1855_v43 = vshrl.u32 %v3955_v54, 16  ;;  %vm1838_vm11 = vcmp.lt.s32.totalorder %v3934_v1, 2  ;;  %v1849_v21 = vsel %vm1837_vm5, %v3950_v59, %v1830_v4 }
 0x194   : > { %v2412_v16 = vmul.f32 %v2411_v32, %v3916_v55  ;;  %v2421_v56 = vxor.u32 2147483648, %v2404_v35  ;;  %v653_v17 = vsel %vm651_vm12, %v652_v28, %v650_v41  ;;  %v1848_v8 = vsel %vm1838_vm11, %v1845_v60, %v1847_v27 }
 0x195   : > { %v654_v34 = vclz %v653_v17  ;;  %v1850_v31 = vsel %vm1840_vm7, %v1836_v33, 1326507024  ;;  %v1821_v61 = vshrl.u32 %v3016_v44, %v3929_v25  ;;  %v397_v2 = vshrl.u32 %v396_v45, 23 }
 0x196   : > { %v2418_v14 = vxor.u32 2147483648, %v2412_v16  ;;  %v1851_v55 = vsel %vm1839_vm9, %v1833_v39, %v1850_v31  ;;  %v672_v49 = vsub.s32 4, %v3947_v15  ;;  %v1842_v0 = vsel %vm1840_vm7, %v1830_v4, 2102212464 }
 0x197   : > { %v2841_v63 = vadd.s32 4294967294, %v654_v34  ;;  %v1878_v47 = vand.u32 65535, %v1848_v8  ;;  %v2422_v12 = vsel %vm2420_vm4, %v2421_v56, %v2412_v16  ;;  %v1852_v25 = vsel %vm1838_vm11, %v1849_v21, %v1851_v55 }
 0x198   : > { %v2419_v20 = vsel %vm2417_vm3, %v2404_v35, %v2418_v14  ;;  %v1879_v42 = vshrl.u32 %v1848_v8, 16  ;;  %v1856_v50 = vand.u32 65535, %v1852_v25  ;;  %v1857_v58 = vshrl.u32 %v1852_v25, 16 }
 0x199   : > { %v2423_v39 = vsel %vm2416_vm6, %v2419_v20, %v2422_v12  ;;  %vm2842_vm13 = vcmp.lt.s32.totalorder %v2841_v63, 0  ;;  %v1841_v4 = vsel %vm1837_vm5, %v1821_v61, %v1824_v5  ;;  %v673_v57 = vsel %vm550_vm10, %v672_v49, %v3947_v15 }
 0x19a   : > { %v2424_v6 = vsel %vm2413_vm8, nan, %v2423_v39  ;;  %v657_v37 = vsel %vm2842_vm13, 0, %v2841_v63  ;;  %v1881_v40 = vmul.u32 %v1879_v42, %v1854_v36  ;;  %v1882_v52 = vmul.u32 %v1878_v47, %v1855_v43 }
 0x19b   : > { %2748 = vst [vmem:[%s3456_s25 + $0x68] sm:$0xff] %v2424_v6  ;;  %v658_v45 = vsub.s32 32, %v657_v37  ;;  %v662_v13 = vsub.s32 4294967266, %v657_v37  ;;  %v1843_v33 = vsel %vm1839_vm9, %v3950_v59, %v1842_v0  ;;  %v1859_v60 = vmul.u32 %v1857_v58, %v1854_v36 }
 0x19c   : > { %v1860_v26 = vmul.u32 %v1856_v50, %v1855_v43  ;;  %v1880_v29 = vmul.u32 %v1878_v47, %v1854_v36  ;;  %v659_v35 = vshll.u32 %v650_v41, %v657_v37  ;;  %v1884_v5 = vshll.u32 %v1881_v40, 16 }
 0x19d   : > { %v660_v32 = vshrl.u32 %v642_v7, %v658_v45  ;;  %v663_v28 = vadd.s32 127, %v662_v13  ;;  %v1858_v27 = vmul.u32 %v1856_v50, %v1854_v36  ;;  %v1861_v16 = vmul.u32 %v1857_v58, %v1855_v43 }
 0x19e   : > { %v1862_v56 = vshll.u32 %v1859_v60, 16  ;;  %v1883_v17 = vmul.u32 %v1879_v42, %v1855_v43  ;;  %v1864_v21 = vshll.u32 %v1860_v26, 16  ;;  %v1886_v15 = vshll.u32 %v1882_v52, 16 }
 0x19f   : > { %v661_v34 = vor.u32 %v660_v32, %v659_v35  ;;  %v664_v8 = vshll.u32 %v663_v28, 23  ;;  %vm1888_vm15 = vc.u32 %v1880_v29, %v1884_v5  ;;  %v1890_v14 = vadd.s32 %v1884_v5, %v1880_v29 }
 0x1a0   : > { %vm1866_vm14 = vc.u32 %v1858_v27, %v1862_v56  ;;  %v1868_v31 = vadd.s32 %v1862_v56, %v1858_v27  ;;  %v1885_v55 = vshrl.u32 %v1881_v40, 16  ;;  %v1889_v41 = vsel %vm1888_vm15, 1, %v3014_v3 }
 0x1a1   : > { %v665_v59 = vor.u32 4788187, %v664_v8  ;;  %v1867_v61 = vsel %vm1866_vm14, 1, %v3014_v3  ;;  %v1891_v36 = vadd.s32 %v1889_v41, %v1883_v17  ;;  %vm1892_vm1 = vc.u32 %v1890_v14, %v1886_v15  ;;  %v4045_v8 = vld [vmem:[%s3105_s3 + $0x1] ss:$0 sm:$0xff] }
 0x1a2   : > { %v1869_v7 = vadd.s32 %v1867_v61, %v1861_v16  ;;  %vm1870_vm0 = vc.u32 %v1868_v31, %v1864_v21  ;;  %v668_v43 = vcvt.s32.f32 %v661_v34  ;;  %v1893_v0 = vsel %vm1892_vm1, 1, %v3014_v3 }
 0x1a3   : > { %v666_v63 = vand.u32 2147483647, %v665_v59  ;;  %v1871_v49 = vsel %vm1870_vm0, 1, %v3014_v3  ;;  %v1863_v47 = vshrl.u32 %v1859_v60, 16  ;;  %v1895_v12 = vadd.s32 %v1893_v0, %v1891_v36 }
 0x1a4   : > { %v1873_v20 = vadd.s32 %v1871_v49, %v1869_v7  ;;  %v2837_v25 = vadd.s32 4294967169, %v397_v2  ;;  %vm4019_vm2 = vcmp.le.f32.partialorder %v548_v24, 0.7853982  ;;  %v1865_v50 = vshrl.u32 %v1860_v26, 16 }
 0x1a5   : > { %v669_v39 = vmul.f32 %v668_v43, %v666_v63  ;;  %v1887_v6 = vshrl.u32 %v1882_v52, 16  ;;  %v1896_v37 = vadd.s32 %v1895_v12, %v1885_v55  ;;  %v675_v13 = vsel %vm4019_vm2, 0, %v673_v57 }
 0x1a6   : > { %v1874_v58 = vadd.s32 %v1873_v20, %v1863_v47  ;;  %v403_v40 = vadd.s32 1, %v2837_v25  ;;  %v1844_v60 = vsel %vm1838_vm11, %v1841_v4, %v1843_v33  ;;  %v393_v2 = vand.u32 2147483647, %v3932_v18 }
 0x1a7   : > { %v670_v45 = vxor.u32 2147483648, %v669_v39  ;;  %v4030_v24 = vadd.s32 %v1890_v14, %v1886_v15  ;;  %v1897_v35 = vadd.s32 %v1896_v37, %v1887_v6  ;;  %v692_v32 = vadd.s32 3, %v675_v13 }
 0x1a8   : > { %v4028_v29 = vadd.s32 %v1874_v58, %v1865_v50  ;;  %vm404_vm3 = vcmp.gt.s32.totalorder %v403_v40, 0  ;;  %v1898_v33 = vmul.u32 %v3955_v54, %v1844_v60  ;;  %v400_v28 = vand.u32 8388607, %v393_v2 }
 0x1a9   : > { %v671_v52 = vsel %vm550_vm10, %v670_v45, %v669_v39  ;;  %v405_v26 = vsel %vm404_vm3, %v403_v40, 0  ;;  %v1901_v1 = vadd.s32 1, %v1897_v35  ;;  %v1480_v21 = vmul.f32 %v4045_v8, %v3863_v9 }
 0x1aa   : > { %v674_v57 = vsel %vm4019_vm2, %v3669_v30, %v671_v52  ;;  %vm1900_vm4 = vc.u32 %v4028_v29, %v4030_v24  ;;  %v407_v5 = vand.u32 31, %v405_v26  ;;  %v4049_v15 = vand.u32 3, %v692_v32 }
 0x1ab   : > { %v676_v4 = vmul.f32 %v674_v57, %v674_v57  ;;  %v1902_v27 = vsel %vm1900_vm4, %v1901_v1, %v1897_v35  ;;  %v401_v59 = vor.u32 8388608, %v400_v28  ;;  %v4058_v7 = vadd.f32 %v1480_v21, %v3920_v11 }
 0x1ac   : > { %v1903_v17 = vadd.s32 %v1902_v27, %v1898_v33  ;;  %v4042_v34 = vsub.s32 32, %v407_v5  ;;  %v4062_v43 = vshrl.u32 %v405_v26, 5  ;;  %v410_v49 = vshll.u32 %v3016_v44, %v407_v5 }
 0x1ad   : > { %v677_v16 = vmul.f32 -0.001358992, %v676_v4  ;;  %v684_v56 = vmul.f32 -0.00019511016, %v676_v4  ;;  %v413_v0 = vshll.u32 %v3017_v46, %v407_v5  ;;  %v419_v20 = vshll.u32 %v3019_v51, %v407_v5 }
 0x1ae   : > { %v1904_v54 = vadd.s32 536870912, %v1903_v17  ;;  %v411_v61 = vshrl.u32 %v3017_v46, %v4042_v34  ;;  %v414_v55 = vshrl.u32 %v3018_v48, %v4042_v34  ;;  %v420_v41 = vshrl.u32 %v3020_v53, %v4042_v34 }
 0x1af   : > { %v678_v31 = vadd.f32 0.041655596, %v677_v16  ;;  %v685_v14 = vadd.f32 0.008332121, %v684_v56  ;;  %v417_v47 = vshrl.u32 %v3019_v51, %v4042_v34  ;;  %v4070_v42 = vshll.u32 %v401_v59, 8 }
 0x1b0   : > { %v4060_v63 = vshrl.u32 %v1904_v54, 30  ;;  %vm695_vm5 = vcmp.eq.s32.totalorder %v4049_v15, 0  ;;  %v4073_v39 = vor.u32 %v411_v61, %v410_v49  ;;  %v4075_v50 = vor.u32 %v414_v55, %v413_v0 }
 0x1b1   : > { %v679_v36 = vmul.f32 %v678_v31, %v676_v4  ;;  %v686_v9 = vmul.f32 %v685_v14, %v676_v4  ;;  %v416_v58 = vshll.u32 %v3018_v48, %v407_v5  ;;  %v421_v6 = vor.u32 %v420_v41, %v419_v20 }
 0x1b2   : > { %v1906_v11 = vshll.u32 %v4060_v63, 30  ;;  %vm694_vm6 = vcmp.lt.s32.totalorder %v4049_v15, 2  ;;  %v423_v13 = vshrl.u32 %v3021_v62, %v4042_v34  ;;  %vm691_vm7 = vweird.f32 %v3669_v30 }
 0x1b3   : > { %v680_v12 = vadd.f32 -0.4999988, %v679_v36  ;;  %v687_v25 = vadd.f32 -0.16666654, %v686_v9  ;;  %v418_v60 = vor.u32 %v417_v47, %v416_v58  ;;  %v422_v35 = vshll.u32 %v3020_v53, %v407_v5 }
 0x1b4   : > { %v4079_v45 = vsub.s32 %v1903_v17, %v1906_v11  ;;  %vm425_vm8 = vcmp.lt.s32.totalorder %v4062_v43, 1  ;;  %vm428_vm9 = vcmp.lt.s32.totalorder %v4062_v43, 4  ;;  %vm698_vm12 = vcmp.eq.s32.totalorder %v4049_v15, 2 }
 0x1b5   : > { %v681_v37 = vmul.f32 %v680_v12, %v676_v4  ;;  %v688_v40 = vmul.f32 %v687_v25, %v676_v4  ;;  %vm1807_vm11 = vcmp.lt.s32.totalorder %v3872_v38, 0  ;;  %vm427_vm13 = vcmp.lt.s32.totalorder %v4062_v43, 3 }
 0x1b6   : > { %vm1908_vm10 = vcmp.lt.s32.totalorder %v4079_v45, 0  ;;  %v1909_v32 = vsub.s32 0, %v4079_v45  ;;  %v433_v1 = vsel %vm425_vm8, %v4073_v39, %v4075_v50  ;;  %v434_v4 = vsel %vm428_vm9, %v421_v6, 920167782 }
 0x1b7   : > { %v682_v52 = vadd.f32 1.0, %v681_v37  ;;  %v689_v26 = vadd.f32 1.0, %v688_v40  ;;  %v424_v27 = vor.u32 %v423_v13, %v422_v35  ;;  %vm426_vm14 = vcmp.lt.s32.totalorder %v4062_v43, 2 }
 0x1b8   : > { %v1910_v5 = vsel %vm1908_vm10, %v1909_v32, %v4079_v45  ;;  %v435_v56 = vsel %vm427_vm13, %v418_v60, %v434_v4  ;;  %v1653_v17 = vand.u32 2139095040, %v4058_v7  ;;  %v442_v14 = vand.u32 65535, %v4070_v42 }
 0x1b9   : > { %v690_v33 = vmul.f32 %v689_v26, %v674_v57  ;;  %v699_v28 = vxor.u32 2147483648, %v682_v52  ;;  %v1911_v16 = vclz %v1910_v5  ;;  %v436_v31 = vsel %vm426_vm14, %v433_v1, %v435_v56 }
 0x1ba   : > { %v443_v57 = vshrl.u32 %v4070_v42, 16  ;;  %v1929_v61 = vsub.s32 4, %v4060_v63  ;;  %v437_v55 = vsel %vm425_vm8, %v4075_v50, %v418_v60  ;;  %v438_v36 = vsel %vm428_vm9, %v424_v27, 1326507024 }
 0x1bb   : > { %v696_v21 = vxor.u32 2147483648, %v690_v33  ;;  %v700_v54 = vsel %vm698_vm12, %v699_v28, %v690_v33  ;;  %v2865_v59 = vadd.s32 4294967294, %v1911_v16  ;;  %v466_v9 = vand.u32 65535, %v436_v31 }
 0x1bc   : > { %v467_v49 = vshrl.u32 %v436_v31, 16  ;;  %v1899_v47 = vadd.s32 %v4030_v24, %v4028_v29  ;;  %v439_v20 = vsel %vm427_vm13, %v421_v6, %v438_v36  ;;  %v1654_v58 = vshrl.u32 %v1653_v17, 23 }
 0x1bd   : > { %v697_v41 = vsel %vm695_vm5, %v682_v52, %v696_v21  ;;  %vm2866_vm15 = vcmp.lt.s32.totalorder %v2865_v59, 0  ;;  %v440_v11 = vsel %vm426_vm14, %v437_v55, %v439_v20  ;;  %v409_v15 = vshrl.u32 %v3016_v44, %v4042_v34 }
 0x1be   : > { %v701_v0 = vsel %vm694_vm6, %v697_v41, %v700_v54  ;;  %v1914_v25 = vsel %vm2866_vm15, 0, %v2865_v59  ;;  %v444_v13 = vand.u32 65535, %v440_v11  ;;  %v1930_v29 = vsel %vm1807_vm11, %v1929_v61, %v4060_v63 }
 0x1bf   : > { %v702_v12 = vsel %vm691_vm7, nan, %v701_v0  ;;  %v1915_v37 = vsub.s32 32, %v1914_v25  ;;  %v1919_v40 = vsub.s32 4294967266, %v1914_v25  ;;  %v445_v24 = vshrl.u32 %v440_v11, 16 }
 0x1c0   : > { %2737 = vst [vmem:[%s3456_s25 + $0x10] sm:$0xff] %v702_v12  ;;  %v469_v6 = vmul.u32 %v467_v49, %v442_v14  ;;  %v470_v30 = vmul.u32 %v466_v9, %v443_v57  ;;  %v1916_v35 = vshll.u32 %v4079_v45, %v1914_v25  ;;  %v448_v32 = vmul.u32 %v444_v13, %v443_v57 }
 0x1c1   : > { %v1917_v52 = vshrl.u32 %v1899_v47, %v1915_v37  ;;  %v1920_v26 = vadd.s32 127, %v1919_v40  ;;  %v430_v1 = vsel %vm428_vm9, %v418_v60, 2102212464  ;;  %v447_v4 = vmul.u32 %v445_v24, %v442_v14 }
 0x1c2   : > { %v468_v33 = vmul.u32 %v466_v9, %v442_v14  ;;  %v472_v28 = vshll.u32 %v469_v6, 16  ;;  %vm4138_vm0 = vcmp.le.f32.partialorder %v1805_v23, 0.7853982  ;;  %v446_v27 = vmul.u32 %v444_v13, %v442_v14 }
 0x1c3   : > { %v1918_v63 = vor.u32 %v1917_v52, %v1916_v35  ;;  %v1921_v5 = vshll.u32 %v1920_v26, 23  ;;  %v471_v16 = vmul.u32 %v467_v49, %v443_v57  ;;  %v449_v45 = vmul.u32 %v445_v24, %v443_v57 }
 0x1c4   : > { %v450_v56 = vshll.u32 %v447_v4, 16  ;;  %v452_v17 = vshll.u32 %v448_v32, 16  ;;  %v474_v21 = vshll.u32 %v470_v30, 16  ;;  %vm476_vm1 = vc.u32 %v468_v33, %v472_v28 }
 0x1c5   : > { %v1922_v31 = vor.u32 4788187, %v1921_v5  ;;  %v1925_v54 = vcvt.s32.f32 %v1918_v63  ;;  %v478_v60 = vadd.s32 %v472_v28, %v468_v33  ;;  %v477_v61 = vsel %vm476_vm1, 1, %v3014_v3 }
 0x1c6   : > { %vm454_vm2 = vc.u32 %v446_v27, %v450_v56  ;;  %v456_v59 = vadd.s32 %v450_v56, %v446_v27  ;;  %v2861_v23 = vadd.s32 4294967169, %v1654_v58  ;;  %v479_v36 = vadd.s32 %v477_v61, %v471_v16 }
 0x1c7   : > { %v1923_v55 = vand.u32 2147483647, %v1922_v31  ;;  %v455_v41 = vsel %vm454_vm2, 1, %v3014_v3  ;;  %vm480_vm3 = vc.u32 %v478_v60, %v474_v21  ;;  %v429_v14 = vsel %vm425_vm8, %v409_v15, %v4073_v39 }
 0x1c8   : > { %v457_v57 = vadd.s32 %v455_v41, %v449_v45  ;;  %vm458_vm4 = vc.u32 %v456_v59, %v452_v17  ;;  %v481_v9 = vsel %vm480_vm3, 1, %v3014_v3  ;;  %v473_v47 = vshrl.u32 %v469_v6, 16  ;;  %v4174_v45 = vld [vmem:[%s3105_s3] ss:$0 sm:$0xff] }
 0x1c9   : > { %v1926_v49 = vmul.f32 %v1925_v54, %v1923_v55  ;;  %v459_v0 = vsel %vm458_vm4, 1, %v3014_v3  ;;  %v483_v20 = vadd.s32 %v481_v9, %v479_v36  ;;  %v431_v12 = vsel %vm427_vm13, %v4075_v50, %v430_v1 }
 0x1ca   : > { %v451_v25 = vshrl.u32 %v447_v4, 16  ;;  %v461_v11 = vadd.s32 %v459_v0, %v457_v57  ;;  %v1660_v58 = vadd.s32 1, %v2861_v23  ;;  %v475_v40 = vshrl.u32 %v470_v30, 16 }
 0x1cb   : > { %v1927_v37 = vxor.u32 2147483648, %v1926_v49  ;;  %v484_v13 = vadd.s32 %v483_v20, %v473_v47  ;;  %v1650_v39 = vand.u32 2147483647, %v4058_v7  ;;  %v1932_v15 = vsel %vm4138_vm0, 0, %v1930_v29 }
 0x1cc   : > { %v453_v24 = vshrl.u32 %v448_v32, 16  ;;  %v462_v35 = vadd.s32 %v461_v11, %v451_v25  ;;  %vm1661_vm5 = vcmp.gt.s32.totalorder %v1660_v58, 0  ;;  %v432_v50 = vsel %vm426_vm14, %v429_v14, %v431_v12 }
 0x1cd   : > { %v1928_v6 = vsel %vm1807_vm11, %v1927_v37, %v1926_v49  ;;  %v485_v52 = vadd.s32 %v484_v13, %v475_v40  ;;  %v1662_v26 = vsel %vm1661_vm5, %v1660_v58, 0  ;;  %v4164_v4 = vadd.s32 %v478_v60, %v474_v21 }
 0x1ce   : > { %v1931_v30 = vsel %vm4138_vm0, %v3872_v38, %v1928_v6  ;;  %v4162_v1 = vadd.s32 %v462_v35, %v453_v24  ;;  %v1664_v29 = vand.u32 31, %v1662_v26  ;;  %v1949_v33 = vadd.s32 3, %v1932_v15 }
 0x1cf   : > { %v1933_v32 = vmul.f32 %v1931_v30, %v1931_v30  ;;  %v489_v28 = vadd.s32 1, %v485_v52  ;;  %v1657_v63 = vand.u32 8388607, %v1650_v39  ;;  %v486_v43 = vmul.u32 %v4070_v42, %v432_v50 }
 0x1d0   : > { %vm488_vm6 = vc.u32 %v4162_v1, %v4164_v4  ;;  %v4171_v5 = vsub.s32 32, %v1664_v29  ;;  %v4178_v56 = vmul.f32 %v4174_v45, %v3122_v10  ;;  %v1950_v54 = vand.u32 3, %v1949_v33 }
 0x1d1   : > { %v1934_v34 = vmul.f32 -0.001358992, %v1933_v32  ;;  %v1941_v27 = vmul.f32 -0.00019511016, %v1933_v32  ;;  %v490_v16 = vsel %vm488_vm6, %v489_v28, %v485_v52  ;;  %v1658_v60 = vor.u32 8388608, %v1657_v63 }
 0x1d2   : > { %v491_v17 = vadd.s32 %v490_v16, %v486_v43  ;;  %v4180_v59 = vshrl.u32 %v1662_v26, 5  ;;  %v1668_v61 = vshrl.u32 %v3017_v46, %v4171_v5  ;;  %v1671_v23 = vshrl.u32 %v3018_v48, %v4171_v5 }
 0x1d3   : > { %v1935_v21 = vadd.f32 0.041655596, %v1934_v34  ;;  %v1942_v31 = vadd.f32 0.008332121, %v1941_v27  ;;  %v1667_v36 = vshll.u32 %v3016_v44, %v1664_v29  ;;  %v1677_v14 = vshrl.u32 %v3020_v53, %v4171_v5 }
 0x1d4   : > { %v492_v42 = vadd.s32 536870912, %v491_v17  ;;  %v1670_v9 = vshll.u32 %v3017_v46, %v1664_v29  ;;  %v1674_v49 = vshrl.u32 %v3019_v51, %v4171_v5  ;;  %v1680_v0 = vshrl.u32 %v3021_v62, %v4171_v5 }
 0x1d5   : > { %v1936_v55 = vmul.f32 %v1935_v21, %v1933_v32  ;;  %v1943_v41 = vmul.f32 %v1942_v31, %v1933_v32  ;;  %v1673_v12 = vshll.u32 %v3018_v48, %v1664_v29  ;;  %v1676_v25 = vshll.u32 %v3019_v51, %v1664_v29 }
 0x1d6   : > { %v4189_v57 = vshrl.u32 %v492_v42, 30  ;;  %v4199_v58 = vor.u32 %v1668_v61, %v1667_v36  ;;  %v4201_v37 = vor.u32 %v1671_v23, %v1670_v9  ;;  %v1679_v40 = vshll.u32 %v3020_v53, %v1664_v29 }
 0x1d7   : > { %v1937_v47 = vadd.f32 -0.4999988, %v1936_v55  ;;  %v1944_v20 = vadd.f32 -0.16666654, %v1943_v41  ;;  %vm1951_vm7 = vcmp.lt.s32.totalorder %v1950_v54, 2  ;;  %v1678_v24 = vor.u32 %v1677_v14, %v1676_v25  ;;  %v4241_v14 = vpop.permute.xlu1 %215 }
 0x1d8   : > { %v494_v11 = vshll.u32 %v4189_v57, 30  ;;  %vm1948_vm8 = vweird.f32 %v3872_v38  ;;  %v4207_v6 = vor.u32 %v1674_v49, %v1673_v12  ;;  %v1681_v50 = vor.u32 %v1680_v0, %v1679_v40 }
 0x1d9   : > { %v1938_v13 = vmul.f32 %v1937_v47, %v1933_v32  ;;  %v1945_v15 = vmul.f32 %v1944_v20, %v1933_v32  ;;  %v4209_v52 = vshll.u32 %v1658_v60, 8  ;;  %vm1682_vm9 = vcmp.lt.s32.totalorder %v4180_v59, 1 }
 0x1da   : > { %v4205_v35 = vsub.s32 %v491_v17, %v494_v11  ;;  %vm1683_vm10 = vcmp.lt.s32.totalorder %v4180_v59, 2  ;;  %vm1685_vm11 = vcmp.lt.s32.totalorder %v4180_v59, 4  ;;  %v1690_v32 = vsel %vm1682_vm9, %v4199_v58, %v4201_v37 }
 0x1db   : > { %v1939_v26 = vadd.f32 1.0, %v1938_v13  ;;  %v1946_v33 = vadd.f32 1.0, %v1945_v15  ;;  %vm1684_vm13 = vcmp.lt.s32.totalorder %v4180_v59, 3  ;;  %v1691_v43 = vsel %vm1685_vm11, %v1678_v24, 920167782 }
 0x1dc   : > { %vm496_vm12 = vcmp.lt.s32.totalorder %v4205_v35, 0  ;;  %v497_v29 = vsub.s32 0, %v4205_v35  ;;  %v1692_v27 = vsel %vm1684_vm13, %v4207_v6, %v1691_v43  ;;  %v1694_v16 = vsel %vm1682_vm9, %v4201_v37, %v4207_v6 }
 0x1dd   : > { %v1947_v28 = vmul.f32 %v1946_v33, %v1931_v30  ;;  %v1956_v63 = vxor.u32 2147483648, %v1939_v26  ;;  %v1695_v30 = vsel %vm1685_vm11, %v1681_v50, 1326507024  ;;  %vm1952_vm14 = vcmp.eq.s32.totalorder %v1950_v54, 0 }
 0x1de   : > { %v498_v34 = vsel %vm496_vm12, %v497_v29, %v4205_v35  ;;  %v1693_v31 = vsel %vm1683_vm10, %v1690_v32, %v1692_v27  ;;  %vm1955_vm15 = vcmp.eq.s32.totalorder %v1950_v54, 2  ;;  %v1696_v60 = vsel %vm1684_vm13, %v1678_v24, %v1695_v30 }
 0x1df   : > { %v1953_v17 = vxor.u32 2147483648, %v1947_v28  ;;  %v499_v21 = vclz %v498_v34  ;;  %v1699_v42 = vand.u32 65535, %v4209_v52  ;;  %v1700_v61 = vshrl.u32 %v4209_v52, 16 }
 0x1e0   : > { %v1957_v55 = vsel %vm1955_vm15, %v1956_v63, %v1947_v28  ;;  %v1697_v36 = vsel %vm1683_vm10, %v1694_v16, %v1696_v60  ;;  %v1723_v47 = vand.u32 65535, %v1693_v31  ;;  %v1724_v12 = vshrl.u32 %v1693_v31, 16 }
 0x1e1   : > { %v1954_v23 = vsel %vm1952_vm14, %v1939_v26, %v1953_v17  ;;  %v2838_v41 = vadd.s32 4294967294, %v499_v21  ;;  %v1701_v49 = vand.u32 65535, %v1697_v36  ;;  %v1702_v0 = vshrl.u32 %v1697_v36, 16 }
 0x1e2   : > { %v1958_v9 = vsel %vm1951_vm7, %v1954_v23, %v1957_v55  ;;  %v4249_v13 = vadd.f32 %v4241_v14, %v4178_v56  ;;  %v487_v54 = vadd.s32 %v4164_v4, %v4162_v1  ;;  %v517_v50 = vsub.s32 4, %v4189_v57 }
 0x1e3   : > { %v1959_v20 = vsel %vm1948_vm8, nan, %v1958_v9  ;;  %vm2839_vm0 = vcmp.lt.s32.totalorder %v2838_v41, 0  ;;  %v1704_v11 = vmul.u32 %v1702_v0, %v1699_v42  ;;  %v1705_v40 = vmul.u32 %v1701_v49, %v1700_v61 }
 0x1e4   : > { %2745 = vst [vmem:[%s3456_s25 + $0x50] sm:$0xff] %v1959_v20  ;;  %v502_v25 = vsel %vm2839_vm0, 0, %v2838_v41  ;;  %vm395_vm1 = vcmp.lt.s32.totalorder %v3932_v18, 0  ;;  %v1703_v38 = vmul.u32 %v1701_v49, %v1699_v42  ;;  %v1725_v33 = vmul.u32 %v1723_v47, %v1699_v42 }
 0x1e5   : > { %v503_v15 = vsub.s32 32, %v502_v25  ;;  %v507_v24 = vsub.s32 4294967266, %v502_v25  ;;  %v1707_v26 = vshll.u32 %v1704_v11, 16  ;;  %v1727_v29 = vmul.u32 %v1723_v47, %v1700_v61 }
 0x1e6   : > { %v504_v32 = vshll.u32 %v4205_v35, %v502_v25  ;;  %v1726_v43 = vmul.u32 %v1724_v12, %v1699_v42  ;;  %v1706_v56 = vmul.u32 %v1702_v0, %v1700_v61  ;;  %v1709_v34 = vshll.u32 %v1705_v40, 16 }
 0x1e7   : > { %v505_v28 = vshrl.u32 %v487_v54, %v503_v15  ;;  %v508_v63 = vadd.s32 127, %v507_v24  ;;  %vm1711_vm2 = vc.u32 %v1703_v38, %v1707_v26  ;;  %v1713_v27 = vadd.s32 %v1707_v26, %v1703_v38 }
 0x1e8   : > { %vm4258_vm3 = vcmp.le.f32.partialorder %v393_v2, 0.7853982  ;;  %v1712_v30 = vsel %vm1711_vm2, 1, %v3014_v3  ;;  %v1729_v17 = vshll.u32 %v1726_v43, 16  ;;  %v1708_v21 = vshrl.u32 %v1704_v11, 16 }
 0x1e9   : > { %v506_v4 = vor.u32 %v505_v28, %v504_v32  ;;  %v509_v16 = vshll.u32 %v508_v63, 23  ;;  %v1714_v35 = vadd.s32 %v1712_v30, %v1706_v56  ;;  %vm1715_vm4 = vc.u32 %v1713_v27, %v1709_v34 }
 0x1ea   : > { %v1728_v31 = vmul.u32 %v1724_v12, %v1700_v61  ;;  %v1716_v42 = vsel %vm1715_vm4, 1, %v3014_v3  ;;  %v1731_v23 = vshll.u32 %v1727_v29, 16  ;;  %vm1733_vm5 = vc.u32 %v1725_v33, %v1729_v17 }
 0x1eb   : > { %v510_v60 = vor.u32 4788187, %v509_v16  ;;  %v1718_v55 = vadd.s32 %v1716_v42, %v1714_v35  ;;  %v1734_v2 = vsel %vm1733_vm5, 1, %v3014_v3  ;;  %v1735_v41 = vadd.s32 %v1729_v17, %v1725_v33 }
 0x1ec   : > { %v861_v36 = vand.u32 2139095040, %v4249_v13  ;;  %v513_v49 = vcvt.s32.f32 %v506_v4  ;;  %v1666_v0 = vshrl.u32 %v3016_v44, %v4171_v5  ;;  %v1736_v47 = vadd.s32 %v1734_v2, %v1728_v31 }
 0x1ed   : > { %v511_v9 = vand.u32 2147483647, %v510_v60  ;;  %v1687_v61 = vsel %vm1685_vm11, %v4207_v6, 2102212464  ;;  %v1719_v20 = vadd.s32 %v1718_v55, %v1708_v21  ;;  %vm1737_vm6 = vc.u32 %v1735_v41, %v1731_v23 }
 0x1ee   : > { %v862_v12 = vshrl.u32 %v861_v36, 23  ;;  %v518_v11 = vsel %vm395_vm1, %v517_v50, %v4189_v57  ;;  %v1710_v54 = vshrl.u32 %v1705_v40, 16  ;;  %v1738_v15 = vsel %vm1737_vm6, 1, %v3014_v3 }
 0x1ef   : > { %v514_v25 = vmul.f32 %v513_v49, %v511_v9  ;;  %v1730_v24 = vshrl.u32 %v1726_v43, 16  ;;  %v1740_v38 = vadd.s32 %v1738_v15, %v1736_v47  ;;  %v858_v5 = vand.u32 2147483647, %v4249_v13 }
 0x1f0   : > { %v2846_v26 = vadd.s32 4294967169, %v862_v12  ;;  %v1686_v6 = vsel %vm1682_vm9, %v1666_v0, %v4199_v58  ;;  %v1688_v32 = vsel %vm1684_vm13, %v4201_v37, %v1687_v61  ;;  %v4282_v28 = vadd.s32 %v1719_v20, %v1710_v54 }
 0x1f1   : > { %v515_v33 = vxor.u32 2147483648, %v514_v25  ;;  %v520_v57 = vsel %vm4258_vm3, 0, %v518_v11  ;;  %v1732_v40 = vshrl.u32 %v1727_v29, 16  ;;  %v1741_v50 = vadd.s32 %v1740_v38, %v1730_v24 }
 0x1f2   : > { %v868_v63 = vadd.s32 1, %v2846_v26  ;;  %v4288_v56 = vadd.s32 %v1735_v41, %v1731_v23  ;;  %v1689_v37 = vsel %vm1683_vm10, %v1686_v6, %v1688_v32  ;;  %v537_v4 = vadd.s32 3, %v520_v57 }
 0x1f3   : > { %v516_v43 = vsel %vm395_vm1, %v515_v33, %v514_v25  ;;  %v1742_v34 = vadd.s32 %v1741_v50, %v1732_v40  ;;  %v865_v30 = vand.u32 8388607, %v858_v5  ;;  %v1743_v1 = vmul.u32 %v4209_v52, %v1689_v37 }
 0x1f4   : > { %v519_v58 = vsel %vm4258_vm3, %v3932_v18, %v516_v43  ;;  %vm869_vm7 = vcmp.gt.s32.totalorder %v868_v63, 0  ;;  %vm1745_vm8 = vc.u32 %v4282_v28, %v4288_v56  ;;  %v1483_v59 = vmul.f32 %v4045_v8, %v3122_v10 }
 0x1f5   : > { %v521_v27 = vmul.f32 %v519_v58, %v519_v58  ;;  %v870_v29 = vsel %vm869_vm7, %v868_v63, 0  ;;  %v1746_v16 = vadd.s32 1, %v1742_v34  ;;  %v4304_v55 = vand.u32 3, %v537_v4 }
 0x1f6   : > { %v872_v17 = vand.u32 31, %v870_v29  ;;  %v866_v41 = vor.u32 8388608, %v865_v30  ;;  %v4306_v36 = vshrl.u32 %v870_v29, 5  ;;  %v4331_v40 = vadd.f32 %v1483_v59, %v4241_v14 }
 0x1f7   : > { %v522_v21 = vmul.f32 -0.001358992, %v521_v27  ;;  %v529_v35 = vmul.f32 -0.00019511016, %v521_v27  ;;  %v1747_v31 = vsel %vm1745_vm8, %v1746_v16, %v1742_v34  ;;  %vm543_vm9 = vcmp.eq.s32.totalorder %v4304_v55, 2 }
 0x1f8   : > { %v4302_v60 = vsub.s32 32, %v872_v17  ;;  %v1748_v2 = vadd.s32 %v1747_v31, %v1743_v1  ;;  %v875_v8 = vshll.u32 %v3016_v44, %v872_v17  ;;  %v878_v47 = vshll.u32 %v3017_v46, %v872_v17 }
 0x1f9   : > { %v523_v42 = vadd.f32 0.041655596, %v522_v21  ;;  %v530_v23 = vadd.f32 0.008332121, %v529_v35  ;;  %v884_v20 = vshll.u32 %v3019_v51, %v872_v17  ;;  %v881_v15 = vshll.u32 %v3018_v48, %v872_v17 }
 0x1fa   : > { %v876_v9 = vshrl.u32 %v3017_v46, %v4302_v60  ;;  %v879_v52 = vshrl.u32 %v3018_v48, %v4302_v60  ;;  %v1749_v10 = vadd.s32 536870912, %v1748_v2  ;;  %v882_v61 = vshrl.u32 %v3019_v51, %v4302_v60 }
 0x1fb   : > { %v524_v49 = vmul.f32 %v523_v42, %v521_v27  ;;  %v531_v0 = vmul.f32 %v530_v23, %v521_v27  ;;  %v885_v12 = vshrl.u32 %v3020_v53, %v4302_v60  ;;  %vm540_vm10 = vcmp.eq.s32.totalorder %v4304_v55, 0 }
 0x1fc   : > { %v4320_v54 = vshrl.u32 %v1749_v10, 30  ;;  %v877_v24 = vor.u32 %v876_v9, %v875_v8  ;;  %v4324_v38 = vor.u32 %v879_v52, %v878_v47  ;;  %v888_v33 = vshrl.u32 %v3021_v62, %v4302_v60 }
 0x1fd   : > { %v525_v25 = vadd.f32 -0.4999988, %v524_v49  ;;  %v532_v11 = vadd.f32 -0.16666654, %v531_v0  ;;  %v886_v26 = vor.u32 %v885_v12, %v884_v20  ;;  %vm539_vm12 = vcmp.lt.s32.totalorder %v4304_v55, 2 }
 0x1fe   : > { %v1751_v57 = vshll.u32 %v4320_v54, 30  ;;  %vm536_vm11 = vweird.f32 %v3932_v18  ;;  %v883_v50 = vor.u32 %v882_v61, %v881_v15  ;;  %v887_v63 = vshll.u32 %v3020_v53, %v872_v17 }
 0x1ff   : > { %v526_v6 = vmul.f32 %v525_v25, %v521_v27  ;;  %v533_v32 = vmul.f32 %v532_v11, %v521_v27  ;;  %vm890_vm13 = vcmp.lt.s32.totalorder %v4306_v36, 1  ;;  %v4336_v43 = vshll.u32 %v866_v41, 8 }
 0x200   : > { %v1752_v4 = vsub.s32 %v1748_v2, %v1751_v57  ;;  %vm893_vm14 = vcmp.lt.s32.totalorder %v4306_v36, 4  ;;  %v889_v27 = vor.u32 %v888_v33, %v887_v63  ;;  %vm892_vm15 = vcmp.lt.s32.totalorder %v4306_v36, 3 }
 0x201   : > { %v527_v37 = vadd.f32 1.0, %v526_v6  ;;  %v534_v34 = vadd.f32 1.0, %v533_v32  ;;  %v898_v14 = vsel %vm890_vm13, %v877_v24, %v4324_v38  ;;  %v899_v29 = vsel %vm893_vm14, %v886_v26, 920167782 }
 0x202   : > { %vm1652_vm0 = vcmp.lt.s32.totalorder %v4058_v7, 0  ;;  %vm1753_vm1 = vcmp.lt.s32.totalorder %v1752_v4, 0  ;;  %v1754_v17 = vsub.s32 0, %v1752_v4  ;;  %v1744_v21 = vadd.s32 %v4288_v56, %v4282_v28 }
 0x203   : > { %v535_v16 = vmul.f32 %v534_v34, %v519_v58  ;;  %v544_v30 = vxor.u32 2147483648, %v527_v37  ;;  %v900_v35 = vsel %vm892_vm15, %v883_v50, %v899_v29  ;;  %v2115_v1 = vand.u32 2147483647, %v4331_v40 }
 0x204   : > { %v2118_v59 = vand.u32 2139095040, %v4331_v40  ;;  %v1755_v42 = vsel %vm1753_vm1, %v1754_v17, %v1752_v4  ;;  %vm891_vm2 = vcmp.lt.s32.totalorder %v4306_v36, 2  ;;  %v902_v58 = vsel %vm890_vm13, %v4324_v38, %v883_v50 }
 0x205   : > { %v541_v31 = vxor.u32 2147483648, %v535_v16  ;;  %v545_v23 = vsel %vm543_vm9, %v544_v30, %v535_v16  ;;  %v1756_v2 = vclz %v1755_v42  ;;  %v901_v28 = vsel %vm891_vm2, %v898_v14, %v900_v35 }
 0x206   : > { %v903_v56 = vsel %vm893_vm14, %v889_v27, 1326507024  ;;  %v931_v52 = vand.u32 65535, %v901_v28  ;;  %v932_v49 = vshrl.u32 %v901_v28, 16  ;;  %v1774_v8 = vsub.s32 4, %v4320_v54 }
 0x207   : > { %v542_v41 = vsel %vm540_vm10, %v527_v37, %v541_v31  ;;  %v904_v9 = vsel %vm892_vm15, %v886_v26, %v903_v56  ;;  %v2862_v10 = vadd.s32 4294967294, %v1756_v2  ;;  %v907_v47 = vand.u32 65535, %v4336_v43 }
 0x208   : > { %v546_v0 = vsel %vm539_vm12, %v542_v41, %v545_v23  ;;  %v874_v20 = vshrl.u32 %v3016_v44, %v4302_v60  ;;  %v905_v12 = vsel %vm891_vm2, %v902_v58, %v904_v9  ;;  %v908_v25 = vshrl.u32 %v4336_v43, 16 }
 0x209   : > { %v547_v61 = vsel %vm536_vm11, nan, %v546_v0  ;;  %vm2863_vm3 = vcmp.lt.s32.totalorder %v2862_v10, 0  ;;  %v909_v55 = vand.u32 65535, %v905_v12  ;;  %v910_v11 = vshrl.u32 %v905_v12, 16 }
 0x20a   : > { %2736 = vst [vmem:[%s3456_s25 + $0x8] sm:$0xff] %v547_v61  ;;  %v934_v15 = vmul.u32 %v932_v49, %v907_v47  ;;  %v1759_v26 = vsel %vm2863_vm3, 0, %v2862_v10  ;;  %v894_v33 = vsel %vm890_vm13, %v874_v20, %v877_v24  ;;  %v935_v6 = vmul.u32 %v931_v52, %v908_v25 }
 0x20b   : > { %v2119_v18 = vshrl.u32 %v2118_v59, 23  ;;  %v1760_v32 = vsub.s32 32, %v1759_v26  ;;  %v1764_v57 = vsub.s32 4294967266, %v1759_v26  ;;  %v1775_v60 = vsel %vm1652_vm0, %v1774_v8, %v4320_v54 }
 0x20c   : > { %v895_v63 = vsel %vm893_vm14, %v883_v50, 2102212464  ;;  %vm4387_vm4 = vcmp.le.f32.partialorder %v1650_v39, 0.7853982  ;;  %v912_v34 = vmul.u32 %v910_v11, %v907_v47  ;;  %v913_v27 = vmul.u32 %v909_v55, %v908_v25 }
 0x20d   : > { %v933_v24 = vmul.u32 %v931_v52, %v907_v47  ;;  %v937_v14 = vshll.u32 %v934_v15, 16  ;;  %v1761_v29 = vshll.u32 %v1752_v4, %v1759_v26  ;;  %v1762_v16 = vshrl.u32 %v1744_v21, %v1760_v32 }
 0x20e   : > { %v1765_v30 = vadd.s32 127, %v1764_v57  ;;  %v936_v17 = vmul.u32 %v932_v49, %v908_v25  ;;  %v911_v35 = vmul.u32 %v909_v55, %v907_v47  ;;  %v914_v59 = vmul.u32 %v910_v11, %v908_v25 }
 0x20f   : > { %v915_v54 = vshll.u32 %v912_v34, 16  ;;  %v939_v31 = vshll.u32 %v935_v6, 16  ;;  %v1763_v42 = vor.u32 %v1762_v16, %v1761_v29  ;;  %v917_v58 = vshll.u32 %v913_v27, 16 }
 0x210   : > { %v1766_v50 = vshll.u32 %v1765_v30, 23  ;;  %vm941_vm5 = vc.u32 %v933_v24, %v937_v14  ;;  %v943_v2 = vadd.s32 %v937_v14, %v933_v24  ;;  %v896_v4 = vsel %vm892_vm15, %v4324_v38, %v895_v63 }
 0x211   : > { %vm919_vm6 = vc.u32 %v911_v35, %v915_v54  ;;  %v921_v39 = vadd.s32 %v915_v54, %v911_v35  ;;  %v942_v23 = vsel %vm941_vm5, 1, %v3014_v3  ;;  %v1770_v41 = vcvt.s32.f32 %v1763_v42 }
 0x212   : > { %v1767_v28 = vor.u32 4788187, %v1766_v50  ;;  %v920_v21 = vsel %vm919_vm6, 1, %v3014_v3  ;;  %v944_v56 = vadd.s32 %v942_v23, %v936_v17  ;;  %vm945_vm8 = vc.u32 %v943_v2, %v939_v31 }
 0x213   : > { %v922_v9 = vadd.s32 %v920_v21, %v914_v59  ;;  %vm923_vm7 = vc.u32 %v921_v39, %v917_v58  ;;  %v946_v0 = vsel %vm945_vm8, 1, %v3014_v3  ;;  %v2870_v10 = vadd.s32 4294967169, %v2119_v18 }
 0x214   : > { %v1768_v52 = vand.u32 2147483647, %v1767_v28  ;;  %v924_v49 = vsel %vm923_vm7, 1, %v3014_v3  ;;  %v916_v8 = vshrl.u32 %v912_v34, 16  ;;  %v938_v61 = vshrl.u32 %v934_v15, 16 }
 0x215   : > { %v926_v47 = vadd.s32 %v924_v49, %v922_v9  ;;  %v948_v20 = vadd.s32 %v946_v0, %v944_v56  ;;  %v1777_v38 = vsel %vm4387_vm4, 0, %v1775_v60  ;;  %v2125_v25 = vadd.s32 1, %v2870_v10 }
 0x216   : > { %v1771_v12 = vmul.f32 %v1770_v41, %v1768_v52  ;;  %v918_v55 = vshrl.u32 %v913_v27, 16  ;;  %v940_v26 = vshrl.u32 %v935_v6, 16  ;;  %v897_v63 = vsel %vm891_vm2, %v894_v33, %v896_v4 }
 0x217   : > { %v927_v11 = vadd.s32 %v926_v47, %v916_v8  ;;  %v949_v32 = vadd.s32 %v948_v20, %v938_v61  ;;  %v2122_v18 = vand.u32 8388607, %v2115_v1  ;;  %vm2126_vm9 = vcmp.gt.s32.totalorder %v2125_v25, 0 }
 0x218   : > { %v1772_v57 = vxor.u32 2147483648, %v1771_v12  ;;  %v4406_v15 = vadd.s32 %v943_v2, %v939_v31  ;;  %v2127_v14 = vsel %vm2126_vm9, %v2125_v25, 0  ;;  %v1794_v27 = vadd.s32 3, %v1777_v38 }
 0x219   : > { %v4404_v34 = vadd.s32 %v927_v11, %v918_v55  ;;  %v950_v24 = vadd.s32 %v949_v32, %v940_v26  ;;  %v2129_v6 = vand.u32 31, %v2127_v14  ;;  %v951_v16 = vmul.u32 %v4336_v43, %v897_v63  ;;  %v4446_v55 = vpop.permute.xlu0 %223 }
 0x21a   : > { %v1773_v60 = vsel %vm1652_vm0, %v1772_v57, %v1771_v12  ;;  %v2123_v35 = vor.u32 8388608, %v2122_v18  ;;  %v4418_v31 = vand.u32 3, %v1794_v27  ;;  %v4420_v50 = vshrl.u32 %v2127_v14, 5 }
 0x21b   : > { %v1776_v36 = vsel %vm4387_vm4, %v4058_v7, %v1773_v60  ;;  %vm953_vm10 = vc.u32 %v4404_v34, %v4406_v15  ;;  %v954_v33 = vadd.s32 1, %v950_v24  ;;  %v4416_v30 = vsub.s32 32, %v2129_v6 }
 0x21c   : > { %v1778_v29 = vmul.f32 %v1776_v36, %v1776_v36  ;;  %v2141_v28 = vshll.u32 %v3019_v51, %v2129_v6  ;;  %v2135_v21 = vshll.u32 %v3017_v46, %v2129_v6  ;;  %v2138_v56 = vshll.u32 %v3018_v48, %v2129_v6 }
 0x21d   : > { %v955_v17 = vsel %vm953_vm10, %v954_v33, %v950_v24  ;;  %v2136_v37 = vshrl.u32 %v3018_v48, %v4416_v30  ;;  %v2139_v58 = vshrl.u32 %v3019_v51, %v4416_v30  ;;  %v2142_v43 = vshrl.u32 %v3020_v53, %v4416_v30 }
 0x21e   : > { %v1779_v59 = vmul.f32 -0.001358992, %v1778_v29  ;;  %v1786_v54 = vmul.f32 -0.00019511016, %v1778_v29  ;;  %v956_v42 = vadd.s32 %v955_v17, %v951_v16  ;;  %v2133_v4 = vshrl.u32 %v3017_v46, %v4416_v30 }
 0x21f   : > { %v2145_v41 = vshrl.u32 %v3021_v62, %v4416_v30  ;;  %v2143_v0 = vor.u32 %v2142_v43, %v2141_v28  ;;  %v2132_v10 = vshll.u32 %v3016_v44, %v2129_v6  ;;  %v4438_v8 = vor.u32 %v2136_v37, %v2135_v21 }
 0x220   : > { %v1780_v39 = vadd.f32 0.041655596, %v1779_v59  ;;  %v1787_v23 = vadd.f32 0.008332121, %v1786_v54  ;;  %v957_v2 = vadd.s32 536870912, %v956_v42  ;;  %v4440_v47 = vor.u32 %v2139_v58, %v2138_v56 }
 0x221   : > { %v2144_v61 = vshll.u32 %v3020_v53, %v2129_v6  ;;  %v196_v20 = vmul.f32 %v4174_v45, %v3888_v22  ;;  %vm1797_vm12 = vcmp.eq.s32.totalorder %v4418_v31, 0  ;;  %vm1800_vm11 = vcmp.eq.s32.totalorder %v4418_v31, 2 }
 0x222   : > { %v1781_v9 = vmul.f32 %v1780_v39, %v1778_v29  ;;  %v1788_v52 = vmul.f32 %v1787_v23, %v1778_v29  ;;  %v4435_v49 = vshrl.u32 %v957_v2, 30  ;;  %v4450_v11 = vor.u32 %v2133_v4, %v2132_v10 }
 0x223   : > { %v2146_v26 = vor.u32 %v2145_v41, %v2144_v61  ;;  %vm2147_vm13 = vcmp.lt.s32.totalorder %v4420_v50, 1  ;;  %vm2150_vm14 = vcmp.lt.s32.totalorder %v4420_v50, 4  ;;  %vm1796_vm15 = vcmp.lt.s32.totalorder %v4418_v31, 2 }
 0x224   : > { %v1782_v12 = vadd.f32 -0.4999988, %v1781_v9  ;;  %v1789_v38 = vadd.f32 -0.16666654, %v1788_v52  ;;  %v959_v25 = vshll.u32 %v4435_v49, 30  ;;  %vm1793_vm0 = vweird.f32 %v4058_v7 }
 0x225   : > { %v2156_v63 = vsel %vm2150_vm14, %v2143_v0, 920167782  ;;  %vm2149_vm1 = vcmp.lt.s32.totalorder %v4420_v50, 3  ;;  %v2159_v18 = vsel %vm2147_vm13, %v4438_v8, %v4440_v47  ;;  %v4465_v24 = vshll.u32 %v2123_v35, 8 }
 0x226   : > { %v1783_v32 = vmul.f32 %v1782_v12, %v1778_v29  ;;  %v1790_v57 = vmul.f32 %v1789_v38, %v1778_v29  ;;  %v4455_v45 = vsub.s32 %v956_v42, %v959_v25  ;;  %v4468_v14 = vadd.f32 %v4446_v55, %v196_v20 }
 0x227   : > { %vm2148_vm3 = vcmp.lt.s32.totalorder %v4420_v50, 2  ;;  %v2155_v33 = vsel %vm2147_vm13, %v4450_v11, %v4438_v8  ;;  %v2157_v29 = vsel %vm2149_vm1, %v4440_v47, %v2156_v63  ;;  %v2160_v16 = vsel %vm2150_vm14, %v2146_v26, 1326507024 }
 0x228   : > { %v1784_v60 = vadd.f32 1.0, %v1783_v32  ;;  %v1791_v27 = vadd.f32 1.0, %v1790_v57  ;;  %vm961_vm2 = vcmp.lt.s32.totalorder %v4455_v45, 0  ;;  %v962_v6 = vsub.s32 0, %v4455_v45 }
 0x229   : > { %v2161_v54 = vsel %vm2149_vm1, %v2143_v0, %v2160_v16  ;;  %v2164_v58 = vand.u32 65535, %v4465_v24  ;;  %v2165_v43 = vshrl.u32 %v4465_v24, 16  ;;  %v2158_v23 = vsel %vm2148_vm3, %v2155_v33, %v2157_v29 }
 0x22a   : > { %v1792_v17 = vmul.f32 %v1791_v27, %v1776_v36  ;;  %v1801_v35 = vxor.u32 2147483648, %v1784_v60  ;;  %v963_v59 = vsel %vm961_vm2, %v962_v6, %v4455_v45  ;;  %v2162_v37 = vsel %vm2148_vm3, %v2159_v18, %v2161_v54 }
 0x22b   : > { %v964_v42 = vclz %v963_v59  ;;  %v2166_v2 = vand.u32 65535, %v2162_v37  ;;  %v2167_v36 = vshrl.u32 %v2162_v37, 16  ;;  %v952_v28 = vadd.s32 %v4406_v15, %v4404_v34 }
 0x22c   : > { %v1798_v39 = vxor.u32 2147483648, %v1792_v17  ;;  %v1168_v21 = vand.u32 2147483647, %v4468_v14  ;;  %v1171_v56 = vand.u32 2139095040, %v4468_v14  ;;  %v1802_v9 = vsel %vm1800_vm11, %v1801_v35, %v1792_v17 }
 0x22d   : > { %v2847_v4 = vadd.s32 4294967294, %v964_v42  ;;  %v2169_v52 = vmul.u32 %v2167_v36, %v2164_v58  ;;  %v2170_v0 = vmul.u32 %v2166_v2, %v2165_v43  ;;  %vm860_vm4 = vcmp.lt.s32.totalorder %v4249_v13, 0 }
 0x22e   : > { %v1799_v41 = vsel %vm1797_vm12, %v1784_v60, %v1798_v39  ;;  %v2188_v34 = vand.u32 65535, %v2158_v23  ;;  %v2189_v15 = vshrl.u32 %v2158_v23, 16  ;;  %v2168_v12 = vmul.u32 %v2166_v2, %v2164_v58 }
 0x22f   : > { %v1803_v10 = vsel %vm1796_vm15, %v1799_v41, %v1802_v9  ;;  %vm2848_vm5 = vcmp.lt.s32.totalorder %v2847_v4, 0  ;;  %v2172_v38 = vshll.u32 %v2169_v52, 16  ;;  %v982_v32 = vsub.s32 4, %v4435_v49 }
 0x230   : > { %v1804_v61 = vsel %vm1793_vm0, nan, %v1803_v10  ;;  %v967_v20 = vsel %vm2848_vm5, 0, %v2847_v4  ;;  %v2171_v57 = vmul.u32 %v2167_v36, %v2165_v43  ;;  %vm4508_vm6 = vcmp.le.f32.partialorder %v858_v5, 0.7853982 }
 0x231   : > { %2744 = vst [vmem:[%s3456_s25 + $0x48] sm:$0xff] %v1804_v61  ;;  %v968_v25 = vsub.s32 32, %v967_v20  ;;  %v972_v26 = vsub.s32 4294967266, %v967_v20  ;;  %v969_v63 = vshll.u32 %v4455_v45, %v967_v20  ;;  %v2174_v18 = vshll.u32 %v2170_v0, 16 }
 0x232   : > { %vm2176_vm7 = vc.u32 %v2168_v12, %v2172_v38  ;;  %v2178_v7 = vadd.s32 %v2172_v38, %v2168_v12  ;;  %v2191_v33 = vmul.u32 %v2189_v15, %v2164_v58  ;;  %v2190_v16 = vmul.u32 %v2188_v34, %v2164_v58 }
 0x233   : > { %v970_v60 = vshrl.u32 %v952_v28, %v968_v25  ;;  %v973_v27 = vadd.s32 127, %v972_v26  ;;  %v2177_v6 = vsel %vm2176_vm7, 1, %v3014_v3  ;;  %v2192_v17 = vmul.u32 %v2188_v34, %v2165_v43 }
 0x234   : > { %v2179_v29 = vadd.s32 %v2177_v6, %v2171_v57  ;;  %vm2180_vm8 = vc.u32 %v2178_v7, %v2174_v18  ;;  %v2194_v54 = vshll.u32 %v2191_v33, 16  ;;  %v2152_v45 = vsel %vm2150_vm14, %v4440_v47, 2102212464 }
 0x235   : > { %v971_v35 = vor.u32 %v970_v60, %v969_v63  ;;  %v974_v59 = vshll.u32 %v973_v27, 23  ;;  %v2181_v5 = vsel %vm2180_vm8, 1, %v3014_v3  ;;  %v2173_v42 = vshrl.u32 %v2169_v52, 16 }
 0x236   : > { %v2183_v37 = vadd.s32 %v2181_v5, %v2179_v29  ;;  %v2193_v39 = vmul.u32 %v2189_v15, %v2165_v43  ;;  %v2196_v2 = vshll.u32 %v2192_v17, 16  ;;  %vm2198_vm9 = vc.u32 %v2190_v16, %v2194_v54 }
 0x237   : > { %v975_v23 = vor.u32 4788187, %v974_v59  ;;  %v2200_v36 = vadd.s32 %v2194_v54, %v2190_v16  ;;  %v983_v58 = vsel %vm860_vm4, %v982_v32, %v4435_v49  ;;  %v2199_v4 = vsel %vm2198_vm9, 1, %v3014_v3 }
 0x238   : > { %v2184_v28 = vadd.s32 %v2183_v37, %v2173_v42  ;;  %v1172_v41 = vshrl.u32 %v1171_v56, 23  ;;  %v978_v10 = vcvt.s32.f32 %v971_v35  ;;  %v2201_v34 = vadd.s32 %v2199_v4, %v2193_v39 }
 0x239   : > { %v976_v9 = vand.u32 2147483647, %v975_v23  ;;  %vm2202_vm10 = vc.u32 %v2200_v36, %v2196_v2  ;;  %v2131_v47 = vshrl.u32 %v3016_v44, %v4416_v30  ;;  %v2175_v43 = vshrl.u32 %v2170_v0, 16 }
 0x23a   : > { %v2203_v52 = vsel %vm2202_vm10, 1, %v3014_v3  ;;  %v2852_v15 = vadd.s32 4294967169, %v1172_v41  ;;  %v985_v20 = vsel %vm4508_vm6, 0, %v983_v58  ;;  %v2195_v49 = vshrl.u32 %v2191_v33, 16  ;;  %v4545_v33 = vld [vmem:[%s3105_s3 + $0x1] ss:$0 sm:$0xff] }
 0x23b   : > { %v979_v61 = vmul.f32 %v978_v10, %v976_v9  ;;  %v2205_v12 = vadd.s32 %v2203_v52, %v2201_v34  ;;  %v2151_v56 = vsel %vm2147_vm13, %v2131_v47, %v4450_v11  ;;  %v2153_v38 = vsel %vm2149_vm1, %v4438_v8, %v2152_v45 }
 0x23c   : > { %v2185_v25 = vadd.s32 %v2184_v28, %v2175_v43  ;;  %v1178_v30 = vadd.s32 1, %v2852_v15  ;;  %v2197_v26 = vshrl.u32 %v2192_v17, 16  ;;  %v1002_v57 = vadd.s32 3, %v985_v20 }
 0x23d   : > { %v980_v0 = vxor.u32 2147483648, %v979_v61  ;;  %v2206_v32 = vadd.s32 %v2205_v12, %v2195_v49  ;;  %v2204_v63 = vadd.s32 %v2200_v36, %v2196_v2  ;;  %v2154_v7 = vsel %vm2148_vm3, %v2151_v56, %v2153_v38 }
 0x23e   : > { %vm1179_vm12 = vcmp.gt.s32.totalorder %v1178_v30, 0  ;;  %v1175_v27 = vand.u32 8388607, %v1168_v21  ;;  %v1485_v29 = vmul.f32 %v4545_v33, %v3888_v22  ;;  %v4551_v17 = vand.u32 3, %v1002_v57 }
 0x23f   : > { %v981_v18 = vsel %vm860_vm4, %v980_v0, %v979_v61  ;;  %v2207_v11 = vadd.s32 %v2206_v32, %v2197_v26  ;;  %v1180_v60 = vsel %vm1179_vm12, %v1178_v30, 0  ;;  %vm2210_vm11 = vc.u32 %v2185_v25, %v2204_v63 }
 0x240   : > { %v4540_v8 = vsel %vm4508_vm6, %v4249_v13, %v981_v18  ;;  %v1182_v6 = vand.u32 31, %v1180_v60  ;;  %v2208_v31 = vmul.u32 %v4465_v24, %v2154_v7  ;;  %v4557_v45 = vadd.f32 %v1485_v29, %v4446_v55 }
 0x241   : > { %v986_v50 = vmul.f32 %v4540_v8, %v4540_v8  ;;  %v2211_v16 = vadd.s32 1, %v2207_v11  ;;  %v4559_v42 = vadd.s32 %v2204_v63, %v2185_v25  ;;  %v1176_v22 = vor.u32 8388608, %v1175_v27 }
 0x242   : > { %v4554_v35 = vsub.s32 32, %v1182_v6  ;;  %v4561_v39 = vshrl.u32 %v1180_v60, 5  ;;  %v1194_v4 = vshll.u32 %v3019_v51, %v1182_v6  ;;  %v1185_v10 = vshll.u32 %v3016_v44, %v1182_v6 }
 0x243   : > { %v987_v59 = vmul.f32 -0.001358992, %v986_v50  ;;  %v994_v5 = vmul.f32 -0.00019511016, %v986_v50  ;;  %v2212_v54 = vsel %vm2210_vm11, %v2211_v16, %v2207_v11  ;;  %v1188_v34 = vshll.u32 %v3017_v46, %v1182_v6 }
 0x244   : > { %v2213_v37 = vadd.s32 %v2212_v54, %v2208_v31  ;;  %v1186_v36 = vshrl.u32 %v3017_v46, %v4554_v35  ;;  %v1195_v24 = vshrl.u32 %v3020_v53, %v4554_v35  ;;  %v1189_v28 = vshrl.u32 %v3018_v48, %v4554_v35 }
 0x245   : > { %v988_v23 = vadd.f32 0.041655596, %v987_v59  ;;  %v995_v2 = vadd.f32 0.008332121, %v994_v5  ;;  %v1192_v55 = vshrl.u32 %v3019_v51, %v4554_v35  ;;  %v1191_v43 = vshll.u32 %v3018_v48, %v1182_v6 }
 0x246   : > { %v2214_v58 = vadd.s32 536870912, %v2213_v37  ;;  %v1196_v52 = vor.u32 %v1195_v24, %v1194_v4  ;;  %v1198_v15 = vshrl.u32 %v3021_v62, %v4554_v35  ;;  %vm1008_vm13 = vcmp.eq.s32.totalorder %v4551_v17, 2 }
 0x247   : > { %v989_v41 = vmul.f32 %v988_v23, %v986_v50  ;;  %v996_v9 = vmul.f32 %v995_v2, %v986_v50  ;;  %v4580_v49 = vor.u32 %v1186_v36, %v1185_v10  ;;  %v2425_v12 = vand.u32 2147483647, %v4557_v45 }
 0x248   : > { %v4574_v47 = vshrl.u32 %v2214_v58, 30  ;;  %vm1005_vm14 = vcmp.eq.s32.totalorder %v4551_v17, 0  ;;  %v4585_v38 = vor.u32 %v1189_v28, %v1188_v34  ;;  %v1193_v25 = vor.u32 %v1192_v55, %v1191_v43 }
 0x249   : > { %v990_v61 = vadd.f32 -0.4999988, %v989_v41  ;;  %v997_v20 = vadd.f32 -0.16666654, %v996_v9  ;;  %v1197_v30 = vshll.u32 %v3020_v53, %v1182_v6  ;;  %vm1004_vm15 = vcmp.lt.s32.totalorder %v4551_v17, 2 }
 0x24a   : > { %v2216_v56 = vshll.u32 %v4574_v47, 30  ;;  %vm1203_vm0 = vcmp.lt.s32.totalorder %v4561_v39, 4  ;;  %v4590_v32 = vshll.u32 %v1176_v22, 8  ;;  %vm1001_vm1 = vweird.f32 %v4249_v13 }
 0x24b   : > { %v991_v0 = vmul.f32 %v990_v61, %v986_v50  ;;  %v998_v26 = vmul.f32 %v997_v20, %v986_v50  ;;  %v1199_v63 = vor.u32 %v1198_v15, %v1197_v30  ;;  %v1209_v18 = vsel %vm1203_vm0, %v1196_v52, 920167782 }
 0x24c   : > { %v4593_v57 = vsub.s32 %v2213_v37, %v2216_v56  ;;  %v2428_v7 = vand.u32 2139095040, %v4557_v45  ;;  %vm2117_vm2 = vcmp.lt.s32.totalorder %v4331_v40, 0  ;;  %vm1200_vm3 = vcmp.lt.s32.totalorder %v4561_v39, 1 }
 0x24d   : > { %v992_v11 = vadd.f32 1.0, %v991_v0  ;;  %v999_v60 = vadd.f32 1.0, %v998_v26  ;;  %vm1202_vm4 = vcmp.lt.s32.totalorder %v4561_v39, 3  ;;  %v1208_v6 = vsel %vm1200_vm3, %v4580_v49, %v4585_v38 }
 0x24e   : > { %vm2218_vm5 = vcmp.lt.s32.totalorder %v4593_v57, 0  ;;  %v2219_v27 = vsub.s32 0, %v4593_v57  ;;  %v1210_v29 = vsel %vm1202_vm4, %v1193_v25, %v1209_v18  ;;  %v1212_v31 = vsel %vm1200_vm3, %v4585_v38, %v1193_v25 }
 0x24f   : > { %v1000_v50 = vmul.f32 %v999_v60, %v4540_v8  ;;  %v1009_v16 = vxor.u32 2147483648, %v992_v11  ;;  %v1217_v59 = vand.u32 65535, %v4590_v32  ;;  %vm1201_vm6 = vcmp.lt.s32.totalorder %v4561_v39, 2 }
 0x250   : > { %v2220_v5 = vsel %vm2218_vm5, %v2219_v27, %v4593_v57  ;;  %v1213_v54 = vsel %vm1203_vm0, %v1199_v63, 1326507024  ;;  %v1218_v37 = vshrl.u32 %v4590_v32, 16  ;;  %v1211_v8 = vsel %vm1201_vm6, %v1208_v6, %v1210_v29 }
 0x251   : > { %v1006_v22 = vxor.u32 2147483648, %v1000_v50  ;;  %v2221_v23 = vclz %v2220_v5  ;;  %v1214_v2 = vsel %vm1202_vm4, %v1196_v52, %v1213_v54  ;;  %v1010_v36 = vsel %vm1008_vm13, %v1009_v16, %v1000_v50 }
 0x252   : > { %v2239_v24 = vsub.s32 4, %v4574_v47  ;;  %v1215_v58 = vsel %vm1201_vm6, %v1212_v31, %v1214_v2  ;;  %v2429_v28 = vshrl.u32 %v2428_v7, 23  ;;  %v1184_v34 = vshrl.u32 %v3016_v44, %v4554_v35 }
 0x253   : > { %v1007_v55 = vsel %vm1005_vm14, %v992_v11, %v1006_v22  ;;  %v2871_v4 = vadd.s32 4294967294, %v2221_v23  ;;  %v1219_v41 = vand.u32 65535, %v1215_v58  ;;  %v1220_v9 = vshrl.u32 %v1215_v58, 16 }
 0x254   : > { %v1011_v10 = vsel %vm1004_vm15, %v1007_v55, %v1010_v36  ;;  %v1241_v43 = vand.u32 65535, %v1211_v8  ;;  %v1242_v52 = vshrl.u32 %v1211_v8, 16  ;;  %v1205_v61 = vsel %vm1203_vm0, %v1193_v25, 2102212464 }
 0x255   : > { %v1012_v15 = vsel %vm1001_vm1, nan, %v1011_v10  ;;  %vm2872_vm7 = vcmp.lt.s32.totalorder %v2871_v4, 0  ;;  %v1222_v20 = vmul.u32 %v1220_v9, %v1217_v59  ;;  %v2240_v30 = vsel %vm2117_vm2, %v2239_v24, %v4574_v47 }
 0x256   : > { %v2224_v56 = vsel %vm2872_vm7, 0, %v2871_v4  ;;  %2739 = vst [vmem:[%s3456_s25 + $0x20] sm:$0xff] %v1012_v15  ;;  %v1223_v17 = vmul.u32 %v1219_v41, %v1218_v37  ;;  %v1244_v0 = vmul.u32 %v1242_v52, %v1217_v59  ;;  %v1221_v63 = vmul.u32 %v1219_v41, %v1217_v59 }
 0x257   : > { %v2225_v26 = vsub.s32 32, %v2224_v56  ;;  %v2229_v35 = vsub.s32 4294967266, %v2224_v56  ;;  %v1225_v18 = vshll.u32 %v1222_v20, 16  ;;  %vm4644_vm8 = vcmp.le.f32.partialorder %v2115_v1, 0.7853982 }
 0x258   : > { %v2226_v25 = vshll.u32 %v4593_v57, %v2224_v56  ;;  %v1224_v7 = vmul.u32 %v1220_v9, %v1218_v37  ;;  %v1227_v11 = vshll.u32 %v1223_v17, 16  ;;  %v1245_v60 = vmul.u32 %v1241_v43, %v1218_v37 }
 0x259   : > { %v2227_v47 = vshrl.u32 %v4559_v42, %v2225_v26  ;;  %v2230_v27 = vadd.s32 127, %v2229_v35  ;;  %vm1229_vm9 = vc.u32 %v1221_v63, %v1225_v18  ;;  %v1231_v6 = vadd.s32 %v1225_v18, %v1221_v63 }
 0x25a   : > { %v1230_v29 = vsel %vm1229_vm9, 1, %v3014_v3  ;;  %v1243_v50 = vmul.u32 %v1241_v43, %v1217_v59  ;;  %v1246_v16 = vmul.u32 %v1242_v52, %v1218_v37  ;;  %v1247_v31 = vshll.u32 %v1244_v0, 16 }
 0x25b   : > { %v2228_v5 = vor.u32 %v2227_v47, %v2226_v25  ;;  %v2231_v1 = vshll.u32 %v2230_v27, 23  ;;  %v1232_v54 = vadd.s32 %v1230_v29, %v1224_v7  ;;  %vm1233_vm10 = vc.u32 %v1231_v6, %v1227_v11 }
 0x25c   : > { %v1234_v22 = vsel %vm1233_vm10, 1, %v3014_v3  ;;  %v1249_v57 = vshll.u32 %v1245_v60, 16  ;;  %vm1251_vm12 = vc.u32 %v1243_v50, %v1247_v31  ;;  %v1253_v23 = vadd.s32 %v1247_v31, %v1243_v50 }
 0x25d   : > { %v2232_v8 = vor.u32 4788187, %v2231_v1  ;;  %v1226_v2 = vshrl.u32 %v1222_v20, 16  ;;  %v1236_v42 = vadd.s32 %v1234_v22, %v1232_v54  ;;  %v1252_v36 = vsel %vm1251_vm12, 1, %v3014_v3 }
 0x25e   : > { %v2235_v24 = vcvt.s32.f32 %v2228_v5  ;;  %v1228_v58 = vshrl.u32 %v1223_v17, 16  ;;  %v1254_v55 = vadd.s32 %v1252_v36, %v1246_v16  ;;  %vm1255_vm11 = vc.u32 %v1253_v23, %v1249_v57 }
 0x25f   : > { %v2233_v59 = vand.u32 2147483647, %v2232_v8  ;;  %v1237_v37 = vadd.s32 %v1236_v42, %v1226_v2  ;;  %v1256_v4 = vsel %vm1255_vm11, 1, %v3014_v3  ;;  %v2876_v41 = vadd.s32 4294967169, %v2429_v28 }
 0x260   : > { %v1204_v9 = vsel %vm1200_vm3, %v1184_v34, %v4580_v49  ;;  %v1206_v10 = vsel %vm1202_vm4, %v4585_v38, %v1205_v61  ;;  %v1248_v43 = vshrl.u32 %v1244_v0, 16  ;;  %v1258_v52 = vadd.s32 %v1256_v4, %v1254_v55 }
 0x261   : > { %v2236_v15 = vmul.f32 %v2235_v24, %v2233_v59  ;;  %v2242_v20 = vsel %vm4644_vm8, 0, %v2240_v30  ;;  %v4662_v56 = vadd.s32 %v1237_v37, %v1228_v58  ;;  %v2435_v17 = vadd.s32 1, %v2876_v41 }
 0x262   : > { %v1250_v26 = vshrl.u32 %v1245_v60, 16  ;;  %v1259_v35 = vadd.s32 %v1258_v52, %v1248_v43  ;;  %v4664_v63 = vadd.s32 %v1253_v23, %v1249_v57  ;;  %v2259_v49 = vadd.s32 3, %v2242_v20  ;;  %v4708_v20 = vpop.permute.xlu1 %227 }
 0x263   : > { %v2237_v28 = vxor.u32 2147483648, %v2236_v15  ;;  %vm2436_vm13 = vcmp.gt.s32.totalorder %v2435_v17, 0  ;;  %v1207_v34 = vsel %vm1201_vm6, %v1204_v9, %v1206_v10  ;;  %v2432_v30 = vand.u32 8388607, %v2425_v12  ;;  %v2949_v9 = vld [vmem:[%s3105_s3] ss:$0 sm:$0xff] }
 0x264   : > { %v1260_v38 = vadd.s32 %v1259_v35, %v1250_v26  ;;  %v2437_v61 = vsel %vm2436_vm13, %v2435_v17, 0  ;;  %vm1263_vm14 = vc.u32 %v4662_v56, %v4664_v63  ;;  %v1261_v39 = vmul.u32 %v4590_v32, %v1207_v34  ;;  %s2765_s3 = sshll.u32 %s2762_s29, 4  ;;  %s2766_s3 = int_to_ptr.hbm [resolvable:$true] %s2765_s3 }
 0x265   : > { %v2238_v0 = vsel %vm2117_vm2, %v2237_v28, %v2236_v15  ;;  %v2439_v18 = vand.u32 31, %v2437_v61  ;;  %v4680_v47 = vand.u32 3, %v2259_v49  ;;  %v2433_v16 = vor.u32 8388608, %v2432_v30  ;;  %s2964_s4 = sshra.s32 %s2766_s3, 4  ;;  %s2965_s4 = int_to_ptr.hbm [resolvable:$true] %s2964_s4 }
 0x266   : > { %v2241_v25 = vsel %vm4644_vm8, %v4331_v40, %v2238_v0  ;;  %v1264_v7 = vadd.s32 1, %v1260_v38  ;;  %v4682_v31 = vshrl.u32 %v2437_v61, 5  ;;  %v197_v10 = vmul.f32 %v2949_v9, %v3634_v19  ;;  %s2966_s5 = scalar_lea.hbm %s2965_s4, 128  ;;  %p2971_p0 = scmp.lt.s32.totalorder %s2965_s4, %s5074_s2 }
 0x267   : > { %v2243_v11 = vmul.f32 %v2241_v25, %v2241_v25  ;;  %v4678_v60 = vsub.s32 32, %v2439_v18  ;;  %v2451_v57 = vshll.u32 %v3019_v51, %v2439_v18  ;;  %v2445_v8 = vshll.u32 %v3017_v46, %v2439_v18  ;;  %p2967_p11 = scmp.ne.s32.totalorder %s2965_s4, %s2966_s5  ;;  %p2972_p1 = scmp.lt.s32.totalorder %s2970_s8, %s2966_s5 }
 0x268   : > { %v1265_v27 = vsel %vm1263_vm14, %v1264_v7, %v1260_v38  ;;  %v2448_v2 = vshll.u32 %v3018_v48, %v2439_v18  ;;  %v2442_v59 = vshll.u32 %v3016_v44, %v2439_v18  ;;  %v2454_v41 = vshll.u32 %v3020_v53, %v2439_v18 }
 0x269   : > { %v2244_v6 = vmul.f32 -0.001358992, %v2243_v11  ;;  %v2251_v29 = vmul.f32 -0.00019511016, %v2243_v11  ;;  %v1266_v50 = vadd.s32 %v1265_v27, %v1261_v39  ;;  %v2446_v5 = vshrl.u32 %v3018_v48, %v4678_v60  ;;  %p2968_p12 = pnand %p2967_p11, %p3078_p5  ;;  %p2973_p2 = por %p2972_p1, %p2971_p0 }
 0x26a   : > { %v2449_v13 = vshrl.u32 %v3019_v51, %v4678_v60  ;;  %v2452_v32 = vshrl.u32 %v3020_v53, %v4678_v60  ;;  %v2443_v23 = vshrl.u32 %v3017_v46, %v4678_v60  ;;  %v2455_v42 = vshrl.u32 %v3021_v62, %v4678_v60 }
 0x26b   : > { %v2245_v1 = vadd.f32 0.041655596, %v2244_v6  ;;  %v2252_v54 = vadd.f32 0.008332121, %v2251_v29  ;;  %v1267_v22 = vadd.s32 536870912, %v1266_v50  ;;  %v4700_v37 = vor.u32 %v2446_v5, %v2445_v8  ;;  %p2969_p13 = pneg %p2968_p12 }
 0x26c   : > { %v2453_v55 = vor.u32 %v2452_v32, %v2451_v57  ;;  %v4702_v4 = vor.u32 %v2449_v13, %v2448_v2  ;;  %vm2262_vm15 = vcmp.eq.s32.totalorder %v4680_v47, 0  ;;  %vm2265_vm0 = vcmp.eq.s32.totalorder %v4680_v47, 2 }
 0x26d   : > { %v2246_v36 = vmul.f32 %v2245_v1, %v2243_v11  ;;  %v2253_v24 = vmul.f32 %v2252_v54, %v2243_v11  ;;  %v4697_v58 = vshrl.u32 %v1267_v22, 30  ;;  %v4712_v17 = vor.u32 %v2443_v23, %v2442_v59  ;;  %p2974_p3 = pnand %p2973_p2, %p2969_p13 }
 0x26e   : > { %v2456_v26 = vor.u32 %v2455_v42, %v2454_v41  ;;  %vm2457_vm1 = vcmp.lt.s32.totalorder %v4682_v31, 1  ;;  %vm2460_vm2 = vcmp.lt.s32.totalorder %v4682_v31, 4  ;;  %vm2261_vm3 = vcmp.lt.s32.totalorder %v4680_v47, 2 }
 0x26f   : > { %v2247_v43 = vadd.f32 -0.4999988, %v2246_v36  ;;  %v2254_v52 = vadd.f32 -0.16666654, %v2253_v24  ;;  %v1269_v15 = vshll.u32 %v4697_v58, 30  ;;  %vm2258_vm4 = vweird.f32 %v4331_v40 }
 0x270   : > { %v2466_v34 = vsel %vm2460_vm2, %v2453_v55, 920167782  ;;  %vm2459_vm5 = vcmp.lt.s32.totalorder %v4682_v31, 3  ;;  %v2469_v38 = vsel %vm2457_vm1, %v4700_v37, %v4702_v4  ;;  %v4727_v61 = vshll.u32 %v2433_v16, 8 }
 0x271   : > { %v2248_v35 = vmul.f32 %v2247_v43, %v2243_v11  ;;  %v2255_v28 = vmul.f32 %v2254_v52, %v2243_v11  ;;  %v4717_v49 = vsub.s32 %v1266_v50, %v1269_v15  ;;  %v4730_v0 = vadd.f32 %v4708_v20, %v197_v10 }
 0x272   : > { %vm2458_vm7 = vcmp.lt.s32.totalorder %v4682_v31, 2  ;;  %v2465_v11 = vsel %vm2457_vm1, %v4712_v17, %v4700_v37  ;;  %v2467_v39 = vsel %vm2459_vm5, %v4702_v4, %v2466_v34  ;;  %v2470_v27 = vsel %vm2460_vm2, %v2456_v26, 1326507024 }
 0x273   : > { %v2249_v30 = vadd.f32 1.0, %v2248_v35  ;;  %v2256_v18 = vadd.f32 1.0, %v2255_v28  ;;  %vm1271_vm6 = vcmp.lt.s32.totalorder %v4717_v49, 0  ;;  %v1272_v7 = vsub.s32 0, %v4717_v49 }
 0x274   : > { %v2471_v16 = vsel %vm2459_vm5, %v2453_v55, %v2470_v27  ;;  %v2474_v32 = vand.u32 65535, %v4727_v61  ;;  %v2475_v1 = vshrl.u32 %v4727_v61, 16  ;;  %v2468_v22 = vsel %vm2458_vm7, %v2465_v11, %v2467_v39 }
 0x275   : > { %v2257_v6 = vmul.f32 %v2256_v18, %v2241_v25  ;;  %v2266_v29 = vxor.u32 2147483648, %v2249_v30  ;;  %v1273_v50 = vsel %vm1271_vm6, %v1272_v7, %v4717_v49  ;;  %v2472_v13 = vsel %vm2458_vm7, %v2469_v38, %v2471_v16 }
 0x276   : > { %v1274_v5 = vclz %v1273_v50  ;;  %v2476_v57 = vand.u32 65535, %v2472_v13  ;;  %v2477_v25 = vshrl.u32 %v2472_v13, 16  ;;  %v1262_v23 = vadd.s32 %v4664_v63, %v4662_v56 }
 0x277   : > { %v2263_v54 = vxor.u32 2147483648, %v2257_v6  ;;  %v1323_v2 = vand.u32 2147483647, %v4730_v0  ;;  %v1326_v42 = vand.u32 2139095040, %v4730_v0  ;;  %v2267_v24 = vsel %vm2265_vm0, %v2266_v29, %v2257_v6 }
 0x278   : > { %v2853_v8 = vadd.s32 4294967294, %v1274_v5  ;;  %v2479_v55 = vmul.u32 %v2477_v25, %v2474_v32  ;;  %v2480_v59 = vmul.u32 %v2476_v57, %v2475_v1  ;;  %vm1170_vm8 = vcmp.lt.s32.totalorder %v4468_v14, 0 }
 0x279   : > { %v2264_v36 = vsel %vm2262_vm15, %v2249_v30, %v2263_v54  ;;  %v2498_v56 = vand.u32 65535, %v2468_v22  ;;  %v2499_v63 = vshrl.u32 %v2468_v22, 16  ;;  %v2478_v43 = vmul.u32 %v2476_v57, %v2474_v32 }
 0x27a   : > { %v2268_v41 = vsel %vm2261_vm3, %v2264_v36, %v2267_v24  ;;  %vm2854_vm9 = vcmp.lt.s32.totalorder %v2853_v8, 0  ;;  %v2482_v52 = vshll.u32 %v2479_v55, 16  ;;  %v1292_v35 = vsub.s32 4, %v4697_v58 }
 0x27b   : > { %v2269_v9 = vsel %vm2258_vm4, nan, %v2268_v41  ;;  %v1277_v10 = vsel %vm2854_vm9, 0, %v2853_v8  ;;  %v2481_v28 = vmul.u32 %v2477_v25, %v2475_v1  ;;  %vm4770_vm10 = vcmp.le.f32.partialorder %v1168_v21, 0.7853982 }
 0x27c   : > { %2747 = vst [vmem:[%s3456_s25 + $0x60] sm:$0xff] %v2269_v9  ;;  %v1278_v15 = vsub.s32 32, %v1277_v10  ;;  %v1282_v26 = vsub.s32 4294967266, %v1277_v10  ;;  %v1279_v34 = vshll.u32 %v4717_v49, %v1277_v10  ;;  %v2484_v38 = vshll.u32 %v2480_v59, 16 }
 0x27d   : > { %vm2486_vm12 = vc.u32 %v2478_v43, %v2482_v52  ;;  %v2488_v40 = vadd.s32 %v2482_v52, %v2478_v43  ;;  %v2501_v11 = vmul.u32 %v2499_v63, %v2474_v32  ;;  %v2500_v27 = vmul.u32 %v2498_v56, %v2474_v32 }
 0x27e   : > { %v1280_v30 = vshrl.u32 %v1262_v23, %v1278_v15  ;;  %v1283_v18 = vadd.s32 127, %v1282_v26  ;;  %v2487_v7 = vsel %vm2486_vm12, 1, %v3014_v3  ;;  %v2502_v6 = vmul.u32 %v2498_v56, %v2475_v1 }
 0x27f   : > { %v2489_v39 = vadd.s32 %v2487_v7, %v2481_v28  ;;  %vm2490_vm11 = vc.u32 %v2488_v40, %v2484_v38  ;;  %v2504_v16 = vshll.u32 %v2501_v11, 16  ;;  %v2462_v49 = vsel %vm2460_vm2, %v4702_v4, 2102212464 }
 0x280   : > { %v1281_v29 = vor.u32 %v1280_v30, %v1279_v34  ;;  %v1284_v50 = vshll.u32 %v1283_v18, 23  ;;  %v2491_v21 = vsel %vm2490_vm11, 1, %v3014_v3  ;;  %v2483_v5 = vshrl.u32 %v2479_v55, 16 }
 0x281   : > { %v2493_v13 = vadd.s32 %v2491_v21, %v2489_v39  ;;  %v2503_v54 = vmul.u32 %v2499_v63, %v2475_v1  ;;  %v2506_v57 = vshll.u32 %v2502_v6, 16  ;;  %vm2508_vm13 = vc.u32 %v2500_v27, %v2504_v16 }
 0x282   : > { %v1285_v22 = vor.u32 4788187, %v1284_v50  ;;  %v2510_v25 = vadd.s32 %v2504_v16, %v2500_v27  ;;  %v1293_v32 = vsel %vm1170_vm8, %v1292_v35, %v4697_v58  ;;  %v2509_v8 = vsel %vm2508_vm13, 1, %v3014_v3 }
 0x283   : > { %v2494_v23 = vadd.s32 %v2493_v13, %v2483_v5  ;;  %v1327_v36 = vshrl.u32 %v1326_v42, 23  ;;  %v1288_v41 = vcvt.s32.f32 %v1281_v29  ;;  %v2511_v56 = vadd.s32 %v2509_v8, %v2503_v54 }
 0x284   : > { %v1286_v24 = vand.u32 2147483647, %v1285_v22  ;;  %vm2512_vm14 = vc.u32 %v2510_v25, %v2506_v57  ;;  %v2441_v4 = vshrl.u32 %v3016_v44, %v4678_v60  ;;  %v2485_v1 = vshrl.u32 %v2480_v59, 16 }
 0x285   : > { %v2513_v55 = vsel %vm2512_vm14, 1, %v3014_v3  ;;  %v2855_v63 = vadd.s32 4294967169, %v1327_v36  ;;  %v1295_v10 = vsel %vm4770_vm10, 0, %v1293_v32  ;;  %v2505_v58 = vshrl.u32 %v2501_v11, 16 }
 0x286   : > { %v1289_v9 = vmul.f32 %v1288_v41, %v1286_v24  ;;  %v2515_v43 = vadd.s32 %v2513_v55, %v2511_v56  ;;  %v2461_v42 = vsel %vm2457_vm1, %v2441_v4, %v4712_v17  ;;  %v2463_v52 = vsel %vm2459_vm5, %v4700_v37, %v2462_v49 }
 0x287   : > { %v2495_v15 = vadd.s32 %v2494_v23, %v2485_v1  ;;  %v1333_v60 = vadd.s32 1, %v2855_v63  ;;  %v2507_v26 = vshrl.u32 %v2502_v6, 16  ;;  %v1312_v28 = vadd.s32 3, %v1295_v10 }
 0x288   : > { %v1290_v59 = vxor.u32 2147483648, %v1289_v9  ;;  %v2516_v35 = vadd.s32 %v2515_v43, %v2505_v58  ;;  %v2514_v34 = vadd.s32 %v2510_v25, %v2506_v57  ;;  %v2464_v40 = vsel %vm2458_vm7, %v2461_v42, %v2463_v52 }
 0x289   : > { %vm1334_vm15 = vcmp.gt.s32.totalorder %v1333_v60, 0  ;;  %v1330_v18 = vand.u32 8388607, %v1323_v2  ;;  %v1486_v27 = vmul.f32 %v4545_v33, %v3634_v19  ;;  %v2518_v6 = vmul.u32 %v4727_v61, %v2464_v40 }
 0x28a   : > { %v1291_v38 = vsel %vm1170_vm8, %v1290_v59, %v1289_v9  ;;  %v2517_v30 = vadd.s32 %v2516_v35, %v2507_v26  ;;  %v1335_v17 = vsel %vm1334_vm15, %v1333_v60, 0  ;;  %vm2520_vm0 = vc.u32 %v2495_v15, %v2514_v34 }
 0x28b   : > { %v1294_v37 = vsel %vm4770_vm10, %v4468_v14, %v1291_v38  ;;  %v1337_v7 = vand.u32 31, %v1335_v17  ;;  %v4809_v21 = vand.u32 3, %v1312_v28  ;;  %v1331_v49 = vor.u32 8388608, %v1330_v18 }
 0x28c   : > { %v1296_v11 = vmul.f32 %v1294_v37, %v1294_v37  ;;  %v2521_v39 = vadd.s32 1, %v2517_v30  ;;  %v4811_v5 = vshrl.u32 %v1335_v17, 5  ;;  %v4814_v13 = vadd.f32 %v1486_v27, %v4708_v20 }
 0x28d   : > { %v4807_v31 = vsub.s32 32, %v1337_v7  ;;  %v1349_v32 = vshll.u32 %v3019_v51, %v1337_v7  ;;  %v1340_v8 = vshll.u32 %v3016_v44, %v1337_v7  ;;  %v1343_v36 = vshll.u32 %v3017_v46, %v1337_v7 }
 0x28e   : > { %v1297_v29 = vmul.f32 -0.001358992, %v1296_v11  ;;  %v1304_v50 = vmul.f32 -0.00019511016, %v1296_v11  ;;  %v2522_v47 = vsel %vm2520_vm0, %v2521_v39, %v2517_v30  ;;  %v1346_v41 = vshll.u32 %v3018_v48, %v1337_v7 }
 0x28f   : > { %v2523_v16 = vadd.s32 %v2522_v47, %v2518_v6  ;;  %v1341_v19 = vshrl.u32 %v3017_v46, %v4807_v31  ;;  %v1350_v33 = vshrl.u32 %v3020_v53, %v4807_v31  ;;  %v1344_v57 = vshrl.u32 %v3018_v48, %v4807_v31 }
 0x290   : > { %v1298_v54 = vadd.f32 0.041655596, %v1297_v29  ;;  %v1305_v22 = vadd.f32 0.008332121, %v1304_v50  ;;  %v1347_v25 = vshrl.u32 %v3019_v51, %v4807_v31  ;;  %v1353_v4 = vshrl.u32 %v3021_v62, %v4807_v31 }
 0x291   : > { %v2524_v61 = vadd.s32 536870912, %v2523_v16  ;;  %v1351_v56 = vor.u32 %v1350_v33, %v1349_v32  ;;  %vm1318_vm1 = vcmp.eq.s32.totalorder %v4809_v21, 2  ;;  %v4833_v63 = vadd.s32 %v2514_v34, %v2495_v15 }
 0x292   : > { %v1299_v23 = vmul.f32 %v1298_v54, %v1296_v11  ;;  %v1306_v20 = vmul.f32 %v1305_v22, %v1296_v11  ;;  %v4835_v9 = vor.u32 %v1341_v19, %v1340_v8  ;;  %vm1315_vm2 = vcmp.eq.s32.totalorder %v4809_v21, 0 }
 0x293   : > { %v4827_v24 = vshrl.u32 %v2524_v61, 30  ;;  %v4839_v58 = vor.u32 %v1344_v57, %v1343_v36  ;;  %v1348_v43 = vor.u32 %v1347_v25, %v1346_v41  ;;  %v1352_v42 = vshll.u32 %v3020_v53, %v1337_v7 }
 0x294   : > { %v1300_v1 = vadd.f32 -0.4999988, %v1299_v23  ;;  %v1307_v55 = vadd.f32 -0.16666654, %v1306_v20  ;;  %vm1314_vm3 = vcmp.lt.s32.totalorder %v4809_v21, 2  ;;  %vm1358_vm4 = vcmp.lt.s32.totalorder %v4811_v5, 4 }
 0x295   : > { %v2526_v10 = vshll.u32 %v4827_v24, 30  ;;  %v4844_v59 = vshll.u32 %v1331_v49, 8  ;;  %vm1311_vm5 = vweird.f32 %v4468_v14  ;;  %v1354_v26 = vor.u32 %v1353_v4, %v1352_v42 }
 0x296   : > { %v1301_v52 = vmul.f32 %v1300_v1, %v1296_v11  ;;  %v1308_v60 = vmul.f32 %v1307_v55, %v1296_v11  ;;  %v1364_v35 = vsel %vm1358_vm4, %v1351_v56, 920167782  ;;  %v2583_v28 = vand.u32 2139095040, %v4814_v13 }
 0x297   : > { %v4847_v15 = vsub.s32 %v2523_v16, %v2526_v10  ;;  %vm1355_vm6 = vcmp.lt.s32.totalorder %v4811_v5, 1  ;;  %vm1357_vm7 = vcmp.lt.s32.totalorder %v4811_v5, 3  ;;  %v2580_v39 = vand.u32 2147483647, %v4814_v13 }
 0x298   : > { %v1302_v34 = vadd.f32 1.0, %v1301_v52  ;;  %v1309_v38 = vadd.f32 1.0, %v1308_v60  ;;  %v1363_v30 = vsel %vm1355_vm6, %v4835_v9, %v4839_v58  ;;  %v1365_v17 = vsel %vm1357_vm7, %v1348_v43, %v1364_v35 }
 0x299   : > { %vm2528_vm8 = vcmp.lt.s32.totalorder %v4847_v15, 0  ;;  %v2529_v40 = vsub.s32 0, %v4847_v15  ;;  %v1367_v11 = vsel %vm1355_vm6, %v4839_v58, %v1348_v43  ;;  %vm1356_vm9 = vcmp.lt.s32.totalorder %v4811_v5, 2 }
 0x29a   : > { %v1310_v18 = vmul.f32 %v1309_v38, %v1294_v37  ;;  %v1319_v7 = vxor.u32 2147483648, %v1302_v34  ;;  %v1368_v6 = vsel %vm1358_vm4, %v1354_v26, 1326507024  ;;  %v1372_v29 = vand.u32 65535, %v4844_v59 }
 0x29b   : > { %v2530_v27 = vsel %vm2528_vm8, %v2529_v40, %v4847_v15  ;;  %v1366_v37 = vsel %vm1356_vm9, %v1363_v30, %v1365_v17  ;;  %v1369_v16 = vsel %vm1357_vm7, %v1351_v56, %v1368_v6  ;;  %v1373_v22 = vshrl.u32 %v4844_v59, 16 }
 0x29c   : > { %v1316_v50 = vxor.u32 2147483648, %v1310_v18  ;;  %v2531_v47 = vclz %v2530_v27  ;;  %v1320_v49 = vsel %vm1318_vm1, %v1319_v7, %v1310_v18  ;;  %v1370_v54 = vsel %vm1356_vm9, %v1367_v11, %v1369_v16 }
 0x29d   : > { %v2584_v19 = vshrl.u32 %v2583_v28, 23  ;;  %v1374_v57 = vand.u32 65535, %v1370_v54  ;;  %v1375_v25 = vshrl.u32 %v1370_v54, 16  ;;  %v1339_v23 = vshrl.u32 %v3016_v44, %v4807_v31 }
 0x29e   : > { %v1317_v33 = vsel %vm1315_vm2, %v1302_v34, %v1316_v50  ;;  %v2877_v61 = vadd.s32 4294967294, %v2531_v47  ;;  %v1396_v20 = vand.u32 65535, %v1366_v37  ;;  %v1397_v8 = vshrl.u32 %v1366_v37, 16 }
 0x29f   : > { %v1321_v32 = vsel %vm1314_vm3, %v1317_v33, %v1320_v49  ;;  %v2549_v41 = vsub.s32 4, %v4827_v24  ;;  %v1377_v56 = vmul.u32 %v1375_v25, %v1372_v29  ;;  %v1360_v1 = vsel %vm1358_vm4, %v1348_v43, 2102212464 }
 0x2a0   : > { %v1322_v36 = vsel %vm1311_vm5, nan, %v1321_v32  ;;  %vm2878_vm10 = vcmp.lt.s32.totalorder %v2877_v61, 0  ;;  %v1378_v55 = vmul.u32 %v1374_v57, %v1373_v22  ;;  %v1399_v21 = vmul.u32 %v1397_v8, %v1372_v29 }
 0x2a1   : > { %v2534_v4 = vsel %vm2878_vm10, 0, %v2877_v61  ;;  %2741 = vst [vmem:[%s3456_s25 + $0x30] sm:$0xff] %v1322_v36  ;;  %vm2427_vm12 = vcmp.lt.s32.totalorder %v4557_v45, 0  ;;  %v1376_v42 = vmul.u32 %v1374_v57, %v1372_v29  ;;  %v1380_v52 = vshll.u32 %v1377_v56, 16 }
 0x2a2   : > { %v2535_v10 = vsub.s32 32, %v2534_v4  ;;  %v2539_v31 = vsub.s32 4294967266, %v2534_v4  ;;  %v2536_v14 = vshll.u32 %v4847_v15, %v2534_v4  ;;  %v1379_v60 = vmul.u32 %v1375_v25, %v1373_v22 }
 0x2a3   : > { %v1382_v26 = vshll.u32 %v1378_v55, 16  ;;  %v1400_v35 = vmul.u32 %v1396_v20, %v1373_v22  ;;  %vm1384_vm11 = vc.u32 %v1376_v42, %v1380_v52  ;;  %v1386_v38 = vadd.s32 %v1380_v52, %v1376_v42 }
 0x2a4   : > { %v2537_v28 = vshrl.u32 %v4833_v63, %v2535_v10  ;;  %v2540_v34 = vadd.s32 127, %v2539_v31  ;;  %v1385_v43 = vsel %vm1384_vm11, 1, %v3014_v3  ;;  %v1398_v40 = vmul.u32 %v1396_v20, %v1372_v29 }
 0x2a5   : > { %v1401_v30 = vmul.u32 %v1397_v8, %v1373_v22  ;;  %v1402_v17 = vshll.u32 %v1399_v21, 16  ;;  %v1387_v11 = vadd.s32 %v1385_v43, %v1379_v60  ;;  %vm1388_vm13 = vc.u32 %v1386_v38, %v1382_v26 }
 0x2a6   : > { %v2538_v18 = vor.u32 %v2537_v28, %v2536_v14  ;;  %v2541_v7 = vshll.u32 %v2540_v34, 23  ;;  %v1389_v27 = vsel %vm1388_vm13, 1, %v3014_v3  ;;  %v1404_v15 = vshll.u32 %v1400_v35, 16 }
 0x2a7   : > { %vm1406_vm14 = vc.u32 %v1398_v40, %v1402_v17  ;;  %v1408_v6 = vadd.s32 %v1402_v17, %v1398_v40  ;;  %v1381_v47 = vshrl.u32 %v1377_v56, 16  ;;  %v1391_v63 = vadd.s32 %v1389_v27, %v1387_v11 }
 0x2a8   : > { %v2542_v50 = vor.u32 4788187, %v2541_v7  ;;  %v1407_v37 = vsel %vm1406_vm14, 1, %v3014_v3  ;;  %v2545_v16 = vcvt.s32.f32 %v2538_v18  ;;  %v1383_v49 = vshrl.u32 %v1378_v55, 16 }
 0x2a9   : > { %v1409_v54 = vadd.s32 %v1407_v37, %v1401_v30  ;;  %vm1410_vm15 = vc.u32 %v1408_v6, %v1404_v15  ;;  %v1392_v22 = vadd.s32 %v1391_v63, %v1381_v47  ;;  %v2879_v61 = vadd.s32 4294967169, %v2584_v19 }
 0x2aa   : > { %v2543_v29 = vand.u32 2147483647, %v2542_v50  ;;  %v1411_v33 = vsel %vm1410_vm15, 1, %v3014_v3  ;;  %v2550_v57 = vsel %vm2427_vm12, %v2549_v41, %v4827_v24  ;;  %v1359_v25 = vsel %vm1355_vm6, %v1339_v23, %v4835_v9 }
 0x2ab   : > { %v1403_v32 = vshrl.u32 %v1399_v21, 16  ;;  %v1413_v20 = vadd.s32 %v1411_v33, %v1409_v54  ;;  %v1361_v36 = vsel %vm1357_vm7, %v4839_v58, %v1360_v1  ;;  %v4908_v56 = vadd.s32 %v1392_v22, %v1383_v49 }
 0x2ac   : > { %v2546_v8 = vmul.f32 %v2545_v16, %v2543_v29  ;;  %v2590_v4 = vadd.s32 1, %v2879_v61  ;;  %v1405_v55 = vshrl.u32 %v1400_v35, 16  ;;  %vm4912_vm0 = vcmp.le.f32.partialorder %v2425_v12, 0.7853982 }
 0x2ad   : > { %v1414_v19 = vadd.s32 %v1413_v20, %v1403_v32  ;;  %v4916_v9 = vadd.s32 %v1408_v6, %v1404_v15  ;;  %v2552_v23 = vsel %vm4912_vm0, 0, %v2550_v57  ;;  %v1362_v58 = vsel %vm1356_vm9, %v1359_v25, %v1361_v36 }
 0x2ae   : > { %v2547_v41 = vxor.u32 2147483648, %v2546_v8  ;;  %vm2591_vm1 = vcmp.gt.s32.totalorder %v2590_v4, 0  ;;  %v2587_v12 = vand.u32 8388607, %v2580_v39  ;;  %v1416_v5 = vmul.u32 %v4844_v59, %v1362_v58 }
 0x2af   : > { %v1415_v1 = vadd.s32 %v1414_v19, %v1405_v55  ;;  %v2592_v21 = vsel %vm2591_vm1, %v2590_v4, 0  ;;  %vm1418_vm2 = vc.u32 %v4908_v56, %v4916_v9  ;;  %v2569_v26 = vadd.s32 3, %v2552_v23 }
 0x2b0   : > { %v2548_v10 = vsel %vm2427_vm12, %v2547_v41, %v2546_v8  ;;  %v2594_v31 = vand.u32 31, %v2592_v21  ;;  %v2588_v43 = vor.u32 8388608, %v2587_v12  ;;  %v4934_v40 = vshrl.u32 %v2592_v21, 5 }
 0x2b1   : > { %v2551_v42 = vsel %vm4912_vm0, %v4557_v45, %v2548_v10  ;;  %v1419_v52 = vadd.s32 1, %v1415_v1  ;;  %vm2568_vm5 = vweird.f32 %v4557_v45  ;;  %vm1325_vm1 = vcmp.lt.s32.totalorder %v4730_v0, 0 }
 0x2b2   : > { %v2553_v14 = vmul.f32 %v2551_v42, %v2551_v42  ;;  %v4932_v60 = vsub.s32 32, %v2594_v31  ;;  %v2606_v27 = vshll.u32 %v3019_v51, %v2594_v31  ;;  %v2600_v6 = vshll.u32 %v3017_v46, %v2594_v31 }
 0x2b3   : > { %v1420_v35 = vsel %vm1418_vm2, %v1419_v52, %v1415_v1  ;;  %v2603_v50 = vshll.u32 %v3018_v48, %v2594_v31  ;;  %v2597_v54 = vshll.u32 %v3016_v44, %v2594_v31  ;;  %v2609_v22 = vshll.u32 %v3020_v53, %v2594_v31 }
 0x2b4   : > { %v2554_v28 = vmul.f32 -0.001358992, %v2553_v14  ;;  %v2561_v34 = vmul.f32 -0.00019511016, %v2553_v14  ;;  %v1421_v38 = vadd.s32 %v1420_v35, %v1416_v5  ;;  %v2601_v30 = vshrl.u32 %v3018_v48, %v4932_v60 }
 0x2b5   : > { %v2604_v17 = vshrl.u32 %v3019_v51, %v4932_v60  ;;  %v2607_v18 = vshrl.u32 %v3020_v53, %v4932_v60  ;;  %v2598_v15 = vshrl.u32 %v3017_v46, %v4932_v60  ;;  %v2610_v47 = vshrl.u32 %v3021_v62, %v4932_v60 }
 0x2b6   : > { %v2555_v59 = vadd.f32 0.041655596, %v2554_v28  ;;  %v2562_v7 = vadd.f32 0.008332121, %v2561_v34  ;;  %v1422_v11 = vadd.s32 536870912, %v1421_v38  ;;  %v4952_v29 = vor.u32 %v2601_v30, %v2600_v6 }
 0x2b7   : > { %v2608_v49 = vor.u32 %v2607_v18, %v2606_v27  ;;  %v4954_v51 = vor.u32 %v2604_v17, %v2603_v50  ;;  %v4958_v61 = vor.u32 %v2598_v15, %v2597_v54  ;;  %v2611_v62 = vor.u32 %v2610_v47, %v2609_v22 }
 0x2b8   : > { %v2556_v63 = vmul.f32 %v2555_v59, %v2553_v14  ;;  %v2563_v37 = vmul.f32 %v2562_v7, %v2553_v14  ;;  %v4949_v16 = vshrl.u32 %v1422_v11, 30  ;;  %vm2612_vm3 = vcmp.lt.s32.totalorder %v4934_v40, 1 }
 0x2b9   : > { %vm2615_vm4 = vcmp.lt.s32.totalorder %v4934_v40, 4  ;;  %v2570_v53 = vand.u32 3, %v2569_v26  ;;  %vm2614_vm6 = vcmp.lt.s32.totalorder %v4934_v40, 3  ;;  %v2624_v8 = vsel %vm2612_vm3, %v4952_v29, %v4954_v51 }
 0x2ba   : > { %v2557_v33 = vadd.f32 -0.4999988, %v2556_v63  ;;  %v2564_v46 = vadd.f32 -0.16666654, %v2563_v37  ;;  %v1424_v48 = vshll.u32 %v4949_v16, 30  ;;  %v4970_v36 = vshll.u32 %v2588_v43, 8 }
 0x2bb   : > { %v2621_v20 = vsel %vm2615_vm4, %v2608_v49, 920167782  ;;  %vm2613_vm8 = vcmp.lt.s32.totalorder %v4934_v40, 2  ;;  %v2620_v24 = vsel %vm2612_vm3, %v4958_v61, %v4952_v29  ;;  %v2625_v23 = vsel %vm2615_vm4, %v2611_v62, 1326507024 }
 0x2bc   : > { %v2558_v57 = vmul.f32 %v2557_v33, %v2553_v14  ;;  %v2565_v25 = vmul.f32 %v2564_v46, %v2553_v14  ;;  %v1425_v32 = vsub.s32 %v1421_v38, %v1424_v48  ;;  %v2622_v41 = vsel %vm2614_vm6, %v4954_v51, %v2621_v20 }
 0x2bd   : > { %v2626_v10 = vsel %vm2614_vm6, %v2608_v49, %v2625_v23  ;;  %v2629_v52 = vand.u32 65535, %v4970_v36  ;;  %v2630_v14 = vshrl.u32 %v4970_v36, 16  ;;  %v2623_v26 = vsel %vm2613_vm8, %v2620_v24, %v2622_v41 }
 0x2be   : > { %v2559_v4 = vadd.f32 1.0, %v2558_v57  ;;  %v2566_v55 = vadd.f32 1.0, %v2565_v25  ;;  %vm1426_vm7 = vcmp.lt.s32.totalorder %v1425_v32, 0  ;;  %v1427_v19 = vsub.s32 0, %v1425_v32 }
 0x2bf   : > { %v2627_v31 = vsel %vm2613_vm8, %v2624_v8, %v2626_v10  ;;  %vm2571_vm9 = vcmp.lt.s32.totalorder %v2570_v53, 2  ;;  %vm2572_vm10 = vcmp.eq.s32.totalorder %v2570_v53, 0  ;;  %vm2575_vm12 = vcmp.eq.s32.totalorder %v2570_v53, 2 }
 0x2c0   : > { %v2567_v58 = vmul.f32 %v2566_v55, %v2551_v42  ;;  %v2576_v1 = vxor.u32 2147483648, %v2559_v4  ;;  %v1428_v21 = vsel %vm1426_vm7, %v1427_v19, %v1425_v32  ;;  %v2631_v35 = vand.u32 65535, %v2627_v31 }
 0x2c1   : > { %v1429_v12 = vclz %v1428_v21  ;;  %v2632_v28 = vshrl.u32 %v2627_v31, 16  ;;  %v2653_v18 = vand.u32 65535, %v2623_v26  ;;  %v2654_v59 = vshrl.u32 %v2623_v26, 16 }
 0x2c2   : > { %v2573_v5 = vxor.u32 2147483648, %v2567_v58  ;;  %v2577_v38 = vsel %vm2575_vm12, %v2576_v1, %v2567_v58  ;;  %v2635_v30 = vmul.u32 %v2631_v35, %v2630_v14  ;;  %v2633_v27 = vmul.u32 %v2631_v35, %v2629_v52 }
 0x2c3   : > { %v2856_v42 = vadd.s32 4294967294, %v1429_v12  ;;  %v2634_v43 = vmul.u32 %v2632_v28, %v2629_v52  ;;  %v1417_v6 = vadd.s32 %v4916_v9, %v4908_v56  ;;  %v2636_v63 = vmul.u32 %v2632_v28, %v2630_v14 }
 0x2c4   : > { %v2574_v34 = vsel %vm2572_vm10, %v2559_v4, %v2573_v5  ;;  %v2639_v49 = vshll.u32 %v2635_v30, 16  ;;  %v2656_v45 = vmul.u32 %v2654_v59, %v2629_v52  ;;  %v2655_v62 = vmul.u32 %v2653_v18, %v2629_v52 }
 0x2c5   : > { %v2578_v17 = vsel %vm2571_vm9, %v2574_v34, %v2577_v38  ;;  %vm2857_vm11 = vcmp.lt.s32.totalorder %v2856_v42, 0  ;;  %v2637_v15 = vshll.u32 %v2634_v43, 16  ;;  %v2657_v57 = vmul.u32 %v2653_v18, %v2630_v14 }
 0x2c6   : > { %v2579_v7 = vsel %vm2568_vm5, nan, %v2578_v17  ;;  %v1432_v11 = vsel %vm2857_vm11, 0, %v2856_v42  ;;  %v2659_v9 = vshll.u32 %v2656_v45, 16  ;;  %v2638_v53 = vshrl.u32 %v2634_v43, 16 }
 0x2c7   : > { %2749 = vst [vmem:[%s3456_s25 + $0x70] sm:$0xff] %v2579_v7  ;;  %v1433_v50 = vsub.s32 32, %v1432_v11  ;;  %v1437_v47 = vsub.s32 4294967266, %v1432_v11  ;;  %v1434_v37 = vshll.u32 %v1425_v32, %v1432_v11  ;;  %vm2641_vm13 = vc.u32 %v2633_v27, %v2637_v15 }
 0x2c8   : > { %v2643_v54 = vadd.s32 %v2637_v15, %v2633_v27  ;;  %v2642_v46 = vsel %vm2641_vm13, 1, %v3014_v3  ;;  %v2658_v32 = vmul.u32 %v2654_v59, %v2630_v14  ;;  %v2661_v55 = vshll.u32 %v2657_v57, 16 }
 0x2c9   : > { %v1435_v22 = vshrl.u32 %v1417_v6, %v1433_v50  ;;  %v1438_v33 = vadd.s32 127, %v1437_v47  ;;  %v2644_v48 = vadd.s32 %v2642_v46, %v2636_v63  ;;  %vm2663_vm15 = vc.u32 %v2655_v62, %v2659_v9 }
 0x2ca   : > { %vm2645_vm14 = vc.u32 %v2643_v54, %v2639_v49  ;;  %v2665_v19 = vadd.s32 %v2659_v9, %v2655_v62  ;;  %v2617_v24 = vsel %vm2615_vm4, %v4954_v51, 2102212464  ;;  %v2664_v23 = vsel %vm2663_vm15, 1, %v3014_v3 }
 0x2cb   : > { %v1436_v25 = vor.u32 %v1435_v22, %v1434_v37  ;;  %v1439_v20 = vshll.u32 %v1438_v33, 23  ;;  %v2646_v56 = vsel %vm2645_vm14, 1, %v3014_v3  ;;  %v2666_v21 = vadd.s32 %v2664_v23, %v2658_v32 }
 0x2cc   : > { %v2648_v8 = vadd.s32 %v2646_v56, %v2644_v48  ;;  %vm2667_vm0 = vc.u32 %v2665_v19, %v2661_v55  ;;  %v2596_v10 = vshrl.u32 %v3016_v44, %v4932_v60  ;;  %v2640_v12 = vshrl.u32 %v2635_v30, 16 }
 0x2cd   : > { %v1440_v4 = vor.u32 4788187, %v1439_v20  ;;  %v1443_v1 = vcvt.s32.f32 %v1436_v25  ;;  %v2668_v31 = vsel %vm2667_vm0, 1, %v3014_v3  ;;  %v2660_v14 = vshrl.u32 %v2656_v45, 16 }
 0x2ce   : > { %v2649_v41 = vadd.s32 %v2648_v8, %v2638_v53  ;;  %v2670_v5 = vadd.s32 %v2668_v31, %v2666_v21  ;;  %v2616_v51 = vsel %vm2612_vm3, %v2596_v10, %v4958_v61  ;;  %v2618_v26 = vsel %vm2614_vm6, %v4952_v29, %v2617_v24 }
 0x2cf   : > { %v1441_v58 = vand.u32 2147483647, %v1440_v4  ;;  %v2662_v42 = vshrl.u32 %v2657_v57, 16  ;;  %v2669_v44 = vadd.s32 %v2665_v19, %v2661_v55  ;;  %vm5013_vm2 = vcmp.le.f32.partialorder %v1323_v2, 0.7853982 }
 0x2d0   : > { %v2650_v35 = vadd.s32 %v2649_v41, %v2640_v12  ;;  %v2671_v34 = vadd.s32 %v2670_v5, %v2660_v14  ;;  %v2619_v61 = vsel %vm2613_vm8, %v2616_v51, %v2618_v26  ;;  %v1447_v29 = vsub.s32 4, %v4949_v16 }
 0x2d1   : > { %v1444_v52 = vmul.f32 %v1443_v1, %v1441_v58  ;;  %v2673_v18 = vmul.u32 %v4970_v36, %v2619_v61  ;;  %vm1466_vm8 = vweird.f32 %v4730_v0  ;;  %vm2582_vm10 = vcmp.lt.s32.totalorder %v4814_v13, 0 }
 0x2d2   : > { %v2672_v38 = vadd.s32 %v2671_v34, %v2662_v42  ;;  %vm2675_vm3 = vc.u32 %v2650_v35, %v2669_v44  ;;  %v1448_v11 = vsel %vm1325_vm1, %v1447_v29, %v4949_v16  ;;  %v2674_v41 = vadd.s32 %v2669_v44, %v2650_v35 }
 0x2d3   : > { %v1445_v28 = vxor.u32 2147483648, %v1444_v52  ;;  %v1450_v50 = vsel %vm5013_vm2, 0, %v1448_v11  ;;  %vm2581_vm12 = vcmp.le.f32.partialorder %v2580_v39, 0.7853982  ;;  %vm2723_vm15 = vweird.f32 %v4814_v13 }
 0x2d4   : > { %v2676_v17 = vadd.s32 1, %v2672_v38  ;;  %v1467_v22 = vadd.s32 3, %v1450_v50 }
 0x2d5   : > { %v1446_v60 = vsel %vm1325_vm1, %v1445_v28, %v1444_v52 }
 0x2d6   : > { %v1449_v43 = vsel %vm5013_vm2, %v4730_v0, %v1446_v60  ;;  %v2677_v7 = vsel %vm2675_vm3, %v2676_v17, %v2672_v38  ;;  %v1468_v16 = vand.u32 3, %v1467_v22 }
 0x2d7   : > { %v1451_v30 = vmul.f32 %v1449_v43, %v1449_v43  ;;  %v2678_v27 = vadd.s32 %v2677_v7, %v2673_v18 }
 0x2d8   : > { %vm1470_vm5 = vcmp.eq.s32.totalorder %v1468_v16, 0  ;;  %vm1473_vm6 = vcmp.eq.s32.totalorder %v1468_v16, 2  ;;  %vm1469_vm7 = vcmp.lt.s32.totalorder %v1468_v16, 2 }
 0x2d9   : > { %v1452_v2 = vmul.f32 -0.001358992, %v1451_v30  ;;  %v1459_v59 = vmul.f32 -0.00019511016, %v1451_v30  ;;  %v2679_v6 = vadd.s32 536870912, %v2678_v27 }
 0x2db   : > { %v1453_v40 = vadd.f32 0.041655596, %v1452_v2  ;;  %v1460_v15 = vadd.f32 0.008332121, %v1459_v59  ;;  %v2680_v37 = vshrl.u32 %v2679_v6, 30 }
 0x2dd   : > { %v1454_v47 = vmul.f32 %v1453_v40, %v1451_v30  ;;  %v1461_v63 = vmul.f32 %v1460_v15, %v1451_v30  ;;  %v2681_v33 = vshll.u32 %v2680_v37, 30  ;;  %v2704_v35 = vsub.s32 4, %v2680_v37 }
 0x2df   : > { %v1455_v49 = vadd.f32 -0.4999988, %v1454_v47  ;;  %v1462_v54 = vadd.f32 -0.16666654, %v1461_v63  ;;  %v2682_v45 = vsub.s32 %v2678_v27, %v2681_v33  ;;  %v2705_v3 = vsel %vm2582_vm10, %v2704_v35, %v2680_v37 }
 0x2e0   : > { %v2707_v38 = vsel %vm2581_vm12, 0, %v2705_v3 }
 0x2e1   : > { %v1456_v36 = vmul.f32 %v1455_v49, %v1451_v30  ;;  %v1463_v46 = vmul.f32 %v1462_v54, %v1451_v30  ;;  %vm2683_vm4 = vcmp.lt.s32.totalorder %v2682_v45, 0  ;;  %v2684_v57 = vsub.s32 0, %v2682_v45 }
 0x2e2   : > { %v2724_v18 = vadd.s32 3, %v2707_v38 }
 0x2e3   : > { %v1457_v48 = vadd.f32 1.0, %v1456_v36  ;;  %v1464_v62 = vadd.f32 1.0, %v1463_v46  ;;  %v2685_v56 = vsel %vm2683_vm4, %v2684_v57, %v2682_v45 }
 0x2e4   : > { %v2686_v53 = vclz %v2685_v56  ;;  %v2725_v11 = vand.u32 3, %v2724_v18 }
 0x2e5   : > { %v1465_v25 = vmul.f32 %v1464_v62, %v1449_v43  ;;  %v1474_v20 = vxor.u32 2147483648, %v1457_v48 }
 0x2e6   : > { %v2880_v4 = vadd.s32 4294967294, %v2686_v53  ;;  %vm2727_vm11 = vcmp.eq.s32.totalorder %v2725_v11, 0  ;;  %vm2730_vm13 = vcmp.eq.s32.totalorder %v2725_v11, 2  ;;  %vm2726_vm14 = vcmp.lt.s32.totalorder %v2725_v11, 2 }
 0x2e7   : > { %v1471_v9 = vxor.u32 2147483648, %v1465_v25  ;;  %v1475_v32 = vsel %vm1473_vm6, %v1474_v20, %v1465_v25 }
 0x2e8   : > { %vm2881_vm9 = vcmp.lt.s32.totalorder %v2880_v4, 0 }
 0x2e9   : > { %v1472_v8 = vsel %vm1470_vm5, %v1457_v48, %v1471_v9  ;;  %v2689_v24 = vsel %vm2881_vm9, 0, %v2880_v4 }
 0x2ea   : > { %v1476_v55 = vsel %vm1469_vm7, %v1472_v8, %v1475_v32  ;;  %v2690_v23 = vsub.s32 32, %v2689_v24  ;;  %v2694_v58 = vsub.s32 4294967266, %v2689_v24  ;;  %v2691_v1 = vshll.u32 %v2682_v45, %v2689_v24 }
 0x2eb   : > { %v1477_v19 = vsel %vm1466_vm8, nan, %v1476_v55 }
 0x2ec   : > { %2742 = vst [vmem:[%s3456_s25 + $0x38] sm:$0xff] %v1477_v19  ;;  %v2692_v21 = vshrl.u32 %v2674_v41, %v2690_v23  ;;  %v2695_v10 = vadd.s32 127, %v2694_v58 }
 0x2ee   : > { %v2693_v12 = vor.u32 %v2692_v21, %v2691_v1  ;;  %v2696_v31 = vshll.u32 %v2695_v10, 23 }
 0x2f0   : > { %v2697_v52 = vor.u32 4788187, %v2696_v31  ;;  %v2700_v5 = vcvt.s32.f32 %v2693_v12 }
 0x2f2   : > { %v2698_v14 = vand.u32 2147483647, %v2697_v52 }
 0x2f4   : > { %v2701_v51 = vmul.f32 %v2700_v5, %v2698_v14 }
 0x2f6   : > { %v2702_v26 = vxor.u32 2147483648, %v2701_v51 }
 0x2f8   : > { %v2703_v0 = vsel %vm2582_vm10, %v2702_v26, %v2701_v51 }
 0x2f9   : > { %v2706_v28 = vsel %vm2581_vm12, %v4814_v13, %v2703_v0 }
 0x2fa   : > { %v2708_v42 = vmul.f32 %v2706_v28, %v2706_v28 }
 0x2fc   : > { %v2709_v34 = vmul.f32 -0.001358992, %v2708_v42  ;;  %v2716_v44 = vmul.f32 -0.00019511016, %v2708_v42 }
 0x2fe   : > { %v2710_v60 = vadd.f32 0.041655596, %v2709_v34  ;;  %v2717_v61 = vadd.f32 0.008332121, %v2716_v44 }
 0x300   : > { %v2711_v29 = vmul.f32 %v2710_v60, %v2708_v42  ;;  %v2718_v43 = vmul.f32 %v2717_v61, %v2708_v42 }
 0x302   : > { %v2712_v30 = vadd.f32 -0.4999988, %v2711_v29  ;;  %v2719_v17 = vadd.f32 -0.16666654, %v2718_v43 }
 0x304   : > { %v2713_v39 = vmul.f32 %v2712_v30, %v2708_v42  ;;  %v2720_v2 = vmul.f32 %v2719_v17, %v2708_v42 }
 0x306   : > { %v2714_v59 = vadd.f32 1.0, %v2713_v39  ;;  %v2721_v7 = vadd.f32 1.0, %v2720_v2 }
 0x308   : > { %v2722_v27 = vmul.f32 %v2721_v7, %v2706_v28  ;;  %v2731_v40 = vxor.u32 2147483648, %v2714_v59 }
 0x30a   : > { %v2728_v15 = vxor.u32 2147483648, %v2722_v27  ;;  %v2732_v50 = vsel %vm2730_vm13, %v2731_v40, %v2722_v27 }
 0x30c   : > { %v2729_v6 = vsel %vm2727_vm11, %v2714_v59, %v2728_v15 }
 0x30d   : > { %v2733_v47 = vsel %vm2726_vm14, %v2729_v6, %v2732_v50 }
 0x30e   : > { %v2734_v63 = vsel %vm2723_vm15, nan, %v2733_v47 }
 0x30f   : > { %2750 = vst [vmem:[%s3456_s25 + $0x78] sm:$0xff] %v2734_v63 }
 0x310   : > { %2977 = shalt.err (!%p2974_p3)
}
 0x311   : > { %s3022_s17 = smov 128   ;;  %s3023_s21 = smov 256  }
 0x312   : > { %s3024_s22 = smov 8  }
 0x313   : > { %2886 = dma.vmem_to_hbm [thread:$0]  (%p3078_p5), %s5038_s30, 2048, %s2766_s3, %s2752_s13, %s3022_s17, %s3023_s21, %s3024_s22  }
 0x314 PF: > { %p2892_p4 = scmp.ge.s32.totalorder %s3012_s12, 2  ;;  %s2780_s23 = sand.u32 1, %s3000_s9  }
 0x315   : > { %s2781_s24 = scalar_lea.sflag [#allocation3], %s2780_s23 }
 0x316   : > { %p2889_p7 = pnand %p2892_p4, %p3082_p6 }
 0x318   : > { %p2890_p8 = pneg %p2889_p7 }
 0x31a   : > { %2995 = dma.done.wait (%p2890_p8), %s2781_s24, 2048  }
 0x31b   : > { %2997 = vsyncadd (%p2890_p8), %s2781_s24, 4294965248  ;;  %p12_p9 = scmp.ge.s32.totalorder %s3065_s15, 4   ;;  %s5107_s9 = smov %s3004_s10 }
 0x31c   : > { %s5108_s10 = smov %s3008_s11  ;;  %s5109_s11 = smov %s3076_s18 }
 0x31d   : > { %s5110_s12 = smov %s3065_s15  ;;  %14 = sbr.rel (!%p12_p9) target bundleno = 3 (0x3), region = 63 }
 0x322   :  { %2787 = vsyncpa [#allocation3], 1 }
 0x323   :  { %2789 = vsyncpa [#allocation3 + $0x1], 1 }

</bundles_post_ra>
